<compile_context>
chip_gen: v7x
topology: tpu7x:2x2x1
jax: 0.10.0
libtpu: 0.0.40
codegen_flags: <defaults>
</compile_context>

<pallas_src>
import numpy as np
import jax
import jax.numpy as jnp
from jax.experimental import pallas as pl
from jax.experimental.pallas import tpu as pltpu

STEFAN_BOLTZMANN_CONSTANT = 5.67e-08

X_DIM = 8          # covariate dimension
HIDDEN = 32        # hidden_dim (kept small for the example; module default is 256)
PISZ = 8           # propensity embedding size
NH = 32            # quantile-embedding size (self.nh)
PW = 128           # working lane width (one full vreg lane group)
NDEPTH = 8         # serial dot count == network depth
OUT_COLS = 6       # packed output columns: [y0, y1, pi1, te0, te1, mu]

# Column ranges inside the 128-lane working activation (per depth, see pack_params):
C_X = (0, 8)        # raw covariates (in xin and in the depth-2 input)
C_PI = (8, 16)      # propensity embedding (depth-1 output, no relu)
C_TE_H = (16, 48)   # te-trunk hidden (depths 0-1)
C_MU_H = (16, 48)   # mu-path hidden (depths 2-6)
C_TEHID = (48, 80)  # te_hid / te1 hidden (depths 2-4)
C_Z = 48            # treatment column inside xin (weight rows there are all zero)
C_EPS = 49          # reparameterized-noise column inside xin


def treatment_effect_kernel(xin_ref, tau_ref, w_ref, b_ref, out_ref):
    lane = jax.lax.broadcasted_iota(jnp.int32, (1, PW), 1)

    def dot(h, d):
        return jnp.dot(h, w_ref[d], preferred_element_type=jnp.float32) + b_ref[d]

    xin = xin_ref[...]        # (tb, 128): cols 0:8 = x, col 48 = z, col 49 = eps
    tau_row = tau_ref[...]    # (1, 128):  cols 48:80 = relu(tau embed), 1 elsewhere

    # depth 0: x -> [pi hidden (0:16) | te hidden0 (16:48)]; both branches ReLU.
    a0 = jnp.maximum(dot(xin, 0), 0.0)
    # depth 1: pi hidden -> pi (cols 8:16, linear) | te hidden0 -> te hidden1 (relu).
    h1 = dot(a0, 1)
    a1 = jnp.where(lane >= C_PI[1], jnp.maximum(h1, 0.0), h1)
    in2 = a1 + xin            # drops x into cols 0:8; z/eps at cols 48/49 are inert
    # depth 2: pi1 hidden (0:16) | mu hidden0 from cat(x, pi) (16:48) | te_hid (48:80).
    h2 = dot(in2, 2)
    in3 = jnp.where(lane < C_TEHID[0], jnp.maximum(h2, 0.0), h2) * tau_row
    # depth 3: pi1 out (col 0) | mu hidden1 (16:48) | te1 hidden0 (48:80).
    h3 = dot(in3, 3)
    pi1 = h3[:, 0:1]
    a3 = jnp.maximum(h3, 0.0)                 # col 0 corrupted -> unused downstream
    # depth 4: mu_hid (linear, 16:48) | te1 hidden1 (relu, 48:80).
    h4 = dot(a3, 4)
    a4 = jnp.where(lane >= C_TEHID[0], jnp.maximum(h4, 0.0), h4)
    # depth 5: mu1 hidden0 (relu, 16:48) | te out (cols 0:2).
    h5 = dot(a4, 5)
    te = h5[:, 0:2]
    a5 = jnp.maximum(h5, 0.0)                 # cols 0:2 corrupted -> unused downstream
    # depths 6-7: mu1 hidden1, mu out (col 0).
    a6 = jnp.maximum(dot(a5, 6), 0.0)
    mu = dot(a6, 7)[:, 0:1]

    # Stefan-Boltzmann radiation noise, reparameterized with eps ~ N(0, 1).
    # TODO(synk): torch.normal sampling is reparameterized as mean + 0.1*mean*eps
    # with eps supplied by the caller (no in-kernel RNG).
    temperature = xin[:, 0:1]
    z = xin[:, C_Z:C_Z + 1]
    eps = xin[:, C_EPS:C_EPS + 1]
    sb = STEFAN_BOLTZMANN_CONSTANT * temperature ** 4
    noise = sb + 0.1 * sb * eps

    y = mu + te * z + noise                   # (tb, 2)

    # Single lane-packed (tb, 6) store: [y0, y1, pi1, te0, te1, mu].
    out_ref[...] = jnp.concatenate([y, pi1, te, mu], axis=1)


def init_params(key):
    """Deterministic PyTorch-style uniform(-1/sqrt(fan_in), 1/sqrt(fan_in)) init.
    Weights are stored transposed as (in, out); biases as (1, out)."""
    layer_shapes = [
        (X_DIM, 16), (16, PISZ),                    # pi
        (PISZ, 16), (16, 1),                        # pi1
        (X_DIM + PISZ, 32), (32, 32), (32, HIDDEN), # mu
        (HIDDEN, 32), (32, 32), (32, 1),            # mu1
        (X_DIM, 32), (32, 32), (32, HIDDEN),        # te
        (HIDDEN, 32), (32, 32), (32, 2),            # te1
        (NH, HIDDEN),                               # tau
    ]
    params = []
    keys = jax.random.split(key, 2 * len(layer_shapes))
    for li, (fan_in, fan_out) in enumerate(layer_shapes):
        bound = 1.0 / jnp.sqrt(jnp.float32(fan_in))
        w = jax.random.uniform(keys[2 * li], (fan_in, fan_out), jnp.float32,
                               minval=-bound, maxval=bound)
        b = jax.random.uniform(keys[2 * li + 1], (1, fan_out), jnp.float32,
                               minval=-bound, maxval=bound)
        params += [w, b]
    return tuple(params)


def pack_params(params):
    """Pack the 16 trunk/head (w, b) pairs block-diagonally BY DEPTH into an
    (NDEPTH, 128, 128) weight stack and an (NDEPTH, 1, 128) bias stack.  All padding
    is exact zero, so unused lanes stay zero.  The tau head stays separate
    (hoisted to the wrapper)."""
    assert HIDDEN == 32 and NH == 32
    (pi_w0, pi_b0, pi_w1, pi_b1,
     pi1_w0, pi1_b0, pi1_w1, pi1_b1,
     mu_w0, mu_b0, mu_w1, mu_b1, mu_w2, mu_b2,
     mu1_w0, mu1_b0, mu1_w1, mu1_b1, mu1_w2, mu1_b2,
     te_w0, te_b0, te_w1, te_b1, te_w2, te_b2,
     te1_w0, te1_b0, te1_w1, te1_b1, te1_w2, te1_b2,
     tau_w, tau_b) = params

    W = np.zeros((NDEPTH, PW, PW), np.float32)
    Bv = np.zeros((NDEPTH, 1, PW), np.float32)

    def put(d, w, b, row_off, col_off):
        w = np.asarray(w, np.float32)
        W[d, row_off:row_off + w.shape[0], col_off:col_off + w.shape[1]] = w
        if b is not None:
            b = np.asarray(b, np.float32).reshape(-1)
            Bv[d, 0, col_off:col_off + b.shape[0]] = b

    mu_w0 = np.asarray(mu_w0, np.float32)
    # depth 0: x -> pi hidden | te hidden0
    put(0, pi_w0, pi_b0, 0, 0)
    put(0, te_w0, te_b0, 0, 16)
    # depth 1: pi hidden -> pi | te hidden0 -> te hidden1
    put(1, pi_w1, pi_b1, 0, 8)
    put(1, te_w1, te_b1, 16, 16)
    # depth 2: pi -> pi1 hidden | cat(x, pi) -> mu hidden0 | te hidden1 -> te_hid
    put(2, pi1_w0, pi1_b0, 8, 0)
    put(2, mu_w0[:X_DIM, :], mu_b0, 0, 16)
    put(2, mu_w0[X_DIM:, :], None, 8, 16)
    put(2, te_w2, te_b2, 16, 48)
    # depth 3: pi1 out | mu hidden1 | te1 hidden0
    put(3, pi1_w1, pi1_b1, 0, 0)
    put(3, mu_w1, mu_b1, 16, 16)
    put(3, te1_w0, te1_b0, 48, 48)
    # depth 4: mu_hid (linear) | te1 hidden1
    put(4, mu_w2, mu_b2, 16, 16)
    put(4, te1_w1, te1_b1, 48, 48)
    # depth 5: mu1 hidden0 | te out
    put(5, mu1_w0, mu1_b0, 16, 16)
    put(5, te1_w2, te1_b2, 48, 0)
    # depths 6-7: mu1 hidden1, mu out
    put(6, mu1_w1, mu1_b1, 16, 16)
    put(7, mu1_w2, mu1_b2, 16, 0)

    return jnp.asarray(W), jnp.asarray(Bv), jnp.asarray(tau_w), jnp.asarray(tau_b)


def _default_grid_steps(batch):
    """1 grid step on single-TensorCore chips (v5e/v6e); 2 'parallel' steps on v7x
    so both TensorCores are fed.  Falls back to 1 if the device kind is unknown."""
    try:
        kind = jax.devices()[0].device_kind.lower()
    except Exception:
        kind = ""
    if ("v7" in kind or "tpu7" in kind) and batch % 16 == 0:
        return 2
    return 1


def treatment_effect_forward(packed, x, z, tau, eps, *, grid_steps=None):
    Wstack, Bstack, tau_w, tau_b = packed
    B = x.shape[0]
    if grid_steps is None:
        grid_steps = _default_grid_steps(B)
    assert B % grid_steps == 0
    tb = B // grid_steps
    assert tb % 8 == 0

    # Grid-invariant quantile embedding, hoisted out of the kernel and turned into a
    # (1, 128) gate row: tau features on the te_hid lanes, ones everywhere else.
    tau_vec = jnp.cos(jnp.arange(NH, dtype=jnp.float32) * jnp.pi
                      * jnp.float32(tau))[None, :]
    tau_feat = jnp.maximum(tau_vec @ tau_w + tau_b, 0.0)                # (1, HIDDEN)
    tau_row = jnp.ones((1, PW), jnp.float32)
    tau_row = tau_row.at[:, C_TEHID[0]:C_TEHID[0] + HIDDEN].set(tau_feat)

    # One lane-padded (B, 128) data block: [x | 0.. | z | eps | 0..].  The packed
    # weights have zero rows at the z/eps/pad columns, so they are inert in the dots.
    xf = x.astype(jnp.float32)
    zcol = z.reshape(-1, 1).astype(jnp.float32)
    ecol = eps.reshape(-1, 1).astype(jnp.float32)
    xin = jnp.concatenate(
        [xf,
         jnp.zeros((B, C_Z - X_DIM), jnp.float32),
         zcol, ecol,
         jnp.zeros((B, PW - (C_EPS + 1)), jnp.float32)], axis=1)

    out = pl.pallas_call(
        treatment_effect_kernel,
        grid=(grid_steps,),
        in_specs=[
            pl.BlockSpec((tb, PW), lambda i: (i, 0)),                 # data block
            pl.BlockSpec((1, PW), lambda i: (0, 0)),                  # tau gate row
            pl.BlockSpec((NDEPTH, PW, PW), lambda i: (0, 0, 0)),      # weight stack
            pl.BlockSpec((NDEPTH, 1, PW), lambda i: (0, 0, 0)),       # bias stack
        ],
        out_specs=pl.BlockSpec((tb, OUT_COLS), lambda i: (i, 0)),
        out_shape=jax.ShapeDtypeStruct((B, OUT_COLS), jnp.float32),
        compiler_params=pltpu.CompilerParams(
            dimension_semantics=("parallel",)),
    )(xin, tau_row, Wstack, Bstack)

    y = out[:, 0:2]
    pi1 = out[:, 2:3]
    te = out[:, 3:5]
    mu = out[:, 5:6]
    return y, pi1, te, mu


def treatment_effect_ref(params, x, z, tau, eps):
    """Pure-JAX reference mirroring the PyTorch forward."""
    (pi_w0, pi_b0, pi_w1, pi_b1,
     pi1_w0, pi1_b0, pi1_w1, pi1_b1,
     mu_w0, mu_b0, mu_w1, mu_b1, mu_w2, mu_b2,
     mu1_w0, mu1_b0, mu1_w1, mu1_b1, mu1_w2, mu1_b2,
     te_w0, te_b0, te_w1, te_b1, te_w2, te_b2,
     te1_w0, te1_b0, te1_w1, te1_b1, te1_w2, te1_b2,
     tau_w, tau_b) = params
    relu = lambda v: jnp.maximum(v, 0.0)
    tau_vec = jnp.cos(jnp.arange(NH, dtype=jnp.float32) * jnp.pi * tau)[None, :]
    tau_feat = relu(tau_vec @ tau_w + tau_b)
    pi = relu(x @ pi_w0 + pi_b0) @ pi_w1 + pi_b1
    pi1 = relu(pi @ pi1_w0 + pi1_b0) @ pi1_w1 + pi1_b1
    xp = jnp.concatenate([x, pi], axis=1)
    mu_hid = relu(relu(xp @ mu_w0 + mu_b0) @ mu_w1 + mu_b1) @ mu_w2 + mu_b2
    mu = relu(relu(mu_hid @ mu1_w0 + mu1_b0) @ mu1_w1 + mu1_b1) @ mu1_w2 + mu1_b2
    te_hid = relu(relu(x @ te_w0 + te_b0) @ te_w1 + te_b1) @ te_w2 + te_b2
    te = relu(relu((tau_feat * te_hid) @ te1_w0 + te1_b0) @ te1_w1 + te1_b1) @ te1_w2 + te1_b2
    sb = STEFAN_BOLTZMANN_CONSTANT * x[:, 0:1] ** 4
    noise = sb + 0.1 * sb * eps.reshape(-1, 1)
    y = mu + te * z.reshape(-1, 1) + noise
    return y, pi1, te, mu


if __name__ == "__main__":
    B = 256            # multiple of 16: 1 grid step on v5e/v6e, 2 parallel on v7x
    key = jax.random.PRNGKey(0)
    kp, kx, kz, ke = jax.random.split(key, 4)

    params = init_params(kp)
    packed = pack_params(params)

    x = jax.random.uniform(kx, (B, X_DIM), jnp.float32, minval=0.5, maxval=1.5)
    z = jax.random.bernoulli(kz, 0.5, (B,)).astype(jnp.float32)
    eps = jax.random.normal(ke, (B, 1), jnp.float32)   # reparameterized torch.normal
    tau = 0.3

    outs = treatment_effect_forward(packed, x, z, tau, eps)
    outs = jax.block_until_ready(outs)
    refs = treatment_effect_ref(params, x, z, tau, eps)

    for o, r in zip(outs, refs):
        assert o.shape == r.shape, (o.shape, r.shape)
        assert jnp.allclose(o, r, rtol=1e-2, atol=1e-3), float(jnp.max(jnp.abs(o - r)))

    print("KERNEL_OK")
</pallas_src>

<mosaic_0001>
module attributes {stable_mosaic.version = 11 : i64} {
  func.func @treatment_effect_kernel(%arg0: i32, %arg1: memref<256x128xf32, #tpu.memory_space<vmem>>, %arg2: memref<1x128xf32, #tpu.memory_space<vmem>>, %arg3: memref<8x128x128xf32, #tpu.memory_space<vmem>>, %arg4: memref<8x1x128xf32, #tpu.memory_space<vmem>>, %arg5: memref<256x6xf32, #tpu.memory_space<vmem>>) attributes {dimension_semantics = [#tpu.dimension_semantics<parallel>], iteration_bounds = array<i64: 1>, scalar_prefetch = 0 : i64, scratch_operands = 0 : i64, tpu.core_type = #tpu.core_type<tc>, window_params = [{transform_indices = @transform_0, window_bounds = array<i64: 256, 128>}, {pipeline_mode = #tpu.pipeline_mode<synchronous>, transform_indices = @transform_1, window_bounds = array<i64: 1, 128>}, {pipeline_mode = #tpu.pipeline_mode<synchronous>, transform_indices = @transform_2, window_bounds = array<i64: 8, 128, 128>}, {pipeline_mode = #tpu.pipeline_mode<synchronous>, transform_indices = @transform_3, window_bounds = array<i64: 8, 1, 128>}, {transform_indices = @transform_4, window_bounds = array<i64: 256, 6>}]} {
    %0 = tpu.iota {dimensions = array<i32: 1>} : vector<1x128xi32>
    %c0 = arith.constant 0 : index
    %c0_0 = arith.constant 0 : index
    %1 = vector.load %arg1[%c0, %c0_0] : memref<256x128xf32, #tpu.memory_space<vmem>>, vector<256x128xf32>
    %c0_1 = arith.constant 0 : index
    %c0_2 = arith.constant 0 : index
    %2 = vector.load %arg2[%c0_1, %c0_2] : memref<1x128xf32, #tpu.memory_space<vmem>>, vector<1x128xf32>
    %c0_3 = arith.constant 0 : index
    %c0_4 = arith.constant 0 : index
    %c0_5 = arith.constant 0 : index
    %3 = vector.load %arg3[%c0_3, %c0_4, %c0_5] : memref<8x128x128xf32, #tpu.memory_space<vmem>>, vector<1x128x128xf32>
    %4 = vector.shape_cast %3 : vector<1x128x128xf32> to vector<128x128xf32>
    %cst = arith.constant dense<0.000000e+00> : vector<256x128xf32>
    %5 = tpu.matmul %1, %4, %cst {dimension_numbers = #tpu.dot_dimension_numbers<[1], [0], [0], [1], [0, 0, 1, 1], [], []>} : vector<256x128xf32>, vector<128x128xf32>, vector<256x128xf32> -> vector<256x128xf32>
    %c0_6 = arith.constant 0 : index
    %c0_7 = arith.constant 0 : index
    %c0_8 = arith.constant 0 : index
    %6 = vector.load %arg4[%c0_6, %c0_7, %c0_8] : memref<8x1x128xf32, #tpu.memory_space<vmem>>, vector<1x1x128xf32>
    %7 = vector.shape_cast %6 : vector<1x1x128xf32> to vector<1x128xf32>
    %8 = vector.broadcast %7 : vector<1x128xf32> to vector<256x128xf32>
    %9 = arith.addf %5, %8 : vector<256x128xf32>
    %cst_9 = arith.constant 0.000000e+00 : f32
    %10 = vector.broadcast %cst_9 : f32 to vector<256x128xf32>
    %11 = arith.maximumf %9, %10 : vector<256x128xf32>
    %c1 = arith.constant 1 : index
    %c0_10 = arith.constant 0 : index
    %c0_11 = arith.constant 0 : index
    %12 = vector.load %arg3[%c1, %c0_10, %c0_11] : memref<8x128x128xf32, #tpu.memory_space<vmem>>, vector<1x128x128xf32>
    %13 = vector.shape_cast %12 : vector<1x128x128xf32> to vector<128x128xf32>
    %cst_12 = arith.constant dense<0.000000e+00> : vector<256x128xf32>
    %14 = tpu.matmul %11, %13, %cst_12 {dimension_numbers = #tpu.dot_dimension_numbers<[1], [0], [0], [1], [0, 0, 1, 1], [], []>} : vector<256x128xf32>, vector<128x128xf32>, vector<256x128xf32> -> vector<256x128xf32>
    %c1_13 = arith.constant 1 : index
    %c0_14 = arith.constant 0 : index
    %c0_15 = arith.constant 0 : index
    %15 = vector.load %arg4[%c1_13, %c0_14, %c0_15] : memref<8x1x128xf32, #tpu.memory_space<vmem>>, vector<1x1x128xf32>
    %16 = vector.shape_cast %15 : vector<1x1x128xf32> to vector<1x128xf32>
    %17 = vector.broadcast %16 : vector<1x128xf32> to vector<256x128xf32>
    %18 = arith.addf %14, %17 : vector<256x128xf32>
    %c16_i32 = arith.constant 16 : i32
    %19 = vector.broadcast %c16_i32 : i32 to vector<1x128xi32>
    %20 = arith.cmpi sge, %0, %19 : vector<1x128xi32>
    %cst_16 = arith.constant 0.000000e+00 : f32
    %21 = vector.broadcast %cst_16 : f32 to vector<256x128xf32>
    %22 = arith.maximumf %18, %21 : vector<256x128xf32>
    %23 = vector.shape_cast %20 : vector<1x128xi1> to vector<1x128xi1>
    %24 = vector.broadcast %23 : vector<1x128xi1> to vector<256x128xi1>
    %25 = arith.select %24, %22, %18 : vector<256x128xi1>, vector<256x128xf32>
    %26 = arith.addf %25, %1 : vector<256x128xf32>
    %c2 = arith.constant 2 : index
    %c0_17 = arith.constant 0 : index
    %c0_18 = arith.constant 0 : index
    %27 = vector.load %arg3[%c2, %c0_17, %c0_18] : memref<8x128x128xf32, #tpu.memory_space<vmem>>, vector<1x128x128xf32>
    %28 = vector.shape_cast %27 : vector<1x128x128xf32> to vector<128x128xf32>
    %cst_19 = arith.constant dense<0.000000e+00> : vector<256x128xf32>
    %29 = tpu.matmul %26, %28, %cst_19 {dimension_numbers = #tpu.dot_dimension_numbers<[1], [0], [0], [1], [0, 0, 1, 1], [], []>} : vector<256x128xf32>, vector<128x128xf32>, vector<256x128xf32> -> vector<256x128xf32>
    %c2_20 = arith.constant 2 : index
    %c0_21 = arith.constant 0 : index
    %c0_22 = arith.constant 0 : index
    %30 = vector.load %arg4[%c2_20, %c0_21, %c0_22] : memref<8x1x128xf32, #tpu.memory_space<vmem>>, vector<1x1x128xf32>
    %31 = vector.shape_cast %30 : vector<1x1x128xf32> to vector<1x128xf32>
    %32 = vector.broadcast %31 : vector<1x128xf32> to vector<256x128xf32>
    %33 = arith.addf %29, %32 : vector<256x128xf32>
    %c48_i32 = arith.constant 48 : i32
    %34 = vector.broadcast %c48_i32 : i32 to vector<1x128xi32>
    %35 = arith.cmpi slt, %0, %34 : vector<1x128xi32>
    %cst_23 = arith.constant 0.000000e+00 : f32
    %36 = vector.broadcast %cst_23 : f32 to vector<256x128xf32>
    %37 = arith.maximumf %33, %36 : vector<256x128xf32>
    %38 = vector.shape_cast %35 : vector<1x128xi1> to vector<1x128xi1>
    %39 = vector.broadcast %38 : vector<1x128xi1> to vector<256x128xi1>
    %40 = arith.select %39, %37, %33 : vector<256x128xi1>, vector<256x128xf32>
    %41 = vector.broadcast %2 : vector<1x128xf32> to vector<256x128xf32>
    %42 = arith.mulf %40, %41 : vector<256x128xf32>
    %c3 = arith.constant 3 : index
    %c0_24 = arith.constant 0 : index
    %c0_25 = arith.constant 0 : index
    %43 = vector.load %arg3[%c3, %c0_24, %c0_25] : memref<8x128x128xf32, #tpu.memory_space<vmem>>, vector<1x128x128xf32>
    %44 = vector.shape_cast %43 : vector<1x128x128xf32> to vector<128x128xf32>
    %cst_26 = arith.constant dense<0.000000e+00> : vector<256x128xf32>
    %45 = tpu.matmul %42, %44, %cst_26 {dimension_numbers = #tpu.dot_dimension_numbers<[1], [0], [0], [1], [0, 0, 1, 1], [], []>} : vector<256x128xf32>, vector<128x128xf32>, vector<256x128xf32> -> vector<256x128xf32>
    %c3_27 = arith.constant 3 : index
    %c0_28 = arith.constant 0 : index
    %c0_29 = arith.constant 0 : index
    %46 = vector.load %arg4[%c3_27, %c0_28, %c0_29] : memref<8x1x128xf32, #tpu.memory_space<vmem>>, vector<1x1x128xf32>
    %47 = vector.shape_cast %46 : vector<1x1x128xf32> to vector<1x128xf32>
    %48 = vector.broadcast %47 : vector<1x128xf32> to vector<256x128xf32>
    %49 = arith.addf %45, %48 : vector<256x128xf32>
    %50 = vector.extract_strided_slice %49 {offsets = [0, 0], sizes = [256, 1], strides = [1, 1]} : vector<256x128xf32> to vector<256x1xf32>
    %cst_30 = arith.constant 0.000000e+00 : f32
    %51 = vector.broadcast %cst_30 : f32 to vector<256x128xf32>
    %52 = arith.maximumf %49, %51 : vector<256x128xf32>
    %c4 = arith.constant 4 : index
    %c0_31 = arith.constant 0 : index
    %c0_32 = arith.constant 0 : index
    %53 = vector.load %arg3[%c4, %c0_31, %c0_32] : memref<8x128x128xf32, #tpu.memory_space<vmem>>, vector<1x128x128xf32>
    %54 = vector.shape_cast %53 : vector<1x128x128xf32> to vector<128x128xf32>
    %cst_33 = arith.constant dense<0.000000e+00> : vector<256x128xf32>
    %55 = tpu.matmul %52, %54, %cst_33 {dimension_numbers = #tpu.dot_dimension_numbers<[1], [0], [0], [1], [0, 0, 1, 1], [], []>} : vector<256x128xf32>, vector<128x128xf32>, vector<256x128xf32> -> vector<256x128xf32>
    %c4_34 = arith.constant 4 : index
    %c0_35 = arith.constant 0 : index
    %c0_36 = arith.constant 0 : index
    %56 = vector.load %arg4[%c4_34, %c0_35, %c0_36] : memref<8x1x128xf32, #tpu.memory_space<vmem>>, vector<1x1x128xf32>
    %57 = vector.shape_cast %56 : vector<1x1x128xf32> to vector<1x128xf32>
    %58 = vector.broadcast %57 : vector<1x128xf32> to vector<256x128xf32>
    %59 = arith.addf %55, %58 : vector<256x128xf32>
    %c48_i32_37 = arith.constant 48 : i32
    %60 = vector.broadcast %c48_i32_37 : i32 to vector<1x128xi32>
    %61 = arith.cmpi sge, %0, %60 : vector<1x128xi32>
    %cst_38 = arith.constant 0.000000e+00 : f32
    %62 = vector.broadcast %cst_38 : f32 to vector<256x128xf32>
    %63 = arith.maximumf %59, %62 : vector<256x128xf32>
    %64 = vector.shape_cast %61 : vector<1x128xi1> to vector<1x128xi1>
    %65 = vector.broadcast %64 : vector<1x128xi1> to vector<256x128xi1>
    %66 = arith.select %65, %63, %59 : vector<256x128xi1>, vector<256x128xf32>
    %c5 = arith.constant 5 : index
    %c0_39 = arith.constant 0 : index
    %c0_40 = arith.constant 0 : index
    %67 = vector.load %arg3[%c5, %c0_39, %c0_40] : memref<8x128x128xf32, #tpu.memory_space<vmem>>, vector<1x128x128xf32>
    %68 = vector.shape_cast %67 : vector<1x128x128xf32> to vector<128x128xf32>
    %cst_41 = arith.constant dense<0.000000e+00> : vector<256x128xf32>
    %69 = tpu.matmul %66, %68, %cst_41 {dimension_numbers = #tpu.dot_dimension_numbers<[1], [0], [0], [1], [0, 0, 1, 1], [], []>} : vector<256x128xf32>, vector<128x128xf32>, vector<256x128xf32> -> vector<256x128xf32>
    %c5_42 = arith.constant 5 : index
    %c0_43 = arith.constant 0 : index
    %c0_44 = arith.constant 0 : index
    %70 = vector.load %arg4[%c5_42, %c0_43, %c0_44] : memref<8x1x128xf32, #tpu.memory_space<vmem>>, vector<1x1x128xf32>
    %71 = vector.shape_cast %70 : vector<1x1x128xf32> to vector<1x128xf32>
    %72 = vector.broadcast %71 : vector<1x128xf32> to vector<256x128xf32>
    %73 = arith.addf %69, %72 : vector<256x128xf32>
    %74 = vector.extract_strided_slice %73 {offsets = [0, 0], sizes = [256, 2], strides = [1, 1]} : vector<256x128xf32> to vector<256x2xf32>
    %cst_45 = arith.constant 0.000000e+00 : f32
    %75 = vector.broadcast %cst_45 : f32 to vector<256x128xf32>
    %76 = arith.maximumf %73, %75 : vector<256x128xf32>
    %c6 = arith.constant 6 : index
    %c0_46 = arith.constant 0 : index
    %c0_47 = arith.constant 0 : index
    %77 = vector.load %arg3[%c6, %c0_46, %c0_47] : memref<8x128x128xf32, #tpu.memory_space<vmem>>, vector<1x128x128xf32>
    %78 = vector.shape_cast %77 : vector<1x128x128xf32> to vector<128x128xf32>
    %cst_48 = arith.constant dense<0.000000e+00> : vector<256x128xf32>
    %79 = tpu.matmul %76, %78, %cst_48 {dimension_numbers = #tpu.dot_dimension_numbers<[1], [0], [0], [1], [0, 0, 1, 1], [], []>} : vector<256x128xf32>, vector<128x128xf32>, vector<256x128xf32> -> vector<256x128xf32>
    %c6_49 = arith.constant 6 : index
    %c0_50 = arith.constant 0 : index
    %c0_51 = arith.constant 0 : index
    %80 = vector.load %arg4[%c6_49, %c0_50, %c0_51] : memref<8x1x128xf32, #tpu.memory_space<vmem>>, vector<1x1x128xf32>
    %81 = vector.shape_cast %80 : vector<1x1x128xf32> to vector<1x128xf32>
    %82 = vector.broadcast %81 : vector<1x128xf32> to vector<256x128xf32>
    %83 = arith.addf %79, %82 : vector<256x128xf32>
    %cst_52 = arith.constant 0.000000e+00 : f32
    %84 = vector.broadcast %cst_52 : f32 to vector<256x128xf32>
    %85 = arith.maximumf %83, %84 : vector<256x128xf32>
    %c7 = arith.constant 7 : index
    %c0_53 = arith.constant 0 : index
    %c0_54 = arith.constant 0 : index
    %86 = vector.load %arg3[%c7, %c0_53, %c0_54] : memref<8x128x128xf32, #tpu.memory_space<vmem>>, vector<1x128x128xf32>
    %87 = vector.shape_cast %86 : vector<1x128x128xf32> to vector<128x128xf32>
    %cst_55 = arith.constant dense<0.000000e+00> : vector<256x128xf32>
    %88 = tpu.matmul %85, %87, %cst_55 {dimension_numbers = #tpu.dot_dimension_numbers<[1], [0], [0], [1], [0, 0, 1, 1], [], []>} : vector<256x128xf32>, vector<128x128xf32>, vector<256x128xf32> -> vector<256x128xf32>
    %c7_56 = arith.constant 7 : index
    %c0_57 = arith.constant 0 : index
    %c0_58 = arith.constant 0 : index
    %89 = vector.load %arg4[%c7_56, %c0_57, %c0_58] : memref<8x1x128xf32, #tpu.memory_space<vmem>>, vector<1x1x128xf32>
    %90 = vector.shape_cast %89 : vector<1x1x128xf32> to vector<1x128xf32>
    %91 = vector.broadcast %90 : vector<1x128xf32> to vector<256x128xf32>
    %92 = arith.addf %88, %91 : vector<256x128xf32>
    %93 = vector.extract_strided_slice %92 {offsets = [0, 0], sizes = [256, 1], strides = [1, 1]} : vector<256x128xf32> to vector<256x1xf32>
    %94 = vector.extract_strided_slice %1 {offsets = [0, 0], sizes = [256, 1], strides = [1, 1]} : vector<256x128xf32> to vector<256x1xf32>
    %95 = vector.extract_strided_slice %1 {offsets = [0, 48], sizes = [256, 1], strides = [1, 1]} : vector<256x128xf32> to vector<256x1xf32>
    %96 = vector.extract_strided_slice %1 {offsets = [0, 49], sizes = [256, 1], strides = [1, 1]} : vector<256x128xf32> to vector<256x1xf32>
    %97 = arith.mulf %94, %94 : vector<256x1xf32>
    %98 = arith.mulf %97, %97 : vector<256x1xf32>
    %cst_59 = arith.constant 5.670000e-08 : f32
    %99 = vector.broadcast %cst_59 : f32 to vector<256x1xf32>
    %100 = arith.mulf %99, %98 : vector<256x1xf32>
    %cst_60 = arith.constant 1.000000e-01 : f32
    %101 = vector.broadcast %cst_60 : f32 to vector<256x1xf32>
    %102 = arith.mulf %101, %100 : vector<256x1xf32>
    %103 = arith.mulf %102, %96 : vector<256x1xf32>
    %104 = arith.addf %100, %103 : vector<256x1xf32>
    %105 = vector.broadcast %95 : vector<256x1xf32> to vector<256x2xf32>
    %106 = arith.mulf %74, %105 : vector<256x2xf32>
    %107 = vector.broadcast %93 : vector<256x1xf32> to vector<256x2xf32>
    %108 = arith.addf %107, %106 : vector<256x2xf32>
    %109 = vector.broadcast %104 : vector<256x1xf32> to vector<256x2xf32>
    %110 = arith.addf %108, %109 : vector<256x2xf32>
    %111 = tpu.concatenate %110, %50, %74, %93 in 1 : vector<256x2xf32>, vector<256x1xf32>, vector<256x2xf32>, vector<256x1xf32> -> vector<256x6xf32>
    %c0_61 = arith.constant 0 : index
    %c0_62 = arith.constant 0 : index
    %112 = vector.load %arg5[%c0_61, %c0_62] : memref<256x6xf32, #tpu.memory_space<vmem>>, vector<256x6xf32>
    tpu.vector_store %arg5[%c0_61, %c0_62], %111 {strides = array<i32>} : memref<256x6xf32, #tpu.memory_space<vmem>>, vector<256x6xf32>,
    return
  }
  func.func @transform_0(%arg0: i32) -> (i32, i32) {
    %c0_i32 = arith.constant 0 : i32
    %c0_i32_0 = arith.constant 0 : i32
    return %arg0, %c0_i32 : i32, i32
  }
  func.func @transform_1(%arg0: i32) -> (i32, i32) {
    %c0_i32 = arith.constant 0 : i32
    %c0_i32_0 = arith.constant 0 : i32
    %c0_i32_1 = arith.constant 0 : i32
    return %c0_i32, %c0_i32_0 : i32, i32
  }
  func.func @transform_2(%arg0: i32) -> (i32, i32, i32) {
    %c0_i32 = arith.constant 0 : i32
    %c0_i32_0 = arith.constant 0 : i32
    %c0_i32_1 = arith.constant 0 : i32
    %c0_i32_2 = arith.constant 0 : i32
    return %c0_i32, %c0_i32_0, %c0_i32_1 : i32, i32, i32
  }
  func.func @transform_3(%arg0: i32) -> (i32, i32, i32) {
    %c0_i32 = arith.constant 0 : i32
    %c0_i32_0 = arith.constant 0 : i32
    %c0_i32_1 = arith.constant 0 : i32
    %c0_i32_2 = arith.constant 0 : i32
    return %c0_i32, %c0_i32_0, %c0_i32_1 : i32, i32, i32
  }
  func.func @transform_4(%arg0: i32) -> (i32, i32) {
    %c0_i32 = arith.constant 0 : i32
    %c0_i32_0 = arith.constant 0 : i32
    return %arg0, %c0_i32 : i32, i32
  }
}

</mosaic_0001>

<bundles_post_ra>
// kernel: tpu_custom_call.1
= control target key start
LH: loop header
LB: loop body
LE: loop exit
PB: predicated region body
PF: predicated region fallthrough
CT: control target
= control target key end

     0   :  { %9 = vsyncpa [#allocation3], 0  ;;  %s7182_s0 = inlined_call_operand.hbm [shape: f32[256,128], index: 0, kind: input, shape index: {}]   ;;  %s7183_s1 = inlined_call_operand.vmem [shape: f32[1,128], index: 1, kind: input, shape index: {}]   ;;  %s7184_s2 = inlined_call_operand.hbm [shape: f32[8,128,128], index: 2, kind: input, shape index: {}]   ;;  %s7185_s3 = inlined_call_operand.vmem [shape: f32[8,1,128], index: 3, kind: input, shape index: {}]   ;;  %s7186_s4 = inlined_call_operand.vmem [shape: f32[256,6], index: 4, kind: output, shape index: {}]  }
   0x1   :  { %10 = vsyncpa [#allocation5], 0  ;;  %s5221_s15 = smov [#allocation2]   ;;  %s5173_s19 = scalar_lea.hbm %s7182_s0, 4096 }
   0x2   :  { %s16_s16 = sshll.u32 %s5221_s15, 4  ;;  %p5174_p0 = scmp.ne.s32.totalorder %s7182_s0, %s5173_s19  ;;  %s17_s16 = int_to_ptr.vmem [resolvable:$true] %s16_s16 }
   0x3   :  { %p5177_p1 = scmp.lt.u32.totalorder %s5173_s19, %s7182_s0 }
   0x5   :  { %p5179_p2 = pnand %p5177_p1, %p5174_p0 }
   0x7   :  { %5182 = shalt.err (!%p5179_p2)
}
   0x8   :  { %s5183_s24 = scalar_lea.vmem %s17_s16, 4096  ;;  %p5188_p4 = scmp.lt.s32.totalorder %s17_s16, %s17_s16 }
   0x9   :  { %p5184_p3 = scmp.ne.s32.totalorder %s17_s16, %s5183_s24  ;;  %p5189_p5 = scmp.lt.s32.totalorder %s5183_s24, %s5183_s24 }
   0xb   :  { %p5190_p6 = por %p5189_p5, %p5188_p4 }
   0xd   :  { %p5191_p7 = pnand %p5190_p6, %p5184_p3 }
   0xf   :  { %5194 = shalt.err (!%p5191_p7)
}
  0x10   :  { %s5222_s25 = smov 128   ;;  %s5223_s26 = smov 8  }
  0x11   :  { %22 = dma.hbm_to_vmem [thread:$0]  %s7182_s0, 4096, %s17_s16, [#allocation3], %s5222_s25, %s5222_s25, %s5223_s26  }
  0x12   :  { %s5224_s29 = smov [#allocation4]   ;;  %s5195_s7 = scalar_lea.hbm %s7184_s2, 16384 }
  0x13   :  { %s30_s30 = sshll.u32 %s5224_s29, 4  ;;  %p5196_p8 = scmp.ne.s32.totalorder %s7184_s2, %s5195_s7  ;;  %s31_s30 = int_to_ptr.vmem [resolvable:$true] %s30_s30 }
  0x14   :  { %p5199_p9 = scmp.lt.u32.totalorder %s5195_s7, %s7184_s2 }
  0x16   :  { %p5201_p10 = pnand %p5199_p9, %p5196_p8 }
  0x18   :  { %5204 = shalt.err (!%p5201_p10)
}
  0x19   :  { %s5205_s12 = scalar_lea.vmem %s31_s30, 16384  ;;  %p5210_p12 = scmp.lt.s32.totalorder %s31_s30, %s31_s30 }
  0x1a   :  { %p5206_p11 = scmp.ne.s32.totalorder %s31_s30, %s5205_s12  ;;  %p5211_p13 = scmp.lt.s32.totalorder %s5205_s12, %s5205_s12 }
  0x1c   :  { %p5212_p0 = por %p5211_p13, %p5210_p12 }
  0x1e   :  { %p5213_p1 = pnand %p5212_p0, %p5206_p11 }
  0x20   :  { %5216 = shalt.err (!%p5213_p1)
}
  0x21   :  { %36 = dma.hbm_to_vmem [thread:$0]  %s7184_s2, 16384, %s31_s30, [#allocation5], %s5222_s25, %s5222_s25, %s5223_s26  }
  0x22   :  { %5217 = dma.done.wait [#allocation3], 4096  }
  0x23   :  { %5218 = vsyncadd [#allocation3], 4294963200 }
  0x24   :  { %5219 = dma.done.wait [#allocation5], 16384  }
  0x25   :  { %5220 = vsyncadd [#allocation5], 4294950912  ;;  %v80_v0 = vld [vmem:[#allocation4] sm:$0xff]  ;;  %v81_v1 = vld [vmem:[#allocation4 + $0x8] sm:$0xff]  ;;  %s5225_s17 = smov 79   ;;  %s5228_s23 = smov 2  }
  0x26   :  { %v82_v2 = vld [vmem:[#allocation4 + $0x10] sm:$0xff]  ;;  %v4871_v3 = vpack.c.bf16 %v81_v1, %v80_v0  ;;  %v83_v4 = vld [vmem:[#allocation4 + $0x18] sm:$0xff]  ;;  %v84_v6 = vld [vmem:[#allocation4 + $0x20] sm:$0xff]  ;;  %s5229_s28 = smov 3   ;;  %s5230_s7 = smov 5   ;;  %vm3693_vm3 = vcmask 15360  }
  0x27   :  { %v4875_v5 = vpack.c.bf16 %v83_v4, %v82_v2  ;;  %v85_v7 = vld [vmem:[#allocation4 + $0x28] sm:$0xff]  ;;  %v5280_v9 = vld [vmem:[#allocation2] sm:$0xff]  ;;  %v86_v10 = vld [vmem:[#allocation4 + $0x30] sm:$0xff]  ;;  %vm3726_vm4 = vcmask 23552   ;;  %vm3759_vm5 = vcmask 39936   ;;  %vm3792_vm6 = vcmask 48128  }
  0x28   :  { %4872 = vmatprep.subr.bf16.mxu0 %v4871_v3  ;;  %v4879_v8 = vpack.c.bf16 %v85_v7, %v84_v6  ;;  %v87_v11 = vld [vmem:[#allocation4 + $0x38] sm:$0xff]  ;;  %4263 = vmatprep.mubr.f32.mxu0 %v5280_v9  ;;  %v88_v13 = vld [vmem:[#allocation4 + $0x40] sm:$0xff]  ;;  %v89_v14 = vld [vmem:[#allocation4 + $0x48] sm:$0xff] }
  0x29   :  { %4874 = vmatpush3.bf16.msra.mxu0 %v4871_v3  ;;  %v4883_v12 = vpack.c.bf16 %v87_v11, %v86_v10  ;;  %v4887_v15 = vpack.c.bf16 %v89_v14, %v88_v13  ;;  %v90_v16 = vld [vmem:[#allocation4 + $0x50] sm:$0xff]  ;;  %v91_v17 = vld [vmem:[#allocation4 + $0x58] sm:$0xff]  ;;  %v361_v18 = vld [vmem:[#allocation4 + $0x80] sm:$0xff] }
  0x2a   :  { %4876 = vmatprep.subr.bf16.mxu0 %v4875_v5  ;;  %v362_v19 = vld [vmem:[#allocation4 + $0x88] sm:$0xff]  ;;  %v363_v20 = vld [vmem:[#allocation4 + $0x90] sm:$0xff]  ;;  %v4891_v21 = vpack.c.bf16 %v91_v17, %v90_v16  ;;  %v92_v22 = vld [vmem:[#allocation4 + $0x60] sm:$0xff] }
  0x2b   :  { %v4903_v23 = vpack.c.bf16 %v362_v19, %v361_v18  ;;  %v364_v24 = vld [vmem:[#allocation4 + $0x98] sm:$0xff]  ;;  %v93_v25 = vld [vmem:[#allocation4 + $0x68] sm:$0xff]  ;;  %v365_v27 = vld [vmem:[#allocation4 + $0xa0] sm:$0xff] }
  0x2c   :  { %v4907_v26 = vpack.c.bf16 %v364_v24, %v363_v20  ;;  %v366_v28 = vld [vmem:[#allocation4 + $0xa8] sm:$0xff]  ;;  %v4895_v29 = vpack.c.bf16 %v93_v25, %v92_v22  ;;  %v94_v30 = vld [vmem:[#allocation4 + $0x70] sm:$0xff]  ;;  %v95_v32 = vld [vmem:[#allocation4 + $0x78] sm:$0xff] }
  0x2d   :  { %4878 = vmatpush3.bf16.msra.mxu0 %v4875_v5  ;;  %4904 = vmatprep.subr.bf16.mxu1 %v4903_v23  ;;  %v4911_v31 = vpack.c.bf16 %v366_v28, %v365_v27  ;;  %v367_v33 = vld [vmem:[#allocation4 + $0xb0] sm:$0xff]  ;;  %v368_v34 = vld [vmem:[#allocation4 + $0xb8] sm:$0xff]  ;;  %v4899_v35 = vpack.c.bf16 %v95_v32, %v94_v30  ;;  %v369_v37 = vld [vmem:[#allocation4 + $0xc0] sm:$0xff] }
  0x2e   :  { %4880 = vmatprep.subr.bf16.mxu0 %v4879_v8  ;;  %4906 = vmatpush3.bf16.msra.mxu1 %v4903_v23  ;;  %v4915_v36 = vpack.c.bf16 %v368_v34, %v367_v33  ;;  %v370_v38 = vld [vmem:[#allocation4 + $0xc8] sm:$0xff]  ;;  %v371_v40 = vld [vmem:[#allocation4 + $0xd0] sm:$0xff]  ;;  %v372_v41 = vld [vmem:[#allocation4 + $0xd8] sm:$0xff] }
  0x2f   :  { %4908 = vmatprep.subr.bf16.mxu1 %v4907_v26  ;;  %v4919_v39 = vpack.c.bf16 %v370_v38, %v369_v37  ;;  %v5283_v42 = vld [vmem:[#allocation2 + $0x8] sm:$0xff]  ;;  %v5285_v43 = vld [vmem:[#allocation2 + $0x10] sm:$0xff]  ;;  %v4923_v44 = vpack.c.bf16 %v372_v41, %v371_v40  ;;  %v373_v45 = vld [vmem:[#allocation4 + $0xe0] sm:$0xff] }
  0x30   :  { %v374_v46 = vld [vmem:[#allocation4 + $0xe8] sm:$0xff]  ;;  %v5289_v47 = vld [vmem:[#allocation2 + $0x18] sm:$0xff]  ;;  %v5291_v48 = vld [vmem:[#allocation2 + $0x20] sm:$0xff]  ;;  %2641 = vrot.lane.b32.xlu1 %v5285_v43, %s5225_s17 }
  0x31   :  { %4882 = vmatpush3.bf16.msra.mxu0 %v4879_v8  ;;  %v4927_v49 = vpack.c.bf16 %v374_v46, %v373_v45  ;;  %v5295_v50 = vld [vmem:[#allocation2 + $0x28] sm:$0xff]  ;;  %v5297_v51 = vld [vmem:[#allocation2 + $0x30] sm:$0xff]  ;;  %v5301_v52 = vld [vmem:[#allocation2 + $0x38] sm:$0xff] }
  0x32   :  { %4884 = vmatprep.subr.bf16.mxu0 %v4883_v12  ;;  %4910 = vmatpush3.bf16.msra.mxu1 %v4907_v26  ;;  %v5303_v53 = vld [vmem:[#allocation2 + $0x40] sm:$0xff]  ;;  %v5307_v54 = vld [vmem:[#allocation2 + $0x48] sm:$0xff]  ;;  %v5309_v55 = vld [vmem:[#allocation2 + $0x50] sm:$0xff] }
  0x33   :  { %4912 = vmatprep.subr.bf16.mxu1 %v4911_v31  ;;  %v5313_v56 = vld [vmem:[#allocation2 + $0x58] sm:$0xff]  ;;  %v5315_v57 = vld [vmem:[#allocation2 + $0x60] sm:$0xff]  ;;  %v5319_v58 = vld [vmem:[#allocation2 + $0x68] sm:$0xff] }
  0x34   :  { %v5321_v59 = vld [vmem:[#allocation2 + $0x70] sm:$0xff]  ;;  %v5325_v60 = vld [vmem:[#allocation2 + $0x78] sm:$0xff]  ;;  %v5327_v61 = vld [vmem:[#allocation2 + $0x80] sm:$0xff]  ;;  %2643 = vrot.lane.b32.xlu1 %v5289_v47, %s5225_s17 }
  0x35   :  { %4886 = vmatpush3.bf16.msra.mxu0 %v4883_v12  ;;  %v5331_v62 = vld [vmem:[#allocation2 + $0x88] sm:$0xff]  ;;  %v5333_v63 = vld [vmem:[#allocation2 + $0x90] sm:$0xff]  ;;  %v5337_v0 = vld [vmem:[#allocation2 + $0x98] sm:$0xff] }
  0x36   :  { %4888 = vmatprep.subr.bf16.mxu0 %v4887_v15  ;;  %4914 = vmatpush3.bf16.msra.mxu1 %v4911_v31  ;;  %v5339_v1 = vld [vmem:[#allocation2 + $0xa0] sm:$0xff]  ;;  %v5343_v2 = vld [vmem:[#allocation2 + $0xa8] sm:$0xff]  ;;  %v5345_v3 = vld [vmem:[#allocation2 + $0xb0] sm:$0xff] }
  0x37   :  { %4916 = vmatprep.subr.bf16.mxu1 %v4915_v36  ;;  %v5349_v4 = vld [vmem:[#allocation2 + $0xb8] sm:$0xff]  ;;  %v5351_v5 = vld [vmem:[#allocation2 + $0xc0] sm:$0xff]  ;;  %v5355_v6 = vld [vmem:[#allocation2 + $0xc8] sm:$0xff] }
  0x38   :  { %v5357_v7 = vld [vmem:[#allocation2 + $0xd0] sm:$0xff]  ;;  %v5361_v8 = vld [vmem:[#allocation2 + $0xd8] sm:$0xff]  ;;  %v5363_v10 = vld [vmem:[#allocation2 + $0xe0] sm:$0xff]  ;;  %2647 = vrot.lane.b32.xlu1 %v5295_v50, %s5225_s17 }
  0x39   :  { %4890 = vmatpush3.bf16.msra.mxu0 %v4887_v15  ;;  %v5367_v11 = vld [vmem:[#allocation2 + $0xe8] sm:$0xff]  ;;  %v5369_v12 = vld [vmem:[#allocation2 + $0xf0] sm:$0xff]  ;;  %v5373_v13 = vld [vmem:[#allocation2 + $0xf8] sm:$0xff] }
  0x3a   :  { %4892 = vmatprep.subr.bf16.mxu0 %v4891_v21  ;;  %4918 = vmatpush3.bf16.msra.mxu1 %v4915_v36  ;;  %v375_v14 = vld [vmem:[#allocation4 + $0xf0] sm:$0xff]  ;;  %v376_v15 = vld [vmem:[#allocation4 + $0xf8] sm:$0xff]  ;;  %v710_v17 = vld [vmem:[#allocation4 + $0x100] sm:$0xff] }
  0x3b   :  { %4920 = vmatprep.subr.bf16.mxu1 %v4919_v39  ;;  %v4931_v16 = vpack.c.bf16 %v376_v15, %v375_v14  ;;  %v711_v18 = vld [vmem:[#allocation4 + $0x108] sm:$0xff]  ;;  %v712_v19 = vld [vmem:[#allocation4 + $0x110] sm:$0xff]  ;;  %v714_v23 = vld [vmem:[#allocation4 + $0x120] sm:$0xff] }
  0x3c   :  { %v4935_v20 = vpack.c.bf16 %v711_v18, %v710_v17  ;;  %v715_v24 = vld [vmem:[#allocation4 + $0x128] sm:$0xff]  ;;  %v716_v26 = vld [vmem:[#allocation4 + $0x130] sm:$0xff]  ;;  %v717_v27 = vld [vmem:[#allocation4 + $0x138] sm:$0xff]  ;;  %2651 = vrot.lane.b32.xlu1 %v5301_v52, %s5225_s17 }
  0x3d   :  { %4894 = vmatpush3.bf16.msra.mxu0 %v4891_v21  ;;  %v713_v21 = vld [vmem:[#allocation4 + $0x118] sm:$0xff]  ;;  %v4943_v25 = vpack.c.bf16 %v715_v24, %v714_v23  ;;  %v4947_v28 = vpack.c.bf16 %v717_v27, %v716_v26  ;;  %v719_v30 = vld [vmem:[#allocation4 + $0x148] sm:$0xff]  ;;  %v720_v32 = vld [vmem:[#allocation4 + $0x150] sm:$0xff] }
  0x3e   :  { %4896 = vmatprep.subr.bf16.mxu0 %v4895_v29  ;;  %4922 = vmatpush3.bf16.msra.mxu1 %v4919_v39  ;;  %v4939_v22 = vpack.c.bf16 %v713_v21, %v712_v19  ;;  %v721_v33 = vld [vmem:[#allocation4 + $0x158] sm:$0xff]  ;;  %v723_v36 = vld [vmem:[#allocation4 + $0x168] sm:$0xff]  ;;  %v5379_v38 = vld [vmem:[%s7185_s3] ss:$0 sm:$0xff] }
  0x3f   :  { %4924 = vmatprep.subr.bf16.mxu1 %v4923_v44  ;;  %v4955_v34 = vpack.c.bf16 %v721_v33, %v720_v32 }
  0x40   :  { %2655 = vrot.lane.b32.xlu1 %v5307_v54, %s5225_s17 }
  0x41   :  { %4898 = vmatpush3.bf16.msra.mxu0 %v4895_v29  ;;  %v718_v29 = vld [vmem:[#allocation4 + $0x140] sm:$0xff] }
  0x42   :  { %4900 = vmatprep.subr.bf16.mxu0 %v4899_v35  ;;  %4926 = vmatpush3.bf16.msra.mxu1 %v4923_v44  ;;  %v4951_v31 = vpack.c.bf16 %v719_v30, %v718_v29 }
  0x43   :  { %4928 = vmatprep.subr.bf16.mxu1 %v4927_v49 }
  0x44   :  { %2659 = vrot.lane.b32.xlu1 %v5313_v56, %s5225_s17 }
  0x45   :  { %4902 = vmatpush3.bf16.msra.mxu0 %v4899_v35  ;;  %v722_v35 = vld [vmem:[#allocation4 + $0x160] sm:$0xff] }
  0x46   :  { %4930 = vmatpush3.bf16.msra.mxu1 %v4927_v49  ;;  %4936 = vmatprep.subr.bf16.mxu0 %v4935_v20  ;;  %v4959_v37 = vpack.c.bf16 %v723_v36, %v722_v35 }
  0x47   :  { %4932 = vmatprep.subr.bf16.mxu1 %v4931_v16 }
  0x48   :  { %4264 = vmatmul.mubr.f32.vlgmr.msra.gmra.mrb[0].mxu0 %v5283_v42  ;;  %2663 = vrot.lane.b32.xlu1 %v5319_v58, %s5225_s17 }
  0x49   :  { %4266 = vmatprep.mubr.f32.mxu0 %v5285_v43  ;;  %4938 = vmatpush3.bf16.msra.mxu0 %v4935_v20 }
  0x4a   :  { %4934 = vmatpush3.bf16.msra.mxu1 %v4931_v16  ;;  %4940 = vmatprep.subr.bf16.mxu0 %v4939_v22 }
  0x4c   :  { %4267 = vmatmul.mubr.f32.gmra.mrb[2].mxu0 %v5289_v47  ;;  %2667 = vrot.lane.b32.xlu1 %v5325_v60, %s5225_s17 }
  0x4d   :  { %4269 = vmatprep.mubr.f32.mxu0 %v5291_v48  ;;  %4942 = vmatpush3.bf16.msra.mxu0 %v4939_v22 }
  0x4e   :  { %4944 = vmatprep.subr.bf16.mxu0 %v4943_v25 }
  0x50   :  { %4270 = vmatmul.mubr.f32.gmra.mrb[4].mxu0 %v5295_v50  ;;  %2671 = vrot.lane.b32.xlu1 %v5331_v62, %s5225_s17 }
  0x51   :  { %4272 = vmatprep.mubr.f32.mxu0 %v5297_v51  ;;  %4946 = vmatpush3.bf16.msra.mxu0 %v4943_v25 }
  0x52   :  { %4948 = vmatprep.subr.bf16.mxu0 %v4947_v28 }
  0x54   :  { %4273 = vmatmul.mubr.f32.gmra.mrb[6].mxu0 %v5301_v52  ;;  %2675 = vrot.lane.b32.xlu1 %v5337_v0, %s5225_s17 }
  0x55   :  { %4275 = vmatprep.mubr.f32.mxu0 %v5303_v53  ;;  %4950 = vmatpush3.bf16.msra.mxu0 %v4947_v28 }
  0x56   :  { %4952 = vmatprep.subr.bf16.mxu0 %v4951_v31 }
  0x58   :  { %4276 = vmatmul.mubr.f32.gmra.mrb[8].mxu0 %v5307_v54  ;;  %2679 = vrot.lane.b32.xlu1 %v5343_v2, %s5225_s17 }
  0x59   :  { %4278 = vmatprep.mubr.f32.mxu0 %v5309_v55  ;;  %4954 = vmatpush3.bf16.msra.mxu0 %v4951_v31 }
  0x5a   :  { %4956 = vmatprep.subr.bf16.mxu0 %v4955_v34 }
  0x5c   :  { %4279 = vmatmul.mubr.f32.gmra.mrb[10].mxu0 %v5313_v56  ;;  %2683 = vrot.lane.b32.xlu1 %v5349_v4, %s5225_s17 }
  0x5d   :  { %4281 = vmatprep.mubr.f32.mxu0 %v5315_v57  ;;  %4958 = vmatpush3.bf16.msra.mxu0 %v4955_v34 }
  0x5e   :  { %4960 = vmatprep.subr.bf16.mxu0 %v4959_v37 }
  0x60   :  { %4282 = vmatmul.mubr.f32.gmra.mrb[12].mxu0 %v5319_v58  ;;  %2687 = vrot.lane.b32.xlu1 %v5355_v6, %s5225_s17 }
  0x61   :  { %4284 = vmatprep.mubr.f32.mxu0 %v5321_v59  ;;  %4962 = vmatpush3.bf16.msra.mxu0 %v4959_v37 }
  0x64   :  { %4285 = vmatmul.mubr.f32.gmra.mrb[14].mxu0 %v5325_v60  ;;  %2691 = vrot.lane.b32.xlu1 %v5361_v8, %s5225_s17 }
  0x65   :  { %4287 = vmatprep.mubr.f32.mxu0 %v5327_v61 }
  0x68   :  { %4288 = vmatmul.mubr.f32.gmra.mrb[16].mxu0 %v5331_v62  ;;  %2695 = vrot.lane.b32.xlu1 %v5367_v11, %s5225_s17 }
  0x69   :  { %4290 = vmatprep.mubr.f32.mxu0 %v5333_v63 }
  0x6c   :  { %4291 = vmatmul.mubr.f32.gmra.mrb[18].mxu0 %v5337_v0  ;;  %2699 = vrot.lane.b32.xlu1 %v5373_v13, %s5225_s17 }
  0x6d   :  { %4293 = vmatprep.mubr.f32.mxu0 %v5339_v1 }
  0x70   :  { %4294 = vmatmul.mubr.f32.gmra.mrb[20].mxu0 %v5343_v2 }
  0x71   :  { %4296 = vmatprep.mubr.f32.mxu0 %v5345_v3 }
  0x74   :  { %4297 = vmatmul.mubr.f32.gmra.mrb[22].mxu0 %v5349_v4 }
  0x75   :  { %4299 = vmatprep.mubr.f32.mxu0 %v5351_v5 }
  0x78   :  { %4300 = vmatmul.mubr.f32.gmra.mrb[24].mxu0 %v5355_v6 }
  0x79   :  { %4302 = vmatprep.mubr.f32.mxu0 %v5357_v7 }
  0x7c   :  { %4303 = vmatmul.mubr.f32.gmra.mrb[26].mxu0 %v5361_v8 }
  0x7d   :  { %4305 = vmatprep.mubr.f32.mxu0 %v5363_v10 }
  0x80   :  { %4306 = vmatmul.mubr.f32.gmra.mrb[28].mxu0 %v5367_v11 }
  0x81   :  { %4308 = vmatprep.mubr.f32.mxu0 %v5369_v12 }
  0x84   :  { %4309 = vmatmul.mubr.f32.gmra.mrb[30].mxu0 %v5373_v13 }
 0x11b   :  { %v4265_v39 = vpop.f32.mrb[0].mxu0 }
 0x11c   :  { %v175_v40 = vadd.f32 %v4265_v39, %v5379_v38  ;;  %v169_v41 = vpop.f32.mrb[1].mxu0 }
 0x11d   :  { %v170_v44 = vadd.f32 %v5379_v38, %v169_v41 }
 0x11e   :  { %v329_v49 = vmax.f32 %v175_v40, 0.0 }
 0x11f   :  { %v4268_v45 = vpop.f32.mrb[2].mxu0  ;;  %v328_v46 = vmax.f32 %v170_v44, 0.0 }
 0x120   :  { %v185_v14 = vadd.f32 %v4268_v45, %v5379_v38  ;;  %v179_v15 = vpop.f32.mrb[3].mxu0 }
 0x121   :  { %v180_v16 = vadd.f32 %v5379_v38, %v179_v15  ;;  %4343 = vmatprep.mubr.f32.mxu1 %v328_v46 }
 0x122   :  { %v331_v17 = vmax.f32 %v185_v14, 0.0  ;;  %4344 = vmatmul.mubr.f32.vlgmr.msra.gmra.mrb[0].mxu1 %v329_v49 }
 0x123   :  { %v330_v18 = vmax.f32 %v180_v16, 0.0  ;;  %v4271_v19 = vpop.f32.mrb[4].mxu0 }
 0x124   :  { %v195_v20 = vadd.f32 %v4271_v19, %v5379_v38  ;;  %v189_v21 = vpop.f32.mrb[5].mxu0 }
 0x125   :  { %v190_v22 = vadd.f32 %v5379_v38, %v189_v21  ;;  %4346 = vmatprep.mubr.f32.mxu1 %v330_v18 }
 0x126   :  { %v333_v23 = vmax.f32 %v195_v20, 0.0  ;;  %4347 = vmatmul.mubr.f32.gmra.mrb[2].mxu1 %v331_v17 }
 0x127   :  { %v332_v24 = vmax.f32 %v190_v22, 0.0  ;;  %v4274_v25 = vpop.f32.mrb[6].mxu0 }
 0x128   :  { %v205_v26 = vadd.f32 %v4274_v25, %v5379_v38  ;;  %v199_v27 = vpop.f32.mrb[7].mxu0 }
 0x129   :  { %v200_v28 = vadd.f32 %v5379_v38, %v199_v27  ;;  %4349 = vmatprep.mubr.f32.mxu1 %v332_v24 }
 0x12a   :  { %v335_v29 = vmax.f32 %v205_v26, 0.0  ;;  %4350 = vmatmul.mubr.f32.gmra.mrb[4].mxu1 %v333_v23 }
 0x12b   :  { %v334_v30 = vmax.f32 %v200_v28, 0.0  ;;  %v4277_v31 = vpop.f32.mrb[8].mxu0 }
 0x12c   :  { %v215_v32 = vadd.f32 %v4277_v31, %v5379_v38  ;;  %v209_v33 = vpop.f32.mrb[9].mxu0 }
 0x12d   :  { %v210_v34 = vadd.f32 %v5379_v38, %v209_v33  ;;  %4352 = vmatprep.mubr.f32.mxu1 %v334_v30 }
 0x12e   :  { %v337_v35 = vmax.f32 %v215_v32, 0.0  ;;  %4353 = vmatmul.mubr.f32.gmra.mrb[6].mxu1 %v335_v29 }
 0x12f   :  { %v336_v36 = vmax.f32 %v210_v34, 0.0  ;;  %v4280_v37 = vpop.f32.mrb[10].mxu0 }
 0x130   :  { %v225_v39 = vadd.f32 %v4280_v37, %v5379_v38  ;;  %v219_v40 = vpop.f32.mrb[11].mxu0 }
 0x131   :  { %4355 = vmatprep.mubr.f32.mxu1 %v336_v36  ;;  %v220_v41 = vadd.f32 %v5379_v38, %v219_v40 }
 0x132   :  { %v339_v44 = vmax.f32 %v225_v39, 0.0  ;;  %4356 = vmatmul.mubr.f32.gmra.mrb[8].mxu1 %v337_v35 }
 0x133   :  { %v338_v45 = vmax.f32 %v220_v41, 0.0  ;;  %v4283_v46 = vpop.f32.mrb[12].mxu0 }
 0x134   :  { %v235_v49 = vadd.f32 %v4283_v46, %v5379_v38  ;;  %v229_v14 = vpop.f32.mrb[13].mxu0 }
 0x135   :  { %4358 = vmatprep.mubr.f32.mxu1 %v338_v45  ;;  %v230_v15 = vadd.f32 %v5379_v38, %v229_v14 }
 0x136   :  { %4359 = vmatmul.mubr.f32.gmra.mrb[10].mxu1 %v339_v44  ;;  %v341_v16 = vmax.f32 %v235_v49, 0.0 }
 0x137   :  { %v340_v17 = vmax.f32 %v230_v15, 0.0  ;;  %v4286_v18 = vpop.f32.mrb[14].mxu0 }
 0x138   :  { %v245_v19 = vadd.f32 %v4286_v18, %v5379_v38  ;;  %v239_v20 = vpop.f32.mrb[15].mxu0 }
 0x139   :  { %4361 = vmatprep.mubr.f32.mxu1 %v340_v17  ;;  %v240_v21 = vadd.f32 %v5379_v38, %v239_v20 }
 0x13a   :  { %4362 = vmatmul.mubr.f32.gmra.mrb[12].mxu1 %v341_v16  ;;  %v343_v22 = vmax.f32 %v245_v19, 0.0 }
 0x13b   :  { %v342_v23 = vmax.f32 %v240_v21, 0.0  ;;  %v4289_v24 = vpop.f32.mrb[16].mxu0 }
 0x13c   :  { %v255_v25 = vadd.f32 %v4289_v24, %v5379_v38  ;;  %v249_v26 = vpop.f32.mrb[17].mxu0 }
 0x13d   :  { %4364 = vmatprep.mubr.f32.mxu1 %v342_v23  ;;  %v250_v27 = vadd.f32 %v5379_v38, %v249_v26 }
 0x13e   :  { %4365 = vmatmul.mubr.f32.gmra.mrb[14].mxu1 %v343_v22  ;;  %v345_v28 = vmax.f32 %v255_v25, 0.0 }
 0x13f   :  { %v344_v29 = vmax.f32 %v250_v27, 0.0  ;;  %v4292_v30 = vpop.f32.mrb[18].mxu0 }
 0x140   :  { %v265_v31 = vadd.f32 %v4292_v30, %v5379_v38  ;;  %v259_v32 = vpop.f32.mrb[19].mxu0 }
 0x141   :  { %4367 = vmatprep.mubr.f32.mxu1 %v344_v29  ;;  %v260_v33 = vadd.f32 %v5379_v38, %v259_v32 }
 0x142   :  { %4368 = vmatmul.mubr.f32.gmra.mrb[16].mxu1 %v345_v28  ;;  %v347_v34 = vmax.f32 %v265_v31, 0.0 }
 0x143   :  { %v346_v35 = vmax.f32 %v260_v33, 0.0  ;;  %v4295_v36 = vpop.f32.mrb[20].mxu0 }
 0x144   :  { %v275_v37 = vadd.f32 %v4295_v36, %v5379_v38  ;;  %v269_v39 = vpop.f32.mrb[21].mxu0 }
 0x145   :  { %4370 = vmatprep.mubr.f32.mxu1 %v346_v35  ;;  %v270_v40 = vadd.f32 %v5379_v38, %v269_v39 }
 0x146   :  { %4371 = vmatmul.mubr.f32.gmra.mrb[18].mxu1 %v347_v34  ;;  %v349_v41 = vmax.f32 %v275_v37, 0.0 }
 0x147   :  { %v348_v44 = vmax.f32 %v270_v40, 0.0  ;;  %v4298_v45 = vpop.f32.mrb[22].mxu0 }
 0x148   :  { %v285_v46 = vadd.f32 %v4298_v45, %v5379_v38  ;;  %v279_v49 = vpop.f32.mrb[23].mxu0  ;;  %v725_v45 = vld [vmem:[#allocation4 + $0x178] sm:$0xff] }
 0x149   :  { %4373 = vmatprep.mubr.f32.mxu1 %v348_v44  ;;  %v280_v14 = vadd.f32 %v5379_v38, %v279_v49  ;;  %v724_v44 = vld [vmem:[#allocation4 + $0x170] sm:$0xff]  ;;  %v1065_v49 = vld [vmem:[#allocation4 + $0x180] sm:$0xff] }
 0x14a   :  { %4374 = vmatmul.mubr.f32.gmra.mrb[20].mxu1 %v349_v41  ;;  %v351_v15 = vmax.f32 %v285_v46, 0.0  ;;  %v4963_v46 = vpack.c.bf16 %v725_v45, %v724_v44 }
 0x14b   :  { %v350_v16 = vmax.f32 %v280_v14, 0.0  ;;  %v4301_v17 = vpop.f32.mrb[24].mxu0  ;;  %v1066_v14 = vld [vmem:[#allocation4 + $0x188] sm:$0xff] }
 0x14c   :  { %v295_v18 = vadd.f32 %v4301_v17, %v5379_v38  ;;  %v289_v19 = vpop.f32.mrb[25].mxu0  ;;  %4964 = vmatprep.subr.bf16.mxu0 %v4963_v46  ;;  %v1068_v17 = vld [vmem:[#allocation4 + $0x198] sm:$0xff] }
 0x14d   :  { %4376 = vmatprep.mubr.f32.mxu1 %v350_v16  ;;  %v290_v20 = vadd.f32 %v5379_v38, %v289_v19  ;;  %4966 = vmatpush3.bf16.msra.mxu0 %v4963_v46  ;;  %v4967_v16 = vpack.c.bf16 %v1066_v14, %v1065_v49  ;;  %v1069_v19 = vld [vmem:[#allocation4 + $0x1a0] sm:$0xff] }
 0x14e   :  { %4377 = vmatmul.mubr.f32.gmra.mrb[22].mxu1 %v351_v15  ;;  %v353_v21 = vmax.f32 %v295_v18, 0.0  ;;  %v1067_v15 = vld [vmem:[#allocation4 + $0x190] sm:$0xff] }
 0x14f   :  { %v352_v22 = vmax.f32 %v290_v20, 0.0  ;;  %v4304_v23 = vpop.f32.mrb[26].mxu0  ;;  %v4971_v18 = vpack.c.bf16 %v1068_v17, %v1067_v15  ;;  %v1070_v20 = vld [vmem:[#allocation4 + $0x1a8] sm:$0xff]  ;;  %4968 = vmatprep.subr.bf16.mxu1 %v4967_v16 }
 0x150   :  { %v305_v24 = vadd.f32 %v4304_v23, %v5379_v38  ;;  %v299_v25 = vpop.f32.mrb[27].mxu0  ;;  %4970 = vmatpush3.bf16.msra.mxu1 %v4967_v16 }
 0x151   :  { %v300_v26 = vadd.f32 %v5379_v38, %v299_v25  ;;  %4379 = vmatprep.mubr.f32.mxu1 %v352_v22  ;;  %4972 = vmatprep.subr.bf16.mxu1 %v4971_v18  ;;  %v1072_v22 = vld [vmem:[#allocation4 + $0x1b8] sm:$0xff]  ;;  %v1074_v25 = vld [vmem:[#allocation4 + $0x1c8] sm:$0xff] }
 0x152   :  { %v355_v27 = vmax.f32 %v305_v24, 0.0  ;;  %4380 = vmatmul.mubr.f32.gmra.mrb[24].mxu1 %v353_v21  ;;  %v1071_v21 = vld [vmem:[#allocation4 + $0x1b0] sm:$0xff]  ;;  %v1073_v24 = vld [vmem:[#allocation4 + $0x1c0] sm:$0xff] }
 0x153   :  { %v354_v28 = vmax.f32 %v300_v26, 0.0  ;;  %v4307_v29 = vpop.f32.mrb[28].mxu0  ;;  %v4979_v23 = vpack.c.bf16 %v1072_v22, %v1071_v21  ;;  %v4983_v26 = vpack.c.bf16 %v1074_v25, %v1073_v24 }
 0x154   :  { %v315_v30 = vadd.f32 %v4307_v29, %v5379_v38  ;;  %v309_v31 = vpop.f32.mrb[29].mxu0  ;;  %4974 = vmatpush3.bf16.msra.mxu1 %v4971_v18 }
 0x155   :  { %v310_v32 = vadd.f32 %v5379_v38, %v309_v31  ;;  %4382 = vmatprep.mubr.f32.mxu1 %v354_v28  ;;  %v1076_v28 = vld [vmem:[#allocation4 + $0x1d8] sm:$0xff]  ;;  %v1078_v31 = vld [vmem:[#allocation4 + $0x1e8] sm:$0xff] }
 0x156   :  { %v357_v33 = vmax.f32 %v315_v30, 0.0  ;;  %4383 = vmatmul.mubr.f32.gmra.mrb[26].mxu1 %v355_v27  ;;  %v1075_v27 = vld [vmem:[#allocation4 + $0x1d0] sm:$0xff]  ;;  %v1077_v30 = vld [vmem:[#allocation4 + $0x1e0] sm:$0xff] }
 0x157   :  { %v356_v34 = vmax.f32 %v310_v32, 0.0  ;;  %v4310_v35 = vpop.f32.mrb[30].mxu0  ;;  %v4987_v29 = vpack.c.bf16 %v1076_v28, %v1075_v27  ;;  %v4991_v32 = vpack.c.bf16 %v1078_v31, %v1077_v30 }
 0x158   :  { %v325_v36 = vadd.f32 %v4310_v35, %v5379_v38  ;;  %v319_v37 = vpop.f32.mrb[31].mxu0  ;;  %v5418_v35 = vld [vmem:[%s7185_s3 + $0x1] ss:$0 sm:$0xff] }
 0x159   :  { %v320_v39 = vadd.f32 %v5379_v38, %v319_v37  ;;  %4385 = vmatprep.mubr.f32.mxu1 %v356_v34  ;;  %v4975_v38 = vpack.c.bf16 %v1070_v20, %v1069_v19 }
 0x15a   :  { %v359_v40 = vmax.f32 %v325_v36, 0.0  ;;  %4386 = vmatmul.mubr.f32.gmra.mrb[28].mxu1 %v357_v33  ;;  %v45_v33 = vlaneseq }
 0x15b   :  { %v358_v41 = vmax.f32 %v320_v39, 0.0  ;;  %4976 = vmatprep.subr.bf16.mxu1 %v4975_v38 }
 0x15c   :  { %4978 = vmatpush3.bf16.msra.mxu1 %v4975_v38  ;;  %v5413_v34 = vand.u32 127, %v45_v33 }
 0x15d   :  { %4388 = vmatprep.mubr.f32.mxu1 %v358_v41  ;;  %4980 = vmatprep.subr.bf16.mxu1 %v4979_v23 }
 0x15e   :  { %4389 = vmatmul.mubr.f32.gmra.mrb[30].mxu1 %v359_v40  ;;  %vm610_vm0 = vcmp.ge.s32.totalorder %v5413_v34, 16  ;;  %vm959_vm1 = vcmp.lt.s32.totalorder %v5413_v34, 48  ;;  %vm1596_vm2 = vcmp.ge.s32.totalorder %v5413_v34, 48  ;;  %v6219_v34 = vld [vmem:[%s7185_s3 + $0x5] ss:$0 sm:$0xff] }
 0x160   :  { %4982 = vmatpush3.bf16.msra.mxu1 %v4979_v23 }
 0x161   :  { %4984 = vmatprep.subr.bf16.mxu1 %v4983_v26 }
 0x164   :  { %4986 = vmatpush3.bf16.msra.mxu1 %v4983_v26 }
 0x165   :  { %4988 = vmatprep.subr.bf16.mxu1 %v4987_v29 }
 0x168   :  { %4990 = vmatpush3.bf16.msra.mxu1 %v4987_v29 }
 0x169   :  { %4992 = vmatprep.subr.bf16.mxu1 %v4991_v32 }
 0x16c   :  { %4994 = vmatpush3.bf16.msra.mxu1 %v4991_v32 }
 0x1f5   :  { %v4345_v36 = vpop.f32.mrb[0].mxu1 }
 0x1f6   :  { %v457_v37 = vadd.f32 %v4345_v36, %v5418_v35  ;;  %v451_v39 = vpop.f32.mrb[1].mxu1 }
 0x1f7   :  { %v452_v40 = vadd.f32 %v5418_v35, %v451_v39 }
 0x1f8   :  { %v612_v41 = vmax.f32 %v457_v37, 0.0 }
 0x1f9   :  { %v611_v44 = vmax.f32 %v452_v40, 0.0  ;;  %v4348_v45 = vpop.f32.mrb[2].mxu1 }
 0x1fa   :  { %v646_v46 = vsel %vm610_vm0, %v612_v41, %v457_v37  ;;  %v467_v49 = vadd.f32 %v4348_v45, %v5418_v35  ;;  %v461_v14 = vpop.f32.mrb[3].mxu1 }
 0x1fb   :  { %v462_v15 = vadd.f32 %v5418_v35, %v461_v14  ;;  %v645_v16 = vsel %vm610_vm0, %v611_v44, %v452_v40  ;;  %v678_v19 = vadd.f32 %v646_v46, %v5283_v42 }
 0x1fc   :  { %v614_v17 = vmax.f32 %v467_v49, 0.0  ;;  %v677_v18 = vadd.f32 %v645_v16, %v5280_v9 }
 0x1fd   :  { %v613_v20 = vmax.f32 %v462_v15, 0.0  ;;  %v4351_v38 = vpop.f32.mrb[4].mxu1 }
 0x1fe   :  { %v477_v21 = vadd.f32 %v4351_v38, %v5418_v35  ;;  %v471_v22 = vpop.f32.mrb[5].mxu1  ;;  %4423 = vmatprep.mubr.f32.mxu0 %v677_v18  ;;  %v648_v23 = vsel %vm610_vm0, %v614_v17, %v467_v49 }
 0x1ff   :  { %v472_v24 = vadd.f32 %v5418_v35, %v471_v22  ;;  %4424 = vmatmul.mubr.f32.vlgmr.msra.gmra.mrb[32].mxu0 %v678_v19  ;;  %v647_v25 = vsel %vm610_vm0, %v613_v20, %v462_v15  ;;  %v680_v29 = vadd.f32 %v648_v23, %v5289_v47  ;;  %v1348_v47 = vld [vmem:[#allocation4 + $0x208] sm:$0xff] }
 0x200   :  { %v616_v26 = vmax.f32 %v477_v21, 0.0  ;;  %v679_v9 = vadd.f32 %v647_v25, %v5285_v43  ;;  %v1347_v43 = vld [vmem:[#allocation4 + $0x200] sm:$0xff] }
 0x201   :  { %v615_v27 = vmax.f32 %v472_v24, 0.0  ;;  %v4354_v28 = vpop.f32.mrb[6].mxu1 }
 0x202   :  { %v487_v30 = vadd.f32 %v4354_v28, %v5418_v35  ;;  %v481_v31 = vpop.f32.mrb[7].mxu1  ;;  %4426 = vmatprep.mubr.f32.mxu0 %v679_v9  ;;  %v650_v32 = vsel %vm610_vm0, %v616_v26, %v477_v21 }
 0x203   :  { %v482_v33 = vadd.f32 %v5418_v35, %v481_v31  ;;  %4427 = vmatmul.mubr.f32.gmra.mrb[34].mxu0 %v680_v29  ;;  %v649_v36 = vsel %vm610_vm0, %v615_v27, %v472_v24  ;;  %v682_v37 = vadd.f32 %v650_v32, %v5295_v50  ;;  %v1349_v50 = vld [vmem:[#allocation4 + $0x210] sm:$0xff] }
 0x204   :  { %v618_v39 = vmax.f32 %v487_v30, 0.0  ;;  %v681_v40 = vadd.f32 %v649_v36, %v5291_v48 }
 0x205   :  { %v617_v41 = vmax.f32 %v482_v33, 0.0  ;;  %v4357_v44 = vpop.f32.mrb[8].mxu1 }
 0x206   :  { %v497_v45 = vadd.f32 %v4357_v44, %v5418_v35  ;;  %v491_v46 = vpop.f32.mrb[9].mxu1  ;;  %4429 = vmatprep.mubr.f32.mxu0 %v681_v40  ;;  %v652_v49 = vsel %vm610_vm0, %v618_v39, %v487_v30 }
 0x207   :  { %v492_v14 = vadd.f32 %v5418_v35, %v491_v46  ;;  %4430 = vmatmul.mubr.f32.gmra.mrb[36].mxu0 %v682_v37  ;;  %v651_v15 = vsel %vm610_vm0, %v617_v41, %v482_v33  ;;  %v684_v16 = vadd.f32 %v652_v49, %v5301_v52  ;;  %v5615_v52 = vld [vmem:[#allocation2 + $0x8] sm:$0xff] }
 0x208   :  { %v620_v17 = vmax.f32 %v497_v45, 0.0  ;;  %v683_v18 = vadd.f32 %v651_v15, %v5297_v51 }
 0x209   :  { %v619_v19 = vmax.f32 %v492_v14, 0.0  ;;  %v4360_v20 = vpop.f32.mrb[10].mxu1 }
 0x20a   :  { %4432 = vmatprep.mubr.f32.mxu0 %v683_v18  ;;  %v507_v38 = vadd.f32 %v4360_v20, %v5418_v35  ;;  %v501_v21 = vpop.f32.mrb[11].mxu1  ;;  %v654_v22 = vsel %vm610_vm0, %v620_v17, %v497_v45 }
 0x20b   :  { %4433 = vmatmul.mubr.f32.gmra.mrb[38].mxu0 %v684_v16  ;;  %v502_v23 = vadd.f32 %v5418_v35, %v501_v21  ;;  %v653_v24 = vsel %vm610_vm0, %v619_v19, %v492_v14  ;;  %v686_v25 = vadd.f32 %v654_v22, %v5307_v54  ;;  %v1351_v54 = vld [vmem:[#allocation4 + $0x220] sm:$0xff] }
 0x20c   :  { %v622_v26 = vmax.f32 %v507_v38, 0.0  ;;  %v685_v9 = vadd.f32 %v653_v24, %v5303_v53 }
 0x20d   :  { %v621_v27 = vmax.f32 %v502_v23, 0.0  ;;  %v4363_v28 = vpop.f32.mrb[12].mxu1 }
 0x20e   :  { %4435 = vmatprep.mubr.f32.mxu0 %v685_v9  ;;  %v517_v29 = vadd.f32 %v4363_v28, %v5418_v35  ;;  %v511_v30 = vpop.f32.mrb[13].mxu1  ;;  %v656_v31 = vsel %vm610_vm0, %v622_v26, %v507_v38 }
 0x20f   :  { %4436 = vmatmul.mubr.f32.gmra.mrb[40].mxu0 %v686_v25  ;;  %v512_v32 = vadd.f32 %v5418_v35, %v511_v30  ;;  %v655_v33 = vsel %vm610_vm0, %v621_v27, %v502_v23  ;;  %v688_v36 = vadd.f32 %v656_v31, %v5313_v56  ;;  %v5143_v56 = vld [vmem:[#allocation2 + $0x10] sm:$0xff] }
 0x210   :  { %v624_v37 = vmax.f32 %v517_v29, 0.0  ;;  %v687_v39 = vadd.f32 %v655_v33, %v5309_v55 }
 0x211   :  { %v623_v40 = vmax.f32 %v512_v32, 0.0  ;;  %v4366_v41 = vpop.f32.mrb[14].mxu1 }
 0x212   :  { %4438 = vmatprep.mubr.f32.mxu0 %v687_v39  ;;  %v527_v44 = vadd.f32 %v4366_v41, %v5418_v35  ;;  %v521_v45 = vpop.f32.mrb[15].mxu1  ;;  %v658_v46 = vsel %vm610_vm0, %v624_v37, %v517_v29 }
 0x213   :  { %4439 = vmatmul.mubr.f32.gmra.mrb[42].mxu0 %v688_v36  ;;  %v522_v49 = vadd.f32 %v5418_v35, %v521_v45  ;;  %v657_v14 = vsel %vm610_vm0, %v623_v40, %v512_v32  ;;  %v690_v15 = vadd.f32 %v658_v46, %v5319_v58 }
 0x214   :  { %v626_v16 = vmax.f32 %v527_v44, 0.0  ;;  %v689_v17 = vadd.f32 %v657_v14, %v5315_v57 }
 0x215   :  { %v625_v18 = vmax.f32 %v522_v49, 0.0  ;;  %v4369_v19 = vpop.f32.mrb[16].mxu1 }
 0x216   :  { %4441 = vmatprep.mubr.f32.mxu0 %v689_v17  ;;  %v537_v20 = vadd.f32 %v4369_v19, %v5418_v35  ;;  %v531_v38 = vpop.f32.mrb[17].mxu1  ;;  %v660_v21 = vsel %vm610_vm0, %v626_v16, %v527_v44 }
 0x217   :  { %4442 = vmatmul.mubr.f32.gmra.mrb[44].mxu0 %v690_v15  ;;  %v532_v22 = vadd.f32 %v5418_v35, %v531_v38  ;;  %v659_v23 = vsel %vm610_vm0, %v625_v18, %v522_v49  ;;  %v692_v24 = vadd.f32 %v660_v21, %v5325_v60  ;;  %v1354_v60 = vld [vmem:[#allocation4 + $0x238] sm:$0xff] }
 0x218   :  { %v628_v25 = vmax.f32 %v537_v20, 0.0  ;;  %v691_v26 = vadd.f32 %v659_v23, %v5321_v59 }
 0x219   :  { %v627_v9 = vmax.f32 %v532_v22, 0.0  ;;  %v4372_v27 = vpop.f32.mrb[18].mxu1 }
 0x21a   :  { %4444 = vmatprep.mubr.f32.mxu0 %v691_v26  ;;  %v547_v28 = vadd.f32 %v4372_v27, %v5418_v35  ;;  %v541_v29 = vpop.f32.mrb[19].mxu1  ;;  %v662_v30 = vsel %vm610_vm0, %v628_v25, %v537_v20 }
 0x21b   :  { %4445 = vmatmul.mubr.f32.gmra.mrb[46].mxu0 %v692_v24  ;;  %v542_v31 = vadd.f32 %v5418_v35, %v541_v29  ;;  %v661_v32 = vsel %vm610_vm0, %v627_v9, %v532_v22  ;;  %v694_v33 = vadd.f32 %v662_v30, %v5331_v62  ;;  %v5146_v62 = vld [vmem:[#allocation2 + $0x28] sm:$0xff] }
 0x21c   :  { %v630_v36 = vmax.f32 %v547_v28, 0.0  ;;  %v693_v37 = vadd.f32 %v661_v32, %v5327_v61 }
 0x21d   :  { %v629_v39 = vmax.f32 %v542_v31, 0.0  ;;  %v4375_v40 = vpop.f32.mrb[20].mxu1 }
 0x21e   :  { %4447 = vmatprep.mubr.f32.mxu0 %v693_v37  ;;  %v557_v41 = vadd.f32 %v4375_v40, %v5418_v35  ;;  %v551_v44 = vpop.f32.mrb[21].mxu1  ;;  %v664_v45 = vsel %vm610_vm0, %v630_v36, %v547_v28 }
 0x21f   :  { %4448 = vmatmul.mubr.f32.gmra.mrb[48].mxu0 %v694_v33  ;;  %v552_v46 = vadd.f32 %v5418_v35, %v551_v44  ;;  %v663_v49 = vsel %vm610_vm0, %v629_v39, %v542_v31  ;;  %v696_v14 = vadd.f32 %v664_v45, %v5337_v0  ;;  %v5147_v0 = vld [vmem:[#allocation2 + $0x30] sm:$0xff] }
 0x220   :  { %v632_v15 = vmax.f32 %v557_v41, 0.0  ;;  %v695_v16 = vadd.f32 %v663_v49, %v5333_v63 }
 0x221   :  { %v631_v17 = vmax.f32 %v552_v46, 0.0  ;;  %v4378_v18 = vpop.f32.mrb[22].mxu1 }
 0x222   :  { %4450 = vmatprep.mubr.f32.mxu0 %v695_v16  ;;  %v567_v19 = vadd.f32 %v4378_v18, %v5418_v35  ;;  %v561_v20 = vpop.f32.mrb[23].mxu1  ;;  %v666_v38 = vsel %vm610_vm0, %v632_v15, %v557_v41 }
 0x223   :  { %4451 = vmatmul.mubr.f32.gmra.mrb[50].mxu0 %v696_v14  ;;  %v562_v21 = vadd.f32 %v5418_v35, %v561_v20  ;;  %v665_v22 = vsel %vm610_vm0, %v631_v17, %v552_v46  ;;  %v698_v23 = vadd.f32 %v666_v38, %v5343_v2  ;;  %v1355_v2 = vld [vmem:[#allocation4 + $0x240] sm:$0xff] }
 0x224   :  { %v634_v24 = vmax.f32 %v567_v19, 0.0  ;;  %v697_v25 = vadd.f32 %v665_v22, %v5339_v1 }
 0x225   :  { %v633_v26 = vmax.f32 %v562_v21, 0.0  ;;  %v4381_v9 = vpop.f32.mrb[24].mxu1 }
 0x226   :  { %4453 = vmatprep.mubr.f32.mxu0 %v697_v25  ;;  %v577_v27 = vadd.f32 %v4381_v9, %v5418_v35  ;;  %v571_v28 = vpop.f32.mrb[25].mxu1  ;;  %v668_v29 = vsel %vm610_vm0, %v634_v24, %v567_v19 }
 0x227   :  { %4454 = vmatmul.mubr.f32.gmra.mrb[52].mxu0 %v698_v23  ;;  %v572_v30 = vadd.f32 %v5418_v35, %v571_v28  ;;  %v667_v31 = vsel %vm610_vm0, %v633_v26, %v562_v21  ;;  %v700_v32 = vadd.f32 %v668_v29, %v5349_v4 }
 0x228   :  { %v636_v33 = vmax.f32 %v577_v27, 0.0  ;;  %v699_v36 = vadd.f32 %v667_v31, %v5345_v3 }
 0x229   :  { %v635_v37 = vmax.f32 %v572_v30, 0.0  ;;  %v4384_v39 = vpop.f32.mrb[26].mxu1 }
 0x22a   :  { %4456 = vmatprep.mubr.f32.mxu0 %v699_v36  ;;  %v587_v40 = vadd.f32 %v4384_v39, %v5418_v35  ;;  %v581_v41 = vpop.f32.mrb[27].mxu1  ;;  %v670_v44 = vsel %vm610_vm0, %v636_v33, %v577_v27 }
 0x22b   :  { %4457 = vmatmul.mubr.f32.gmra.mrb[54].mxu0 %v700_v32  ;;  %v582_v45 = vadd.f32 %v5418_v35, %v581_v41  ;;  %v669_v46 = vsel %vm610_vm0, %v635_v37, %v572_v30  ;;  %v702_v49 = vadd.f32 %v670_v44, %v5355_v6  ;;  %v1079_v41 = vld [vmem:[#allocation4 + $0x1f0] sm:$0xff]  ;;  %v1080_v44 = vld [vmem:[#allocation4 + $0x1f8] sm:$0xff]  ;;  %v5150_v6 = vld [vmem:[#allocation2 + $0x48] sm:$0xff] }
 0x22c   :  { %v638_v14 = vmax.f32 %v587_v40, 0.0  ;;  %v701_v15 = vadd.f32 %v669_v46, %v5351_v5  ;;  %v5551_v46 = vld [vmem:[#allocation2] sm:$0xff] }
 0x22d   :  { %v637_v16 = vmax.f32 %v582_v45, 0.0  ;;  %v4387_v17 = vpop.f32.mrb[28].mxu1  ;;  %2637 = vrot.lane.b32.xlu0 %v5551_v46, %s5225_s17 }
 0x22e   :  { %v597_v18 = vadd.f32 %v4387_v17, %v5418_v35  ;;  %4459 = vmatprep.mubr.f32.mxu0 %v701_v15  ;;  %v591_v19 = vpop.f32.mrb[29].mxu1  ;;  %v672_v20 = vsel %vm610_vm0, %v638_v14, %v587_v40  ;;  %v1361_v15 = vld [vmem:[#allocation4 + $0x270] sm:$0xff] }
 0x22f   :  { %v592_v38 = vadd.f32 %v5418_v35, %v591_v19  ;;  %4460 = vmatmul.mubr.f32.gmra.mrb[56].mxu0 %v702_v49  ;;  %v671_v21 = vsel %vm610_vm0, %v637_v16, %v582_v45  ;;  %v704_v22 = vadd.f32 %v672_v20, %v5361_v8  ;;  %v4995_v45 = vpack.c.bf16 %v1080_v44, %v1079_v41  ;;  %v1358_v8 = vld [vmem:[#allocation4 + $0x258] sm:$0xff]  ;;  %v5154_v19 = vld [vmem:[#allocation2 + $0x68] sm:$0xff]  ;;  %v5155_v20 = vld [vmem:[#allocation2 + $0x70] sm:$0xff] }
 0x230   :  { %v640_v23 = vmax.f32 %v597_v18, 0.0  ;;  %v703_v24 = vadd.f32 %v671_v21, %v5357_v7  ;;  %v5152_v49 = vld [vmem:[#allocation2 + $0x58] sm:$0xff]  ;;  %v2477_v21 = vmul.f32 %v5551_v46, %v5551_v46 }
 0x231   :  { %v639_v25 = vmax.f32 %v592_v38, 0.0  ;;  %v4390_v26 = vpop.f32.mrb[30].mxu1  ;;  %4996 = vmatprep.subr.bf16.mxu1 %v4995_v45  ;;  %2639 = vrot.lane.b32.xlu0 %v5283_v42, %s5225_s17  ;;  %v5226_v42 = vmov 48   ;;  %v1362_v16 = vld [vmem:[#allocation4 + $0x278] sm:$0xff]  ;;  %v2488_v41 = vmul.f32 %v5152_v49, %v5152_v49 }
 0x232   :  { %v607_v9 = vadd.f32 %v4390_v26, %v5418_v35  ;;  %v601_v27 = vpop.f32.mrb[31].mxu1  ;;  %4462 = vmatprep.mubr.f32.mxu0 %v703_v24  ;;  %v674_v28 = vsel %vm610_vm0, %v640_v23, %v597_v18  ;;  %4998 = vmatpush3.bf16.msra.mxu1 %v4995_v45  ;;  %v5027_v17 = vpack.c.bf16 %v1362_v16, %v1361_v15  ;;  %v5153_v18 = vld [vmem:[#allocation2 + $0x60] sm:$0xff]  ;;  %v5624_v24 = vld [vmem:[#allocation2 + $0x88] sm:$0xff] }
 0x233   :  { %v602_v29 = vadd.f32 %v5418_v35, %v601_v27  ;;  %4463 = vmatmul.mubr.f32.gmra.mrb[58].mxu0 %v704_v22  ;;  %v673_v30 = vsel %vm610_vm0, %v639_v25, %v592_v38  ;;  %v706_v31 = vadd.f32 %v674_v28, %v5367_v11  ;;  %5138 = vset.pattern.permute.xlu1 %v5226_v42  ;;  %v1360_v11 = vld [vmem:[#allocation4 + $0x268] sm:$0xff]  ;;  %v5156_v38 = vld [vmem:[#allocation2 + $0x78] sm:$0xff]  ;;  %v5621_v23 = vld [vmem:[#allocation2 + $0x80] sm:$0xff] }
 0x234   :  { %v642_v32 = vmax.f32 %v607_v9, 0.0  ;;  %v705_v33 = vadd.f32 %v673_v30, %v5363_v10  ;;  %5137 = vset.pattern.permute.xlu0 %v5226_v42  ;;  %2802 = vperm.xlu1 %5138, %v5615_v52   ;;  %v2479_v22 = vmul.f32 %v5143_v56, %v5143_v56  ;;  %v2478_v25 = vmul.f32 %v5615_v52, %v5615_v52 }
 0x235   :  { %v641_v36 = vmax.f32 %v602_v29, 0.0  ;;  %2645 = vrot.lane.b32.xlu0 %v5291_v48, %s5225_s17  ;;  %v4999_v48 = vpack.c.bf16 %v1348_v47, %v1347_v43  ;;  %v5640_v47 = vld [vmem:[#allocation2 + $0xa0] sm:$0xff] }
 0x236   :  { %4465 = vmatprep.mubr.f32.mxu0 %v705_v33  ;;  %v676_v37 = vsel %vm610_vm0, %v642_v32, %v607_v9  ;;  %v2482_v9 = vmul.f32 %v5146_v62, %v5146_v62  ;;  %v2511_v30 = vmul.f32 %v2479_v22, %v2479_v22  ;;  %v5629_v32 = vld [vmem:[#allocation2 + $0x90] sm:$0xff]  ;;  %v5632_v33 = vld [vmem:[#allocation2 + $0x98] sm:$0xff]  ;;  %v5705_v22 = vld [vmem:[%s7183_s1] ss:$0 sm:$0xff] }
 0x237   :  { %4466 = vmatmul.mubr.f32.gmra.mrb[60].mxu0 %v706_v31  ;;  %v675_v39 = vsel %vm610_vm0, %v641_v36, %v602_v29  ;;  %v708_v35 = vadd.f32 %v676_v37, %v5373_v13  ;;  %5000 = vmatprep.subr.bf16.mxu0 %v4999_v48  ;;  %v5151_v13 = vld [vmem:[#allocation2 + $0x50] sm:$0xff]  ;;  %v2509_v29 = vmul.f32 %v2477_v21, %v2477_v21 }
 0x238   :  { %v707_v40 = vadd.f32 %v675_v39, %v5369_v12  ;;  %5002 = vmatpush3.bf16.msra.mxu0 %v4999_v48  ;;  %2806 = vperm.xlu1 %5138, %v5143_v56   ;;  %v2483_v31 = vmul.f32 %v5147_v0, %v5147_v0  ;;  %v2510_v36 = vmul.f32 %v2478_v25, %v2478_v25  ;;  %v5637_v42 = vmul.f32 5.67e-08, %v2511_v30  ;;  %v5643_v48 = vld [vmem:[#allocation2 + $0xa8] sm:$0xff] }
 0x239   :  { %2649 = vrot.lane.b32.xlu0 %v5297_v51, %s5225_s17  ;;  %v1350_v51 = vld [vmem:[#allocation4 + $0x218] sm:$0xff]  ;;  %v2486_v37 = vmul.f32 %v5150_v6, %v5150_v6  ;;  %v2520_v56 = vmul.f32 %v2488_v41, %v2488_v41  ;;  %v2494_v21 = vmul.f32 %v5624_v24, %v5624_v24 }
 0x23a   :  { %4468 = vmatprep.mubr.f32.mxu0 %v707_v40  ;;  %v2514_v40 = vmul.f32 %v2482_v9, %v2482_v9  ;;  %v2515_v43 = vmul.f32 %v2483_v31, %v2483_v31  ;;  %v5711_v9 = vld [vmem:[#allocation2 + $0xc8] sm:$0xff] }
 0x23b   :  { %4469 = vmatmul.mubr.f32.gmra.mrb[62].mxu0 %v708_v35 }
 0x23d   :  { %2653 = vrot.lane.b32.xlu0 %v5303_v53, %s5225_s17  ;;  %v5003_v53 = vpack.c.bf16 %v1350_v51, %v1349_v50  ;;  %v5646_v50 = vmul.f32 5.67e-08, %v2510_v36  ;;  %v2518_v51 = vmul.f32 %v2486_v37, %v2486_v37  ;;  %v2493_v36 = vmul.f32 %v5621_v23, %v5621_v23 }
 0x23f   :  { %5004 = vmatprep.subr.bf16.mxu0 %v5003_v53 }
 0x240   :  { %5006 = vmatpush3.bf16.msra.mxu0 %v5003_v53  ;;  %v2487_v53 = vmul.f32 %v5151_v13, %v5151_v13 }
 0x241   :  { %2657 = vrot.lane.b32.xlu0 %v5309_v55, %s5225_s17  ;;  %v1352_v55 = vld [vmem:[#allocation4 + $0x228] sm:$0xff] }
 0x242   :  { %v5007_v58 = vpack.c.bf16 %v1352_v55, %v1351_v54  ;;  %v5650_v55 = vmul.f32 5.67e-08, %v2514_v40 }
 0x244   :  { %5008 = vmatprep.subr.bf16.mxu0 %v5007_v58 }
 0x245   :  { %2661 = vrot.lane.b32.xlu0 %v5315_v57, %s5225_s17  ;;  %v5144_v57 = vld [vmem:[#allocation2 + $0x18] sm:$0xff]  ;;  %5010 = vmatpush3.bf16.msra.mxu0 %v5007_v58  ;;  %v5655_v58 = vld [vmem:[%s7185_s3 + $0x2] ss:$0 sm:$0xff] }
 0x246   :  { %v2480_v26 = vmul.f32 %v5144_v57, %v5144_v57 }
 0x248   :  { %v2512_v35 = vmul.f32 %v2480_v26, %v2480_v26  ;;  %v5708_v26 = vld [vmem:[#allocation2 + $0xc0] sm:$0xff] }
 0x249   :  { %2665 = vrot.lane.b32.xlu0 %v5321_v59, %s5225_s17  ;;  %v1353_v59 = vld [vmem:[#allocation4 + $0x230] sm:$0xff] }
 0x24a   :  { %v5648_v54 = vmul.f32 5.67e-08, %v2512_v35 }
 0x24d   :  { %2669 = vrot.lane.b32.xlu0 %v5327_v61, %s5225_s17  ;;  %v5145_v61 = vld [vmem:[#allocation2 + $0x20] sm:$0xff] }
 0x24e   :  { %2814 = vperm.xlu1 %5138, %v5145_v61   ;;  %v2481_v27 = vmul.f32 %v5145_v61, %v5145_v61  ;;  %v2489_v61 = vmul.f32 %v5153_v18, %v5153_v18 }
 0x250   :  { %v2513_v44 = vmul.f32 %v2481_v27, %v2481_v27  ;;  %v2521_v16 = vmul.f32 %v2489_v61, %v2489_v61  ;;  %v5746_v61 = vld [vmem:[#allocation2 + $0xd8] sm:$0xff] }
 0x251   :  { %2673 = vrot.lane.b32.xlu0 %v5333_v63, %s5225_s17  ;;  %v5011_v63 = vpack.c.bf16 %v1354_v60, %v1353_v59 }
 0x252   :  { %2822 = vperm.xlu1 %5138, %v5147_v0   ;;  %v5657_v59 = vmul.f32 5.67e-08, %v2513_v44  ;;  %v5665_v0 = vmul.f32 0.1, %v5637_v42  ;;  %v5729_v40 = vmul.f32 5.67e-08, %v2521_v16  ;;  %v2525_v16 = vmul.f32 %v2493_v36, %v2493_v36 }
 0x253   :  { %5012 = vmatprep.subr.bf16.mxu0 %v5011_v63 }
 0x254   :  { %5014 = vmatpush3.bf16.msra.mxu0 %v5011_v63  ;;  %7216 = vst [vmem:[#allocation8_spill] sm:$0xff] %v5729_v40 }
 0x255   :  { %2677 = vrot.lane.b32.xlu0 %v5339_v1, %s5225_s17  ;;  %v5148_v1 = vld [vmem:[#allocation2 + $0x38] sm:$0xff] }
 0x256   :  { %v2484_v28 = vmul.f32 %v5148_v1, %v5148_v1 }
 0x258   :  { %v2516_v45 = vmul.f32 %v2484_v28, %v2484_v28 }
 0x259   :  { %2681 = vrot.lane.b32.xlu0 %v5345_v3, %s5225_s17  ;;  %v1356_v3 = vld [vmem:[#allocation4 + $0x248] sm:$0xff] }
 0x25a   :  { %v5015_v4 = vpack.c.bf16 %v1356_v3, %v1355_v2  ;;  %v5659_v60 = vmul.f32 5.67e-08, %v2516_v45  ;;  %v2491_v2 = vmul.f32 %v5155_v20, %v5155_v20  ;;  %v5669_v3 = vld [vmem:[#allocation2 + $0xb0] sm:$0xff] }
 0x25c   :  { %5016 = vmatprep.subr.bf16.mxu0 %v5015_v4  ;;  %v5694_v15 = vmul.f32 0.1, %v5659_v60 }
 0x25d   :  { %2685 = vrot.lane.b32.xlu0 %v5351_v5, %s5225_s17  ;;  %v5149_v5 = vld [vmem:[#allocation2 + $0x40] sm:$0xff]  ;;  %5018 = vmatpush3.bf16.msra.mxu0 %v5015_v4  ;;  %v5672_v4 = vld [vmem:[#allocation2 + $0xb8] sm:$0xff] }
 0x25e   :  { %2830 = vperm.xlu1 %5138, %v5149_v5   ;;  %v2485_v39 = vmul.f32 %v5149_v5, %v5149_v5  ;;  %v5676_v5 = vmul.f32 0.1, %v5646_v50 }
 0x260   :  { %v2517_v52 = vmul.f32 %v2485_v39, %v2485_v39 }
 0x261   :  { %2689 = vrot.lane.b32.xlu0 %v5357_v7, %s5225_s17  ;;  %v1357_v7 = vld [vmem:[#allocation4 + $0x250] sm:$0xff] }
 0x262   :  { %2838 = vperm.xlu1 %5138, %v5151_v13  }
 0x265   :  { %2693 = vrot.lane.b32.xlu0 %v5363_v10, %s5225_s17  ;;  %v1359_v10 = vld [vmem:[#allocation4 + $0x260] sm:$0xff] }
 0x266   :  { %v5023_v14 = vpack.c.bf16 %v1360_v11, %v1359_v10  ;;  %2846 = vperm.xlu1 %5138, %v5153_v18   ;;  %v5683_v10 = vmul.f32 0.1, %v5648_v54  ;;  %v5686_v11 = vmul.f32 0.1, %v5650_v55 }
 0x269   :  { %2697 = vrot.lane.b32.xlu0 %v5369_v12, %s5225_s17  ;;  %v5019_v12 = vpack.c.bf16 %v1358_v8, %v1357_v7  ;;  %v5680_v7 = vmul.f32 5.67e-08, %v2517_v52  ;;  %v2519_v8 = vmul.f32 %v2487_v53, %v2487_v53  ;;  %v2526_v53 = vmul.f32 %v2494_v21, %v2494_v21 }
 0x26a   :  { %2854 = vperm.xlu1 %5138, %v5155_v20   ;;  %v5760_v21 = vmul.f32 0.1, %v5729_v40 }
 0x26b   :  { %5020 = vmatprep.subr.bf16.mxu0 %v5019_v12  ;;  %v5720_v28 = vmul.f32 5.67e-08, %v2519_v8 }
 0x26c   :  { %5022 = vmatpush3.bf16.msra.mxu0 %v5019_v12  ;;  %v5688_v12 = vmul.f32 5.67e-08, %v2520_v56 }
 0x26d   :  { %2798 = vperm.xlu0 %5137, %v5551_v46   ;;  %5024 = vmatprep.subr.bf16.mxu0 %v5023_v14  ;;  %v5635_v46 = vmul.f32 5.67e-08, %v2509_v29 }
 0x26e   :  { %2862 = vperm.xlu1 %5138, %v5621_v23   ;;  %v5723_v30 = vmul.f32 0.1, %v5688_v12 }
 0x26f   :  { %v5662_v63 = vmul.f32 0.1, %v5635_v46 }
 0x270   :  { %5026 = vmatpush3.bf16.msra.mxu0 %v5023_v14  ;;  %v5691_v14 = vmul.f32 0.1, %v5657_v59 }
 0x271   :  { %2810 = vperm.xlu0 %5137, %v5144_v57   ;;  %5028 = vmatprep.subr.bf16.mxu0 %v5027_v17  ;;  %v2490_v57 = vmul.f32 %v5154_v19, %v5154_v19 }
 0x272   :  { %2870 = vperm.xlu1 %5138, %v5629_v32  }
 0x273   :  { %v2522_v13 = vmul.f32 %v2490_v57, %v2490_v57  ;;  %v5743_v57 = vld [vmem:[#allocation2 + $0xd0] sm:$0xff] }
 0x274   :  { %5030 = vmatpush3.bf16.msra.mxu0 %v5027_v17 }
 0x275   :  { %2818 = vperm.xlu0 %5137, %v5146_v62   ;;  %v2492_v62 = vmul.f32 %v5156_v38, %v5156_v38  ;;  %v5725_v31 = vmul.f32 5.67e-08, %v2522_v13 }
 0x276   :  { %2878 = vperm.xlu1 %5138, %v5640_v47  }
 0x277   :  { %v2524_v17 = vmul.f32 %v2492_v62, %v2492_v62  ;;  %v5750_v62 = vmul.f32 0.1, %v5720_v28 }
 0x279   :  { %2826 = vperm.xlu0 %5137, %v5148_v1   ;;  %v5667_v1 = vmul.f32 5.67e-08, %v2515_v43  ;;  %v5731_v41 = vmul.f32 5.67e-08, %v2524_v17 }
 0x27a   :  { %2886 = vperm.xlu1 %5138, %v5669_v3  }
 0x27b   :  { %v5698_v20 = vmul.f32 0.1, %v5667_v1  ;;  %7217 = vst [vmem:[#allocation9_spill] sm:$0xff] %v5731_v41  ;;  %v5768_v36 = vmul.f32 0.1, %v5731_v41  ;;  %v5782_v41 = vld [vmem:[#allocation2 + $0xe8] sm:$0xff] }
 0x27c   :  { %7221 = vst [vmem:[#allocation13_spill] sm:$0xff] %v5782_v41 }
 0x27d   :  { %2834 = vperm.xlu0 %5137, %v5150_v6   ;;  %v5678_v6 = vmul.f32 5.67e-08, %v2518_v51  ;;  %v5736_v51 = vpop.permute.xlu1 %2641 }
 0x27e   :  { %2894 = vperm.xlu1 %5138, %v5708_v26  }
 0x27f   :  { %v5715_v27 = vmul.f32 0.1, %v5678_v6 }
 0x281   :  { %2842 = vperm.xlu0 %5137, %v5152_v49  }
 0x282   :  { %2902 = vperm.xlu1 %5138, %v5743_v57  }
 0x285   :  { %2850 = vperm.xlu0 %5137, %v5154_v19  }
 0x289   :  { %2858 = vperm.xlu0 %5137, %v5156_v38   ;;  %v2523_v38 = vmul.f32 %v2491_v2, %v2491_v2  ;;  %v2496_v2 = vmul.f32 %v5632_v33, %v5632_v33 }
 0x28b   :  { %v5738_v52 = vmul.f32 5.67e-08, %v2523_v38 }
 0x28d   :  { %2866 = vperm.xlu0 %5137, %v5624_v24   ;;  %v5718_v24 = vmul.f32 0.1, %v5680_v7  ;;  %7218 = vst [vmem:[#allocation10_spill] sm:$0xff] %v5738_v52 }
 0x291   :  { %2874 = vperm.xlu0 %5137, %v5632_v33  }
 0x295   :  { %2882 = vperm.xlu0 %5137, %v5643_v48  }
 0x299   :  { %2890 = vperm.xlu0 %5137, %v5672_v4  }
 0x29d   :  { %2898 = vperm.xlu0 %5137, %v5711_v9  }
 0x29f   :  { %v2638_v35 = vpop.permute.xlu0 %2637 }
 0x2a1   :  { %2906 = vperm.xlu0 %5137, %v5746_v61  }
 0x2a3   :  { %v2640_v38 = vpop.permute.xlu0 %2639 }
 0x2a5   :  { %2914 = vperm.xlu0 %5137, %v5782_v41  }
 0x2d2   :  { %v4425_v49 = vpop.f32.mrb[32].mxu0 }
 0x2d3   :  { %v806_v18 = vadd.f32 %v4425_v49, %v5655_v58  ;;  %v800_v19 = vpop.f32.mrb[33].mxu0  ;;  %v5756_v49 = vmul.f32 0.1, %v5725_v31 }
 0x2d4   :  { %v801_v25 = vadd.f32 %v5655_v58, %v800_v19 }
 0x2d5   :  { %v961_v29 = vmax.f32 %v806_v18, 0.0 }
 0x2d6   :  { %v960_v37 = vmax.f32 %v801_v25, 0.0  ;;  %v4428_v39 = vpop.f32.mrb[34].mxu0 }
 0x2d7   :  { %v995_v44 = vsel %vm959_vm1, %v961_v29, %v806_v18  ;;  %v816_v45 = vadd.f32 %v4428_v39, %v5655_v58  ;;  %v810_v43 = vpop.f32.mrb[35].mxu0  ;;  %v2644_v39 = vpop.permute.xlu1 %2643 }
 0x2d8   :  { %v811_v23 = vadd.f32 %v5655_v58, %v810_v43  ;;  %v994_v56 = vsel %vm959_vm1, %v960_v37, %v801_v25  ;;  %v1033_v17 = vmul.f32 %v5705_v22, %v995_v44  ;;  %v2495_v25 = vmul.f32 %v5629_v32, %v5629_v32 }
 0x2d9   :  { %v963_v8 = vmax.f32 %v816_v45, 0.0  ;;  %v1032_v13 = vmul.f32 %v5705_v22, %v994_v56  ;;  %v5771_v44 = vmul.f32 0.1, %v5738_v52  ;;  %v5776_v56 = vld [vmem:[#allocation2 + $0xe0] sm:$0xff] }
 0x2da   :  { %v962_v18 = vmax.f32 %v811_v23, 0.0  ;;  %v4431_v19 = vpop.f32.mrb[36].mxu0  ;;  %7220 = vst [vmem:[#allocation12_spill] sm:$0xff] %v5776_v56  ;;  %2910 = vperm.xlu1 %5138, %v5776_v56   ;;  %v2733_v56 = vmul.f32 %v2638_v35, %v5662_v63 }
 0x2db   :  { %v826_v33 = vadd.f32 %v4431_v19, %v5655_v58  ;;  %v820_v29 = vpop.f32.mrb[37].mxu0  ;;  %4503 = vmatprep.mubr.f32.mxu1 %v1032_v13  ;;  %v997_v37 = vsel %vm959_vm1, %v963_v8, %v816_v45  ;;  %7219 = vst [vmem:[#allocation11_spill] sm:$0xff] %v5771_v44  ;;  %v5779_v13 = vmul.f32 5.67e-08, %v2526_v53  ;;  %v2528_v45 = vmul.f32 %v2496_v2, %v2496_v2  ;;  %v2646_v53 = vpop.permute.xlu0 %2645 }
 0x2dc   :  { %v821_v43 = vadd.f32 %v5655_v58, %v820_v29  ;;  %4504 = vmatmul.mubr.f32.vlgmr.msra.gmra.mrb[32].mxu1 %v1033_v17  ;;  %v996_v32 = vsel %vm959_vm1, %v962_v18, %v811_v23  ;;  %v2734_v29 = vmul.f32 %v2640_v38, %v5676_v5  ;;  %v5786_v17 = vmul.f32 5.67e-08, %v2525_v16  ;;  %v2648_v41 = vpop.permute.xlu1 %2647 }
 0x2dd   :  { %v965_v8 = vmax.f32 %v826_v33, 0.0  ;;  %v1034_v19 = vmul.f32 %v5705_v22, %v996_v32  ;;  %v1035_v18 = vmul.f32 %v5705_v22, %v997_v37  ;;  %v2527_v44 = vmul.f32 %v2495_v25, %v2495_v25  ;;  %v5801_v25 = vld [vmem:[#allocation2 + $0xf0] sm:$0xff] }
 0x2de   :  { %v964_v52 = vmax.f32 %v821_v43, 0.0  ;;  %v4434_v23 = vpop.f32.mrb[38].mxu0  ;;  %v2498_v5 = vmul.f32 %v5643_v48, %v5643_v48  ;;  %v2497_v16 = vmul.f32 %v5640_v47, %v5640_v47  ;;  %7222 = vst [vmem:[#allocation14_spill] sm:$0xff] %v5801_v25  ;;  %2918 = vperm.xlu1 %5138, %v5801_v25   ;;  %v2766_v47 = vadd.f32 %v2734_v29, %v5646_v50 }
 0x2df   :  { %v836_v2 = vadd.f32 %v4434_v23, %v5655_v58  ;;  %v830_v40 = vpop.f32.mrb[39].mxu0  ;;  %4506 = vmatprep.mubr.f32.mxu1 %v1034_v19  ;;  %v999_v32 = vsel %vm959_vm1, %v965_v8, %v826_v33  ;;  %v5805_v33 = vmul.f32 0.1, %v5779_v13  ;;  %v5809_v8 = vld [vmem:[#allocation2 + $0xf8] sm:$0xff]  ;;  %v2765_v19 = vadd.f32 %v2733_v56, %v5635_v46 }
 0x2e0   :  { %v831_v38 = vadd.f32 %v5655_v58, %v830_v40  ;;  %4507 = vmatmul.mubr.f32.gmra.mrb[34].mxu1 %v1035_v18  ;;  %v998_v63 = vsel %vm959_vm1, %v964_v52, %v821_v43  ;;  %v1037_v35 = vmul.f32 %v5705_v22, %v999_v32  ;;  %2922 = vperm.xlu0 %5137, %v5809_v8   ;;  %v2650_v18 = vpop.permute.xlu0 %2649  ;;  %v5816_v32 = vmul.f32 5.67e-08, %v2528_v45  ;;  %v2652_v29 = vpop.permute.xlu1 %2651 }
 0x2e1   :  { %v967_v37 = vmax.f32 %v836_v2, 0.0  ;;  %v1036_v48 = vmul.f32 %v5705_v22, %v998_v63  ;;  %v2736_v40 = vmul.f32 %v2644_v39, %v5683_v10  ;;  %v2735_v23 = vmul.f32 %v5736_v51, %v5665_v0 }
 0x2e2   :  { %v966_v52 = vmax.f32 %v831_v38, 0.0  ;;  %v4437_v43 = vpop.f32.mrb[40].mxu0  ;;  %v2500_v10 = vmul.f32 %v5672_v4, %v5672_v4  ;;  %v2499_v46 = vmul.f32 %v5669_v3, %v5669_v3  ;;  %v5227_v56 = vmov 0  }
 0x2e3   :  { %v846_v63 = vadd.f32 %v4437_v43, %v5655_v58  ;;  %v840_v25 = vpop.f32.mrb[41].mxu0  ;;  %4509 = vmatprep.mubr.f32.mxu1 %v1036_v48  ;;  %v1001_v50 = vsel %vm959_vm1, %v967_v37, %v836_v2  ;;  %5140 = vset.pattern.permute.xlu1 %v5227_v56  ;;  %v5830_v45 = vmul.f32 0.1, %v5786_v17  ;;  %v2768_v4 = vadd.f32 %v2736_v40, %v5648_v54 }
 0x2e4   :  { %v841_v39 = vadd.f32 %v5655_v58, %v840_v25  ;;  %4510 = vmatmul.mubr.f32.gmra.mrb[36].mxu1 %v1037_v35  ;;  %v1000_v0 = vsel %vm959_vm1, %v966_v52, %v831_v38  ;;  %v1039_v51 = vmul.f32 %v5705_v22, %v1001_v50  ;;  %5139 = vset.pattern.permute.xlu0 %v5227_v56  ;;  %v2654_v52 = vpop.permute.xlu0 %2653  ;;  %v5837_v43 = vmul.f32 5.67e-08, %v2527_v44 }
 0x2e5   :  { %v969_v2 = vmax.f32 %v846_v63, 0.0  ;;  %v1038_v37 = vmul.f32 %v5705_v22, %v1000_v0  ;;  %3156 = vperm.xlu1 %5140, %v2766_v47   ;;  %v2738_v3 = vmul.f32 %v2648_v41, %v5686_v11  ;;  %v2767_v38 = vadd.f32 %v2735_v23, %v5637_v42  ;;  %3151 = vperm.xlu0 %5139, %v2765_v19   ;;  %v2656_v47 = vpop.permute.xlu1 %2655 }
 0x2e6   :  { %v968_v35 = vmax.f32 %v841_v39, 0.0  ;;  %v4440_v25 = vpop.f32.mrb[42].mxu0  ;;  %v2737_v48 = vmul.f32 %v2646_v53, %v5691_v14  ;;  %v2530_v40 = vmul.f32 %v2498_v5, %v2498_v5  ;;  %v2529_v11 = vmul.f32 %v2497_v16, %v2497_v16 }
 0x2e7   :  { %4512 = vmatprep.mubr.f32.mxu1 %v1038_v37  ;;  %v856_v50 = vadd.f32 %v4440_v25, %v5655_v58  ;;  %v850_v0 = vpop.f32.mrb[43].mxu0  ;;  %v1003_v54 = vsel %vm959_vm1, %v969_v2, %v846_v63  ;;  %v5847_v44 = vmul.f32 0.1, %v5816_v32  ;;  %v2770_v23 = vadd.f32 %v2738_v3, %v5650_v55 }
 0x2e8   :  { %4513 = vmatmul.mubr.f32.gmra.mrb[38].mxu1 %v1039_v51  ;;  %v851_v41 = vadd.f32 %v5655_v58, %v850_v0  ;;  %v1002_v42 = vsel %vm959_vm1, %v968_v35, %v841_v39  ;;  %v1041_v14 = vmul.f32 %v5705_v22, %v1003_v54  ;;  %v2740_v5 = vmul.f32 %v2652_v29, %v5694_v15  ;;  %v2658_v56 = vpop.permute.xlu0 %2657 }
 0x2e9   :  { %v971_v53 = vmax.f32 %v856_v50, 0.0  ;;  %v1040_v19 = vmul.f32 %v5705_v22, %v1002_v42  ;;  %3166 = vperm.xlu1 %5140, %v2768_v4   ;;  %v2769_v51 = vadd.f32 %v2737_v48, %v5657_v59  ;;  %3161 = vperm.xlu0 %5139, %v2767_v38   ;;  %v2739_v39 = vmul.f32 %v2650_v18, %v5698_v20  ;;  %v2660_v55 = vpop.permute.xlu1 %2659 }
 0x2ea   :  { %v970_v16 = vmax.f32 %v851_v41, 0.0  ;;  %v4443_v63 = vpop.f32.mrb[44].mxu0  ;;  %v2532_v2 = vmul.f32 %v2500_v10, %v2500_v10  ;;  %v5858_v4 = vmul.f32 0.1, %v5837_v43  ;;  %v2531_v15 = vmul.f32 %v2499_v46, %v2499_v46 }
 0x2eb   :  { %4515 = vmatprep.mubr.f32.mxu1 %v1040_v19  ;;  %v866_v37 = vadd.f32 %v4443_v63, %v5655_v58  ;;  %v860_v35 = vpop.f32.mrb[45].mxu0  ;;  %v1005_v25 = vsel %vm959_vm1, %v971_v53, %v856_v50  ;;  %v5864_v29 = vmul.f32 5.67e-08, %v2530_v40  ;;  %v2772_v38 = vadd.f32 %v2740_v5, %v5659_v60 }
 0x2ec   :  { %4516 = vmatmul.mubr.f32.gmra.mrb[40].mxu1 %v1041_v14  ;;  %v861_v59 = vadd.f32 %v5655_v58, %v860_v35  ;;  %v1004_v20 = vsel %vm959_vm1, %v970_v16, %v851_v41  ;;  %v1043_v18 = vmul.f32 %v5705_v22, %v1005_v25  ;;  %v2742_v48 = vmul.f32 %v2656_v47, %v5715_v27  ;;  %v2662_v41 = vpop.permute.xlu0 %2661 }
 0x2ed   :  { %v973_v10 = vmax.f32 %v866_v37, 0.0  ;;  %v1042_v3 = vmul.f32 %v5705_v22, %v1004_v20  ;;  %3176 = vperm.xlu1 %5140, %v2770_v23   ;;  %v2771_v0 = vadd.f32 %v2739_v39, %v5667_v1  ;;  %3171 = vperm.xlu0 %5139, %v2769_v51   ;;  %v2741_v54 = vmul.f32 %v2654_v52, %v5718_v24  ;;  %v2664_v53 = vpop.permute.xlu1 %2663 }
 0x2ee   :  { %v972_v50 = vmax.f32 %v861_v59, 0.0  ;;  %v4446_v46 = vpop.f32.mrb[46].mxu0  ;;  %v5871_v42 = vmul.f32 5.67e-08, %v2529_v11  ;;  %v5876_v19 = vmul.f32 5.67e-08, %v2532_v2  ;;  %v2502_v27 = vmul.f32 %v5711_v9, %v5711_v9 }
 0x2ef   :  { %4518 = vmatprep.mubr.f32.mxu1 %v1042_v3  ;;  %v876_v40 = vadd.f32 %v4446_v46, %v5655_v58  ;;  %v870_v14 = vpop.f32.mrb[47].mxu0  ;;  %v1007_v60 = vsel %vm959_vm1, %v973_v10, %v866_v37  ;;  %v5884_v47 = vmul.f32 5.67e-08, %v2531_v15  ;;  %v2774_v5 = vadd.f32 %v2742_v48, %v5678_v6 }
 0x2f0   :  { %4519 = vmatmul.mubr.f32.gmra.mrb[42].mxu1 %v1043_v18  ;;  %v871_v1 = vadd.f32 %v5655_v58, %v870_v14  ;;  %v1006_v24 = vsel %vm959_vm1, %v972_v50, %v861_v59  ;;  %v1045_v52 = vmul.f32 %v5705_v22, %v1007_v60  ;;  %v2744_v16 = vmul.f32 %v2660_v55, %v5723_v30  ;;  %v2666_v2 = vpop.permute.xlu0 %2665 }
 0x2f1   :  { %v975_v11 = vmax.f32 %v876_v40, 0.0  ;;  %v1044_v23 = vmul.f32 %v5705_v22, %v1006_v24  ;;  %3186 = vperm.xlu1 %5140, %v2772_v38   ;;  %v2773_v51 = vadd.f32 %v2741_v54, %v5680_v7  ;;  %3181 = vperm.xlu0 %5139, %v2771_v0   ;;  %v2743_v39 = vmul.f32 %v2658_v56, %v5750_v62  ;;  %v2668_v15 = vpop.permute.xlu1 %2667 }
 0x2f2   :  { %v974_v63 = vmax.f32 %v871_v1, 0.0  ;;  %v4449_v9 = vpop.f32.mrb[48].mxu0  ;;  %v2501_v37 = vmul.f32 %v5708_v26, %v5708_v26  ;;  %v5897_v30 = vmul.f32 0.1, %v5864_v29  ;;  %v2504_v7 = vmul.f32 %v5746_v61, %v5746_v61 }
 0x2f3   :  { %4521 = vmatprep.mubr.f32.mxu1 %v1044_v23  ;;  %v886_v35 = vadd.f32 %v4449_v9, %v5655_v58  ;;  %v880_v25 = vpop.f32.mrb[49].mxu0  ;;  %v1009_v6 = vsel %vm959_vm1, %v975_v11, %v876_v40  ;;  %v5906_v55 = vmul.f32 0.1, %v5871_v42  ;;  %v2776_v18 = vadd.f32 %v2744_v16, %v5688_v12  ;;  %v7223_v11 = vld [vmem:[#allocation8_spill] sm:$0xff] }
 0x2f4   :  { %4522 = vmatmul.mubr.f32.gmra.mrb[44].mxu1 %v1045_v52  ;;  %v881_v62 = vadd.f32 %v5655_v58, %v880_v25  ;;  %v1008_v26 = vsel %vm959_vm1, %v974_v63, %v871_v1  ;;  %v1047_v56 = vmul.f32 %v5705_v22, %v1009_v6  ;;  %v2746_v10 = vmul.f32 %v2664_v53, %v5756_v49  ;;  %v2670_v50 = vpop.permute.xlu0 %2669 }
 0x2f5   :  { %v977_v59 = vmax.f32 %v886_v35, 0.0  ;;  %v1046_v20 = vmul.f32 %v5705_v22, %v1008_v26  ;;  %3196 = vperm.xlu1 %5140, %v2774_v5   ;;  %v2775_v38 = vadd.f32 %v2743_v39, %v5720_v28  ;;  %3191 = vperm.xlu0 %5139, %v2773_v51   ;;  %v2745_v48 = vmul.f32 %v2662_v41, %v5760_v21  ;;  %v2672_v12 = vpop.permute.xlu1 %2671  ;;  %v7224_v5 = vld [vmem:[#allocation11_spill] sm:$0xff] }
 0x2f6   :  { %v976_v61 = vmax.f32 %v881_v62, 0.0  ;;  %v4452_v3 = vpop.f32.mrb[50].mxu0  ;;  %v2534_v46 = vmul.f32 %v2502_v27, %v2502_v27  ;;  %v5917_v14 = vmul.f32 0.1, %v5876_v19  ;;  %v2503_v49 = vmul.f32 %v5743_v57, %v5743_v57 }
 0x2f7   :  { %4524 = vmatprep.mubr.f32.mxu1 %v1046_v20  ;;  %v896_v0 = vadd.f32 %v4452_v3, %v5655_v58  ;;  %v890_v54 = vpop.f32.mrb[51].mxu0  ;;  %v1011_v40 = vsel %vm959_vm1, %v977_v59, %v886_v35  ;;  %v5926_v60 = vmul.f32 0.1, %v5884_v47  ;;  %v2778_v1 = vadd.f32 %v2746_v10, %v5725_v31 }
 0x2f8   :  { %4525 = vmatmul.mubr.f32.gmra.mrb[46].mxu1 %v1047_v56  ;;  %v891_v28 = vadd.f32 %v5655_v58, %v890_v54  ;;  %v1010_v21 = vsel %vm959_vm1, %v976_v61, %v881_v62  ;;  %v1049_v41 = vmul.f32 %v5705_v22, %v1011_v40  ;;  %v2748_v24 = vmul.f32 %v2668_v15, %v5768_v36  ;;  %v2674_v63 = vpop.permute.xlu0 %2673  ;;  %v7225_v56 = vld [vmem:[#allocation9_spill] sm:$0xff] }
 0x2f9   :  { %v979_v53 = vmax.f32 %v896_v0, 0.0  ;;  %v1048_v27 = vmul.f32 %v5705_v22, %v1010_v21  ;;  %3206 = vperm.xlu1 %5140, %v2776_v18   ;;  %v2777_v23 = vadd.f32 %v2745_v48, %v7223_v11  ;;  %3201 = vperm.xlu0 %5139, %v2775_v38   ;;  %v2747_v16 = vmul.f32 %v2666_v2, %v7224_v5  ;;  %v2676_v31 = vpop.permute.xlu1 %2675  ;;  %v7227_v48 = vld [vmem:[#allocation13_spill] sm:$0xff]  ;;  %v7228_v21 = vld [vmem:[#allocation12_spill] sm:$0xff] }
 0x2fa   :  { %v978_v57 = vmax.f32 %v891_v28, 0.0  ;;  %v4455_v52 = vpop.f32.mrb[52].mxu0  ;;  %v2533_v9 = vmul.f32 %v2501_v37, %v2501_v37  ;;  %v5936_v25 = vmul.f32 5.67e-08, %v2534_v46  ;;  %v2536_v36 = vmul.f32 %v2504_v7, %v2504_v7  ;;  %v7226_v7 = vld [vmem:[#allocation10_spill] sm:$0xff] }
 0x2fb   :  { %4527 = vmatprep.mubr.f32.mxu1 %v1048_v27  ;;  %v906_v51 = vadd.f32 %v4455_v52, %v5655_v58  ;;  %v900_v39 = vpop.f32.mrb[53].mxu0  ;;  %v1013_v35 = vsel %vm959_vm1, %v979_v53, %v896_v0  ;;  %v2535_v37 = vmul.f32 %v2503_v49, %v2503_v49  ;;  %v2780_v59 = vadd.f32 %v2748_v24, %v7225_v56 }
 0x2fc   :  { %4528 = vmatmul.mubr.f32.gmra.mrb[48].mxu1 %v1049_v41  ;;  %v901_v6 = vadd.f32 %v5655_v58, %v900_v39  ;;  %v1012_v15 = vsel %vm959_vm1, %v978_v57, %v891_v28  ;;  %v1051_v2 = vmul.f32 %v5705_v22, %v1013_v35  ;;  %v2750_v20 = vmul.f32 %v2672_v12, %v5805_v33  ;;  %v2678_v38 = vpop.permute.xlu0 %2677 }
 0x2fd   :  { %v981_v62 = vmax.f32 %v906_v51, 0.0  ;;  %v1050_v26 = vmul.f32 %v5705_v22, %v1012_v15  ;;  %3216 = vperm.xlu1 %5140, %v2778_v1   ;;  %v2779_v61 = vadd.f32 %v2747_v16, %v7226_v7  ;;  %3211 = vperm.xlu0 %5139, %v2777_v23   ;;  %v2749_v3 = vmul.f32 %v2670_v50, %v5830_v45  ;;  %v2680_v49 = vpop.permute.xlu1 %2679 }
 0x2fe   :  { %v980_v18 = vmax.f32 %v901_v6, 0.0  ;;  %v4458_v10 = vpop.f32.mrb[54].mxu0  ;;  %v2506_v46 = vmul.f32 %v7227_v48, %v7227_v48  ;;  %v5952_v33 = vmul.f32 5.67e-08, %v2533_v9  ;;  %v5954_v12 = vmul.f32 5.67e-08, %v2536_v36 }
 0x2ff   :  { %4530 = vmatprep.mubr.f32.mxu1 %v1050_v26  ;;  %v916_v0 = vadd.f32 %v4458_v10, %v5655_v58  ;;  %v910_v54 = vpop.f32.mrb[55].mxu0  ;;  %v1015_v40 = vsel %vm959_vm1, %v981_v62, %v906_v51  ;;  %v2505_v41 = vmul.f32 %v7228_v21, %v7228_v21  ;;  %v2782_v1 = vadd.f32 %v2750_v20, %v5779_v13 }
 0x300   :  { %4531 = vmatmul.mubr.f32.gmra.mrb[50].mxu1 %v1051_v2  ;;  %v911_v28 = vadd.f32 %v5655_v58, %v910_v54  ;;  %v1014_v45 = vsel %vm959_vm1, %v980_v18, %v901_v6  ;;  %v1053_v50 = vmul.f32 %v5705_v22, %v1015_v40  ;;  %v2752_v24 = vmul.f32 %v2676_v31, %v5847_v44  ;;  %v2682_v5 = vpop.permute.xlu0 %2681 }
 0x301   :  { %v983_v53 = vmax.f32 %v916_v0, 0.0  ;;  %v1052_v27 = vmul.f32 %v5705_v22, %v1014_v45  ;;  %3226 = vperm.xlu1 %5140, %v2780_v59   ;;  %v2781_v11 = vadd.f32 %v2749_v3, %v5786_v17  ;;  %3221 = vperm.xlu0 %5139, %v2779_v61   ;;  %v2751_v23 = vmul.f32 %v2674_v63, %v5858_v4  ;;  %v2684_v39 = vpop.permute.xlu1 %2683  ;;  %v7229_v59 = vld [vmem:[#allocation14_spill] sm:$0xff] }
 0x302   :  { %v982_v57 = vmax.f32 %v911_v28, 0.0  ;;  %v4461_v52 = vpop.f32.mrb[56].mxu0  ;;  %v2508_v16 = vmul.f32 %v5809_v8, %v5809_v8  ;;  %v2598_v44 = vmul.f32 0.1, %v5936_v25  ;;  %v5973_v35 = vmul.f32 5.67e-08, %v2535_v37 }
 0x303   :  { %4533 = vmatprep.mubr.f32.mxu1 %v1052_v27  ;;  %v926_v9 = vadd.f32 %v4461_v52, %v5655_v58  ;;  %v920_v51 = vpop.f32.mrb[57].mxu0  ;;  %v1017_v13 = vsel %vm959_vm1, %v983_v53, %v916_v0  ;;  %v2538_v63 = vmul.f32 %v2506_v46, %v2506_v46  ;;  %v2784_v6 = vadd.f32 %v2752_v24, %v5816_v32 }
 0x304   :  { %4534 = vmatmul.mubr.f32.gmra.mrb[52].mxu1 %v1053_v50  ;;  %v921_v17 = vadd.f32 %v5655_v58, %v920_v51  ;;  %v1016_v4 = vsel %vm959_vm1, %v982_v57, %v911_v28  ;;  %v1055_v8 = vmul.f32 %v5705_v22, %v1017_v13  ;;  %v2754_v15 = vmul.f32 %v2680_v49, %v5897_v30  ;;  %v2686_v56 = vpop.permute.xlu0 %2685 }
 0x305   :  { %v985_v31 = vmax.f32 %v926_v9, 0.0  ;;  %v1054_v36 = vmul.f32 %v5705_v22, %v1016_v4  ;;  %3236 = vperm.xlu1 %5140, %v2782_v1   ;;  %v2783_v62 = vadd.f32 %v2751_v23, %v5837_v43  ;;  %3231 = vperm.xlu0 %5139, %v2781_v11   ;;  %v2753_v26 = vmul.f32 %v2678_v38, %v5906_v55  ;;  %v2688_v7 = vpop.permute.xlu1 %2687 }
 0x306   :  { %v984_v2 = vmax.f32 %v921_v17, 0.0  ;;  %v4464_v37 = vpop.f32.mrb[58].mxu0  ;;  %v2507_v20 = vmul.f32 %v7229_v59, %v7229_v59  ;;  %v2597_v30 = vmul.f32 0.1, %v5952_v33  ;;  %v2600_v61 = vmul.f32 0.1, %v5954_v12 }
 0x307   :  { %4536 = vmatprep.mubr.f32.mxu1 %v1054_v36  ;;  %v936_v18 = vadd.f32 %v4464_v37, %v5655_v58  ;;  %v930_v10 = vpop.f32.mrb[59].mxu0  ;;  %v1019_v32 = vsel %vm959_vm1, %v985_v31, %v926_v9  ;;  %v2537_v38 = vmul.f32 %v2505_v41, %v2505_v41  ;;  %v2786_v0 = vadd.f32 %v2754_v15, %v5864_v29 }
 0x308   :  { %4537 = vmatmul.mubr.f32.gmra.mrb[54].mxu1 %v1055_v8  ;;  %v931_v43 = vadd.f32 %v5655_v58, %v930_v10  ;;  %v1018_v55 = vsel %vm959_vm1, %v984_v2, %v921_v17  ;;  %v1057_v3 = vmul.f32 %v5705_v22, %v1019_v32  ;;  %v2756_v54 = vmul.f32 %v2684_v39, %v5917_v14  ;;  %v2690_v50 = vpop.permute.xlu0 %2689 }
 0x309   :  { %v987_v48 = vmax.f32 %v936_v18, 0.0  ;;  %v1056_v46 = vmul.f32 %v5705_v22, %v1018_v55  ;;  %3246 = vperm.xlu1 %5140, %v2784_v6   ;;  %v2785_v28 = vadd.f32 %v2753_v26, %v5871_v42  ;;  %3241 = vperm.xlu0 %5139, %v2783_v62   ;;  %v2755_v45 = vmul.f32 %v2682_v5, %v5926_v60  ;;  %v2692_v29 = vpop.permute.xlu1 %2691 }
 0x30a   :  { %v986_v40 = vmax.f32 %v931_v43, 0.0  ;;  %v4467_v49 = vpop.f32.mrb[60].mxu0  ;;  %v2540_v21 = vmul.f32 %v2508_v16, %v2508_v16  ;;  %v2599_v1 = vmul.f32 0.1, %v5973_v35  ;;  %v2570_v14 = vmul.f32 5.67e-08, %v2538_v63 }
 0x30b   :  { %v946_v53 = vadd.f32 %v4467_v49, %v5655_v58  ;;  %4539 = vmatprep.mubr.f32.mxu1 %v1056_v46  ;;  %v940_v41 = vpop.f32.mrb[61].mxu0  ;;  %v1021_v27 = vsel %vm959_vm1, %v987_v48, %v936_v18  ;;  %v2539_v57 = vmul.f32 %v2507_v20, %v2507_v20  ;;  %v2788_v23 = vadd.f32 %v2756_v54, %v5876_v19 }
 0x30c   :  { %v941_v24 = vadd.f32 %v5655_v58, %v940_v41  ;;  %4540 = vmatmul.mubr.f32.gmra.mrb[56].mxu1 %v1057_v3  ;;  %v1020_v42 = vsel %vm959_vm1, %v986_v40, %v931_v43  ;;  %v1059_v60 = vmul.f32 %v5705_v22, %v1021_v27  ;;  %v2758_v5 = vmul.f32 %v2688_v7, %v2598_v44  ;;  %v2694_v26 = vpop.permute.xlu0 %2693 }
 0x30d   :  { %v989_v52 = vmax.f32 %v946_v53, 0.0  ;;  %v1058_v11 = vmul.f32 %v5705_v22, %v1020_v42  ;;  %3256 = vperm.xlu1 %5140, %v2786_v0   ;;  %v2787_v51 = vadd.f32 %v2755_v45, %v5884_v47  ;;  %3251 = vperm.xlu0 %5139, %v2785_v28   ;;  %v2757_v13 = vmul.f32 %v2686_v56, %v2597_v30  ;;  %v2696_v36 = vpop.permute.xlu1 %2695 }
 0x30e   :  { %v988_v16 = vmax.f32 %v941_v24, 0.0  ;;  %v4470_v9 = vpop.f32.mrb[62].mxu0  ;;  %v2569_v39 = vmul.f32 5.67e-08, %v2537_v38  ;;  %v2602_v63 = vmul.f32 0.1, %v2570_v14  ;;  %v2790_v37 = vadd.f32 %v2758_v5, %v5936_v25 }
 0x30f   :  { %v956_v17 = vadd.f32 %v4470_v9, %v5655_v58  ;;  %v950_v4 = vpop.f32.mrb[63].mxu0  ;;  %4542 = vmatprep.mubr.f32.mxu1 %v1058_v11  ;;  %v1023_v8 = vsel %vm959_vm1, %v989_v52, %v946_v53  ;;  %v2572_v31 = vmul.f32 5.67e-08, %v2540_v21  ;;  %v2571_v6 = vmul.f32 5.67e-08, %v2539_v57 }
 0x310   :  { %v951_v19 = vadd.f32 %v5655_v58, %v950_v4  ;;  %4543 = vmatmul.mubr.f32.gmra.mrb[58].mxu1 %v1059_v60  ;;  %v1022_v44 = vsel %vm959_vm1, %v988_v16, %v941_v24  ;;  %v1061_v47 = vmul.f32 %v5705_v22, %v1023_v8  ;;  %v2760_v62 = vmul.f32 %v2692_v29, %v2600_v61  ;;  %v2698_v38 = vpop.permute.xlu0 %2697 }
 0x311   :  { %v991_v15 = vmax.f32 %v956_v17, 0.0  ;;  %v1060_v2 = vmul.f32 %v5705_v22, %v1022_v44  ;;  %3266 = vperm.xlu1 %5140, %v2788_v23   ;;  %v2789_v59 = vadd.f32 %v2757_v13, %v5952_v33  ;;  %3261 = vperm.xlu0 %5139, %v2787_v51   ;;  %v2759_v58 = vmul.f32 %v2690_v50, %v2599_v1  ;;  %v2700_v55 = vpop.permute.xlu1 %2699  ;;  %v1664_v51 = vld [vmem:[#allocation4 + $0x280] sm:$0xff]  ;;  %v1665_v13 = vld [vmem:[#allocation4 + $0x288] sm:$0xff]  ;;  %v1666_v44 = vld [vmem:[#allocation4 + $0x290] sm:$0xff] }
 0x312   :  { %v990_v56 = vmax.f32 %v951_v19, 0.0  ;;  %v2601_v20 = vmul.f32 0.1, %v2569_v39  ;;  %v2792_v7 = vadd.f32 %v2760_v62, %v5954_v12  ;;  %v2762_v30 = vmul.f32 %v2696_v36, %v2602_v63 }
 0x313   :  { %4545 = vmatprep.mubr.f32.mxu1 %v1060_v2  ;;  %v1025_v18 = vsel %vm959_vm1, %v991_v15, %v956_v17  ;;  %v2604_v33 = vmul.f32 0.1, %v2572_v31  ;;  %v2791_v61 = vadd.f32 %v2759_v58, %v5973_v35  ;;  %v2603_v3 = vmul.f32 0.1, %v2571_v6  ;;  %v6032_v35 = vld [vmem:[%s7185_s3 + $0x3] ss:$0 sm:$0xff] }
 0x314   :  { %4546 = vmatmul.mubr.f32.gmra.mrb[60].mxu1 %v1061_v47  ;;  %v1024_v10 = vsel %vm959_vm1, %v990_v56, %v951_v19  ;;  %v1063_v32 = vmul.f32 %v5705_v22, %v1025_v18  ;;  %v2761_v43 = vmul.f32 %v2694_v26, %v2601_v20  ;;  %v2794_v48 = vadd.f32 %v2762_v30, %v2570_v14  ;;  %v1667_v47 = vld [vmem:[#allocation4 + $0x298] sm:$0xff]  ;;  %v1668_v56 = vld [vmem:[#allocation4 + $0x2a0] sm:$0xff]  ;;  %v1670_v30 = vld [vmem:[#allocation4 + $0x2b0] sm:$0xff] }
 0x315   :  { %v1062_v25 = vmul.f32 %v5705_v22, %v1024_v10  ;;  %3276 = vperm.xlu1 %5140, %v2790_v37   ;;  %3271 = vperm.xlu0 %5139, %v2789_v59   ;;  %v2764_v46 = vmul.f32 %v2700_v55, %v2604_v33  ;;  %v2763_v22 = vmul.f32 %v2698_v38, %v2603_v3  ;;  %v1669_v59 = vld [vmem:[#allocation4 + $0x2a8] sm:$0xff]  ;;  %v1671_v33 = vld [vmem:[#allocation4 + $0x2b8] sm:$0xff] }
 0x316   :  { %v2793_v0 = vadd.f32 %v2761_v43, %v2569_v39  ;;  %v5031_v17 = vpack.c.bf16 %v1665_v13, %v1664_v51  ;;  %v5039_v20 = vpack.c.bf16 %v1669_v59, %v1668_v56  ;;  %v5043_v43 = vpack.c.bf16 %v1671_v33, %v1670_v30 }
 0x317   :  { %4548 = vmatprep.mubr.f32.mxu1 %v1062_v25  ;;  %v2796_v54 = vadd.f32 %v2764_v46, %v2572_v31  ;;  %v2795_v12 = vadd.f32 %v2763_v22, %v2571_v6  ;;  %v5035_v6 = vpack.c.bf16 %v1667_v47, %v1666_v44  ;;  %v1673_v22 = vld [vmem:[#allocation4 + $0x2c8] sm:$0xff] }
 0x318   :  { %4549 = vmatmul.mubr.f32.gmra.mrb[62].mxu1 %v1063_v32  ;;  %5032 = vmatprep.subr.bf16.mxu1 %v5031_v17 }
 0x319   :  { %3286 = vperm.xlu1 %5140, %v2792_v7   ;;  %3281 = vperm.xlu0 %5139, %v2791_v61  }
 0x31a   :  { %5034 = vmatpush3.bf16.msra.mxu1 %v5031_v17 }
 0x31b   :  { %5036 = vmatprep.subr.bf16.mxu1 %v5035_v6 }
 0x31d   :  { %3296 = vperm.xlu1 %5140, %v2794_v48   ;;  %3291 = vperm.xlu0 %5139, %v2793_v0   ;;  %v1672_v0 = vld [vmem:[#allocation4 + $0x2c0] sm:$0xff] }
 0x31e   :  { %5038 = vmatpush3.bf16.msra.mxu1 %v5035_v6 }
 0x31f   :  { %5040 = vmatprep.subr.bf16.mxu1 %v5039_v20 }
 0x321   :  { %3306 = vperm.xlu1 %5140, %v2796_v54   ;;  %3301 = vperm.xlu0 %5139, %v2795_v12   ;;  %v5047_v12 = vpack.c.bf16 %v1673_v22, %v1672_v0  ;;  %v1946_v0 = vld [vmem:[#allocation4 + $0x300] sm:$0xff]  ;;  %v1947_v22 = vld [vmem:[#allocation4 + $0x308] sm:$0xff] }
 0x322   :  { %5042 = vmatpush3.bf16.msra.mxu1 %v5039_v20 }
 0x323   :  { %5044 = vmatprep.subr.bf16.mxu1 %v5043_v43 }
 0x326   :  { %5046 = vmatpush3.bf16.msra.mxu1 %v5043_v43 }
 0x327   :  { %5048 = vmatprep.subr.bf16.mxu1 %v5047_v12 }
 0x32a   :  { %5050 = vmatpush3.bf16.msra.mxu1 %v5047_v12  ;;  %v5063_v12 = vpack.c.bf16 %v1947_v22, %v1946_v0 }
 0x32c   :  { %5064 = vmatprep.subr.bf16.mxu0 %v5063_v12 }
 0x3af   :  { %v4505_v40 = vpop.f32.mrb[32].mxu1 }
 0x3b0   :  { %v1161_v49 = vadd.f32 %v4505_v40, %v6032_v35  ;;  %v1155_v28 = vpop.f32.mrb[33].mxu1 }
 0x3b1   :  { %v1156_v45 = vadd.f32 %v6032_v35, %v1155_v28 }
 0x3b2   :  { %3375 = vrot.lane.b32.xlu1 %v1161_v49, %s5228_s23  ;;  %v1315_v53 = vmax.f32 %v1161_v49, 0.0 }
 0x3b3   :  { %v1314_v50 = vmax.f32 %v1156_v45, 0.0  ;;  %v4508_v21 = vpop.f32.mrb[34].mxu1  ;;  %3373 = vrot.lane.b32.xlu0 %v1156_v45, %s5228_s23 }
 0x3b4   :  { %v1171_v41 = vadd.f32 %v4508_v21, %v6032_v35  ;;  %v1165_v27 = vpop.f32.mrb[35].mxu1  ;;  %v1674_v21 = vld [vmem:[#allocation4 + $0x2d0] sm:$0xff] }
 0x3b5   :  { %v1166_v29 = vadd.f32 %v6032_v35, %v1165_v27  ;;  %4583 = vmatprep.mubr.f32.mxu0 %v1314_v50 }
 0x3b6   :  { %3379 = vrot.lane.b32.xlu1 %v1171_v41, %s5228_s23  ;;  %4584 = vmatmul.mubr.f32.vlgmr.msra.gmra.mrb[64].mxu0 %v1315_v53  ;;  %v1317_v24 = vmax.f32 %v1171_v41, 0.0  ;;  %v1675_v53 = vld [vmem:[#allocation4 + $0x2d8] sm:$0xff] }
 0x3b7   :  { %v1316_v1 = vmax.f32 %v1166_v29, 0.0  ;;  %v4511_v14 = vpop.f32.mrb[36].mxu1  ;;  %3377 = vrot.lane.b32.xlu0 %v1166_v29, %s5228_s23  ;;  %v5051_v27 = vpack.c.bf16 %v1675_v53, %v1674_v21  ;;  %5066 = vmatpush3.bf16.msra.mxu0 %v5063_v12  ;;  %v1953_v21 = vld [vmem:[#allocation4 + $0x338] sm:$0xff] }
 0x3b8   :  { %v1181_v42 = vadd.f32 %v4511_v14, %v6032_v35  ;;  %v1175_v60 = vpop.f32.mrb[37].mxu1 }
 0x3b9   :  { %v1176_v57 = vadd.f32 %v6032_v35, %v1175_v60  ;;  %4586 = vmatprep.mubr.f32.mxu0 %v1316_v1  ;;  %5052 = vmatprep.subr.bf16.mxu1 %v5051_v27  ;;  %v1676_v60 = vld [vmem:[#allocation4 + $0x2e0] sm:$0xff] }
 0x3ba   :  { %v1319_v52 = vmax.f32 %v1181_v42, 0.0  ;;  %4587 = vmatmul.mubr.f32.gmra.mrb[66].mxu0 %v1317_v24  ;;  %3383 = vrot.lane.b32.xlu1 %v1181_v42, %s5228_s23 }
 0x3bb   :  { %v1318_v11 = vmax.f32 %v1176_v57, 0.0  ;;  %v4514_v23 = vpop.f32.mrb[38].mxu1  ;;  %3381 = vrot.lane.b32.xlu0 %v1176_v57, %s5228_s23  ;;  %5054 = vmatpush3.bf16.msra.mxu1 %v5051_v27  ;;  %v1677_v57 = vld [vmem:[#allocation4 + $0x2e8] sm:$0xff] }
 0x3bc   :  { %v1191_v5 = vadd.f32 %v4514_v23, %v6032_v35  ;;  %v1185_v16 = vpop.f32.mrb[39].mxu1  ;;  %v1955_v27 = vld [vmem:[#allocation4 + $0x348] sm:$0xff] }
 0x3bd   :  { %v1186_v9 = vadd.f32 %v6032_v35, %v1185_v16  ;;  %4589 = vmatprep.mubr.f32.mxu0 %v1318_v11  ;;  %v5055_v11 = vpack.c.bf16 %v1677_v57, %v1676_v60  ;;  %v1959_v60 = vld [vmem:[#allocation4 + $0x368] sm:$0xff] }
 0x3be   :  { %v1321_v39 = vmax.f32 %v1191_v5, 0.0  ;;  %4590 = vmatmul.mubr.f32.gmra.mrb[68].mxu0 %v1319_v52  ;;  %3387 = vrot.lane.b32.xlu1 %v1191_v5, %s5228_s23 }
 0x3bf   :  { %v1320_v4 = vmax.f32 %v1186_v9, 0.0  ;;  %v4517_v8 = vpop.f32.mrb[40].mxu1  ;;  %3385 = vrot.lane.b32.xlu0 %v1186_v9, %s5228_s23  ;;  %5056 = vmatprep.subr.bf16.mxu1 %v5055_v11 }
 0x3c0   :  { %v1201_v63 = vadd.f32 %v4517_v8, %v6032_v35  ;;  %v1195_v31 = vpop.f32.mrb[41].mxu1  ;;  %5058 = vmatpush3.bf16.msra.mxu1 %v5055_v11  ;;  %v1961_v11 = vld [vmem:[#allocation4 + $0x378] sm:$0xff] }
 0x3c1   :  { %v1196_v19 = vadd.f32 %v6032_v35, %v1195_v31  ;;  %4592 = vmatprep.mubr.f32.mxu0 %v1320_v4  ;;  %v1678_v31 = vld [vmem:[#allocation4 + $0x2f0] sm:$0xff] }
 0x3c2   :  { %v1323_v36 = vmax.f32 %v1201_v63, 0.0  ;;  %4593 = vmatmul.mubr.f32.gmra.mrb[70].mxu0 %v1321_v39  ;;  %3391 = vrot.lane.b32.xlu1 %v1201_v63, %s5228_s23 }
 0x3c3   :  { %v1322_v15 = vmax.f32 %v1196_v19, 0.0  ;;  %v4520_v2 = vpop.f32.mrb[42].mxu1  ;;  %3389 = vrot.lane.b32.xlu0 %v1196_v19, %s5228_s23  ;;  %v1679_v19 = vld [vmem:[#allocation4 + $0x2f8] sm:$0xff] }
 0x3c4   :  { %v1211_v37 = vadd.f32 %v4520_v2, %v6032_v35  ;;  %v1205_v62 = vpop.f32.mrb[43].mxu1  ;;  %v5059_v47 = vpack.c.bf16 %v1679_v19, %v1678_v31 }
 0x3c5   :  { %4595 = vmatprep.mubr.f32.mxu0 %v1322_v15  ;;  %v1206_v26 = vadd.f32 %v6032_v35, %v1205_v62 }
 0x3c6   :  { %v1325_v58 = vmax.f32 %v1211_v37, 0.0  ;;  %4596 = vmatmul.mubr.f32.gmra.mrb[72].mxu0 %v1323_v36  ;;  %3395 = vrot.lane.b32.xlu1 %v1211_v37, %s5228_s23 }
 0x3c7   :  { %v1324_v18 = vmax.f32 %v1206_v26, 0.0  ;;  %v4523_v10 = vpop.f32.mrb[44].mxu1  ;;  %3393 = vrot.lane.b32.xlu0 %v1206_v26, %s5228_s23  ;;  %5060 = vmatprep.subr.bf16.mxu1 %v5059_v47 }
 0x3c8   :  { %v1221_v32 = vadd.f32 %v4523_v10, %v6032_v35  ;;  %v1215_v25 = vpop.f32.mrb[45].mxu1  ;;  %5062 = vmatpush3.bf16.msra.mxu1 %v5059_v47 }
 0x3c9   :  { %4598 = vmatprep.mubr.f32.mxu0 %v1324_v18  ;;  %v1216_v7 = vadd.f32 %v6032_v35, %v1215_v25 }
 0x3ca   :  { %4599 = vmatmul.mubr.f32.gmra.mrb[74].mxu0 %v1325_v58  ;;  %v1327_v61 = vmax.f32 %v1221_v32, 0.0  ;;  %3399 = vrot.lane.b32.xlu1 %v1221_v32, %s5228_s23 }
 0x3cb   :  { %v1326_v55 = vmax.f32 %v1216_v7, 0.0  ;;  %v4526_v3 = vpop.f32.mrb[46].mxu1  ;;  %3397 = vrot.lane.b32.xlu0 %v1216_v7, %s5228_s23 }
 0x3cc   :  { %v1231_v38 = vadd.f32 %v4526_v3, %v6032_v35  ;;  %v1225_v48 = vpop.f32.mrb[47].mxu1 }
 0x3cd   :  { %4601 = vmatprep.mubr.f32.mxu0 %v1326_v55  ;;  %v1226_v46 = vadd.f32 %v6032_v35, %v1225_v48 }
 0x3ce   :  { %4602 = vmatmul.mubr.f32.gmra.mrb[76].mxu0 %v1327_v61  ;;  %v1329_v54 = vmax.f32 %v1231_v38, 0.0  ;;  %3403 = vrot.lane.b32.xlu1 %v1231_v38, %s5228_s23 }
 0x3cf   :  { %v1328_v40 = vmax.f32 %v1226_v46, 0.0  ;;  %v4529_v49 = vpop.f32.mrb[48].mxu1  ;;  %3401 = vrot.lane.b32.xlu0 %v1226_v46, %s5228_s23 }
 0x3d0   :  { %v1241_v28 = vadd.f32 %v4529_v49, %v6032_v35  ;;  %v1235_v45 = vpop.f32.mrb[49].mxu1 }
 0x3d1   :  { %4604 = vmatprep.mubr.f32.mxu0 %v1328_v40  ;;  %v1236_v50 = vadd.f32 %v6032_v35, %v1235_v45  ;;  %v1949_v40 = vld [vmem:[#allocation4 + $0x318] sm:$0xff]  ;;  %v1951_v45 = vld [vmem:[#allocation4 + $0x328] sm:$0xff] }
 0x3d2   :  { %4605 = vmatmul.mubr.f32.gmra.mrb[78].mxu0 %v1329_v54  ;;  %v1331_v41 = vmax.f32 %v1241_v28, 0.0  ;;  %3407 = vrot.lane.b32.xlu1 %v1241_v28, %s5228_s23  ;;  %v1948_v54 = vld [vmem:[#allocation4 + $0x310] sm:$0xff]  ;;  %v1950_v28 = vld [vmem:[#allocation4 + $0x320] sm:$0xff] }
 0x3d3   :  { %v1330_v29 = vmax.f32 %v1236_v50, 0.0  ;;  %v4532_v1 = vpop.f32.mrb[50].mxu1  ;;  %3405 = vrot.lane.b32.xlu0 %v1236_v50, %s5228_s23  ;;  %v5067_v49 = vpack.c.bf16 %v1949_v40, %v1948_v54  ;;  %v1952_v50 = vld [vmem:[#allocation4 + $0x330] sm:$0xff] }
 0x3d4   :  { %v1251_v14 = vadd.f32 %v4532_v1, %v6032_v35  ;;  %v1245_v24 = vpop.f32.mrb[51].mxu1  ;;  %v5075_v53 = vpack.c.bf16 %v1953_v21, %v1952_v50  ;;  %v1956_v1 = vld [vmem:[#allocation4 + $0x350] sm:$0xff] }
 0x3d5   :  { %4607 = vmatprep.mubr.f32.mxu0 %v1330_v29  ;;  %v1246_v42 = vadd.f32 %v6032_v35, %v1245_v24  ;;  %5068 = vmatprep.subr.bf16.mxu0 %v5067_v49 }
 0x3d6   :  { %4608 = vmatmul.mubr.f32.gmra.mrb[80].mxu0 %v1331_v41  ;;  %v1333_v52 = vmax.f32 %v1251_v14, 0.0  ;;  %3411 = vrot.lane.b32.xlu1 %v1251_v14, %s5228_s23  ;;  %v1954_v41 = vld [vmem:[#allocation4 + $0x340] sm:$0xff]  ;;  %v1957_v14 = vld [vmem:[#allocation4 + $0x358] sm:$0xff] }
 0x3d7   :  { %v1332_v23 = vmax.f32 %v1246_v42, 0.0  ;;  %v4535_v5 = vpop.f32.mrb[52].mxu1  ;;  %3409 = vrot.lane.b32.xlu0 %v1246_v42, %s5228_s23  ;;  %5070 = vmatpush3.bf16.msra.mxu0 %v5067_v49  ;;  %v5079_v29 = vpack.c.bf16 %v1955_v27, %v1954_v41  ;;  %v5083_v24 = vpack.c.bf16 %v1957_v14, %v1956_v1  ;;  %v1958_v42 = vld [vmem:[#allocation4 + $0x360] sm:$0xff] }
 0x3d8   :  { %v1261_v16 = vadd.f32 %v4535_v5, %v6032_v35  ;;  %v1255_v9 = vpop.f32.mrb[53].mxu1  ;;  %v5087_v57 = vpack.c.bf16 %v1959_v60, %v1958_v42  ;;  %v6101_v5 = vld [vmem:[%s7185_s3 + $0x4] ss:$0 sm:$0xff] }
 0x3d9   :  { %4610 = vmatprep.mubr.f32.mxu0 %v1332_v23  ;;  %v1256_v51 = vadd.f32 %v6032_v35, %v1255_v9 }
 0x3da   :  { %4611 = vmatmul.mubr.f32.gmra.mrb[82].mxu0 %v1333_v52  ;;  %v1335_v13 = vmax.f32 %v1261_v16, 0.0  ;;  %3415 = vrot.lane.b32.xlu1 %v1261_v16, %s5228_s23  ;;  %v1960_v52 = vld [vmem:[#allocation4 + $0x370] sm:$0xff] }
 0x3db   :  { %v1334_v39 = vmax.f32 %v1256_v51, 0.0  ;;  %v4538_v17 = vpop.f32.mrb[54].mxu1  ;;  %3413 = vrot.lane.b32.xlu0 %v1256_v51, %s5228_s23  ;;  %v5091_v23 = vpack.c.bf16 %v1961_v11, %v1960_v52 }
 0x3dc   :  { %v1271_v4 = vadd.f32 %v4538_v17, %v6032_v35  ;;  %v1265_v8 = vpop.f32.mrb[55].mxu1 }
 0x3dd   :  { %4613 = vmatprep.mubr.f32.mxu0 %v1334_v39  ;;  %v1266_v63 = vadd.f32 %v6032_v35, %v1265_v8 }
 0x3de   :  { %4614 = vmatmul.mubr.f32.gmra.mrb[84].mxu0 %v1335_v13  ;;  %v1337_v44 = vmax.f32 %v1271_v4, 0.0  ;;  %3419 = vrot.lane.b32.xlu1 %v1271_v4, %s5228_s23 }
 0x3df   :  { %v1336_v36 = vmax.f32 %v1266_v63, 0.0  ;;  %v4541_v6 = vpop.f32.mrb[56].mxu1  ;;  %3417 = vrot.lane.b32.xlu0 %v1266_v63, %s5228_s23 }
 0x3e0   :  { %v1281_v15 = vadd.f32 %v4541_v6, %v6032_v35  ;;  %v1275_v2 = vpop.f32.mrb[57].mxu1 }
 0x3e1   :  { %4616 = vmatprep.mubr.f32.mxu0 %v1336_v36  ;;  %v1276_v37 = vadd.f32 %v6032_v35, %v1275_v2 }
 0x3e2   :  { %4617 = vmatmul.mubr.f32.gmra.mrb[86].mxu0 %v1337_v44  ;;  %v1339_v62 = vmax.f32 %v1281_v15, 0.0  ;;  %3423 = vrot.lane.b32.xlu1 %v1281_v15, %s5228_s23 }
 0x3e3   :  { %v1338_v26 = vmax.f32 %v1276_v37, 0.0  ;;  %v4544_v56 = vpop.f32.mrb[58].mxu1  ;;  %3421 = vrot.lane.b32.xlu0 %v1276_v37, %s5228_s23 }
 0x3e4   :  { %v1291_v59 = vadd.f32 %v4544_v56, %v6032_v35  ;;  %v1285_v58 = vpop.f32.mrb[59].mxu1 }
 0x3e5   :  { %v1286_v20 = vadd.f32 %v6032_v35, %v1285_v58  ;;  %4619 = vmatprep.mubr.f32.mxu0 %v1338_v26 }
 0x3e6   :  { %v1341_v18 = vmax.f32 %v1291_v59, 0.0  ;;  %4620 = vmatmul.mubr.f32.gmra.mrb[88].mxu0 %v1339_v62  ;;  %3427 = vrot.lane.b32.xlu1 %v1291_v59, %s5228_s23 }
 0x3e7   :  { %v1340_v10 = vmax.f32 %v1286_v20, 0.0  ;;  %v4547_v32 = vpop.f32.mrb[60].mxu1  ;;  %3425 = vrot.lane.b32.xlu0 %v1286_v20, %s5228_s23 }
 0x3e8   :  { %v1301_v25 = vadd.f32 %v4547_v32, %v6032_v35  ;;  %v1295_v7 = vpop.f32.mrb[61].mxu1 }
 0x3e9   :  { %v1296_v30 = vadd.f32 %v6032_v35, %v1295_v7  ;;  %4622 = vmatprep.mubr.f32.mxu0 %v1340_v10 }
 0x3ea   :  { %v1343_v33 = vmax.f32 %v1301_v25, 0.0  ;;  %4623 = vmatmul.mubr.f32.gmra.mrb[90].mxu0 %v1341_v18  ;;  %3431 = vrot.lane.b32.xlu1 %v1301_v25, %s5228_s23 }
 0x3eb   :  { %v1342_v61 = vmax.f32 %v1296_v30, 0.0  ;;  %v4550_v43 = vpop.f32.mrb[62].mxu1  ;;  %3429 = vrot.lane.b32.xlu0 %v1296_v30, %s5228_s23 }
 0x3ec   :  { %v1311_v55 = vadd.f32 %v4550_v43, %v6032_v35  ;;  %v1305_v3 = vpop.f32.mrb[63].mxu1 }
 0x3ed   :  { %v1306_v38 = vadd.f32 %v6032_v35, %v1305_v3  ;;  %4625 = vmatprep.mubr.f32.mxu0 %v1342_v61  ;;  %v5071_v35 = vpack.c.bf16 %v1951_v45, %v1950_v28 }
 0x3ee   :  { %v1345_v48 = vmax.f32 %v1311_v55, 0.0  ;;  %4626 = vmatmul.mubr.f32.gmra.mrb[92].mxu0 %v1343_v33  ;;  %3435 = vrot.lane.b32.xlu1 %v1311_v55, %s5228_s23 }
 0x3ef   :  { %v1344_v46 = vmax.f32 %v1306_v38, 0.0  ;;  %3433 = vrot.lane.b32.xlu0 %v1306_v38, %s5228_s23  ;;  %5072 = vmatprep.subr.bf16.mxu0 %v5071_v35 }
 0x3f0   :  { %5074 = vmatpush3.bf16.msra.mxu0 %v5071_v35 }
 0x3f1   :  { %4628 = vmatprep.mubr.f32.mxu0 %v1344_v46  ;;  %5076 = vmatprep.subr.bf16.mxu0 %v5075_v53 }
 0x3f2   :  { %4629 = vmatmul.mubr.f32.gmra.mrb[94].mxu0 %v1345_v48 }
 0x3f4   :  { %5078 = vmatpush3.bf16.msra.mxu0 %v5075_v53 }
 0x3f5   :  { %5080 = vmatprep.subr.bf16.mxu0 %v5079_v29 }
 0x3f8   :  { %5082 = vmatpush3.bf16.msra.mxu0 %v5079_v29 }
 0x3f9   :  { %5084 = vmatprep.subr.bf16.mxu0 %v5083_v24 }
 0x3fc   :  { %5086 = vmatpush3.bf16.msra.mxu0 %v5083_v24 }
 0x3fd   :  { %5088 = vmatprep.subr.bf16.mxu0 %v5087_v57 }
 0x400   :  { %5090 = vmatpush3.bf16.msra.mxu0 %v5087_v57 }
 0x401   :  { %5092 = vmatprep.subr.bf16.mxu0 %v5091_v23 }
 0x404   :  { %5094 = vmatpush3.bf16.msra.mxu0 %v5091_v23 }
 0x489   :  { %v4585_v16 = vpop.f32.mrb[64].mxu0 }
 0x48a   :  { %v1443_v9 = vadd.f32 %v4585_v16, %v6101_v5  ;;  %v1437_v51 = vpop.f32.mrb[65].mxu0 }
 0x48b   :  { %v1438_v13 = vadd.f32 %v6101_v5, %v1437_v51 }
 0x48c   :  { %v1598_v39 = vmax.f32 %v1443_v9, 0.0 }
 0x48d   :  { %v1597_v17 = vmax.f32 %v1438_v13, 0.0  ;;  %v4588_v4 = vpop.f32.mrb[66].mxu0 }
 0x48e   :  { %v1453_v8 = vadd.f32 %v4588_v4, %v6101_v5  ;;  %v1447_v63 = vpop.f32.mrb[67].mxu0  ;;  %v1632_v44 = vsel %vm1596_vm2, %v1598_v39, %v1443_v9 }
 0x48f   :  { %v1448_v31 = vadd.f32 %v6101_v5, %v1447_v63  ;;  %v1631_v19 = vsel %vm1596_vm2, %v1597_v17, %v1438_v13 }
 0x490   :  { %v1600_v47 = vmax.f32 %v1453_v8, 0.0  ;;  %4663 = vmatprep.mubr.f32.mxu1 %v1631_v19 }
 0x491   :  { %v1599_v36 = vmax.f32 %v1448_v31, 0.0  ;;  %v4591_v6 = vpop.f32.mrb[68].mxu0  ;;  %4664 = vmatmul.mubr.f32.vlgmr.msra.gmra.mrb[64].mxu1 %v1632_v44 }
 0x492   :  { %v1463_v15 = vadd.f32 %v4591_v6, %v6101_v5  ;;  %v1457_v2 = vpop.f32.mrb[69].mxu0  ;;  %v1634_v56 = vsel %vm1596_vm2, %v1600_v47, %v1453_v8 }
 0x493   :  { %v1458_v37 = vadd.f32 %v6101_v5, %v1457_v2  ;;  %v1633_v62 = vsel %vm1596_vm2, %v1599_v36, %v1448_v31 }
 0x494   :  { %v1602_v26 = vmax.f32 %v1463_v15, 0.0  ;;  %4666 = vmatprep.mubr.f32.mxu1 %v1633_v62 }
 0x495   :  { %v1601_v59 = vmax.f32 %v1458_v37, 0.0  ;;  %v4594_v58 = vpop.f32.mrb[70].mxu0  ;;  %4667 = vmatmul.mubr.f32.gmra.mrb[66].mxu1 %v1634_v56 }
 0x496   :  { %v1473_v20 = vadd.f32 %v4594_v58, %v6101_v5  ;;  %v1467_v18 = vpop.f32.mrb[71].mxu0  ;;  %v1636_v7 = vsel %vm1596_vm2, %v1602_v26, %v1463_v15 }
 0x497   :  { %v1468_v10 = vadd.f32 %v6101_v5, %v1467_v18  ;;  %v1635_v32 = vsel %vm1596_vm2, %v1601_v59, %v1458_v37 }
 0x498   :  { %v1604_v25 = vmax.f32 %v1473_v20, 0.0  ;;  %4669 = vmatprep.mubr.f32.mxu1 %v1635_v32 }
 0x499   :  { %v1603_v30 = vmax.f32 %v1468_v10, 0.0  ;;  %v4597_v33 = vpop.f32.mrb[72].mxu0  ;;  %4670 = vmatmul.mubr.f32.gmra.mrb[68].mxu1 %v1636_v7 }
 0x49a   :  { %v1483_v61 = vadd.f32 %v4597_v33, %v6101_v5  ;;  %v1477_v43 = vpop.f32.mrb[73].mxu0  ;;  %v1638_v55 = vsel %vm1596_vm2, %v1604_v25, %v1473_v20 }
 0x49b   :  { %v1478_v3 = vadd.f32 %v6101_v5, %v1477_v43  ;;  %v1637_v38 = vsel %vm1596_vm2, %v1603_v30, %v1468_v10 }
 0x49c   :  { %v1606_v48 = vmax.f32 %v1483_v61, 0.0  ;;  %4672 = vmatprep.mubr.f32.mxu1 %v1637_v38 }
 0x49d   :  { %v1605_v46 = vmax.f32 %v1478_v3, 0.0  ;;  %4673 = vmatmul.mubr.f32.gmra.mrb[70].mxu1 %v1638_v55  ;;  %v4600_v0 = vpop.f32.mrb[74].mxu0 }
 0x49e   :  { %v1493_v22 = vadd.f32 %v4600_v0, %v6101_v5  ;;  %v1487_v54 = vpop.f32.mrb[75].mxu0  ;;  %v1640_v12 = vsel %vm1596_vm2, %v1606_v48, %v1483_v61 }
 0x49f   :  { %v1488_v40 = vadd.f32 %v6101_v5, %v1487_v54  ;;  %v1639_v49 = vsel %vm1596_vm2, %v1605_v46, %v1478_v3 }
 0x4a0   :  { %v1608_v28 = vmax.f32 %v1493_v22, 0.0  ;;  %4675 = vmatprep.mubr.f32.mxu1 %v1639_v49 }
 0x4a1   :  { %v1607_v45 = vmax.f32 %v1488_v40, 0.0  ;;  %4676 = vmatmul.mubr.f32.gmra.mrb[72].mxu1 %v1640_v12  ;;  %v4603_v35 = vpop.f32.mrb[76].mxu0 }
 0x4a2   :  { %v1503_v50 = vadd.f32 %v4603_v35, %v6101_v5  ;;  %v1642_v21 = vsel %vm1596_vm2, %v1608_v28, %v1493_v22  ;;  %v1497_v53 = vpop.f32.mrb[77].mxu0 }
 0x4a3   :  { %v1641_v41 = vsel %vm1596_vm2, %v1607_v45, %v1488_v40  ;;  %v1498_v27 = vadd.f32 %v6101_v5, %v1497_v53 }
 0x4a4   :  { %4678 = vmatprep.mubr.f32.mxu1 %v1641_v41  ;;  %v1610_v29 = vmax.f32 %v1503_v50, 0.0 }
 0x4a5   :  { %4679 = vmatmul.mubr.f32.gmra.mrb[74].mxu1 %v1642_v21  ;;  %v1609_v1 = vmax.f32 %v1498_v27, 0.0  ;;  %v4606_v14 = vpop.f32.mrb[78].mxu0 }
 0x4a6   :  { %v1513_v24 = vadd.f32 %v4606_v14, %v6101_v5  ;;  %v1644_v42 = vsel %vm1596_vm2, %v1610_v29, %v1503_v50  ;;  %v1507_v60 = vpop.f32.mrb[79].mxu0 }
 0x4a7   :  { %v1643_v57 = vsel %vm1596_vm2, %v1609_v1, %v1498_v27  ;;  %v1508_v52 = vadd.f32 %v6101_v5, %v1507_v60 }
 0x4a8   :  { %4681 = vmatprep.mubr.f32.mxu1 %v1643_v57  ;;  %v1612_v11 = vmax.f32 %v1513_v24, 0.0 }
 0x4a9   :  { %4682 = vmatmul.mubr.f32.gmra.mrb[76].mxu1 %v1644_v42  ;;  %v1611_v23 = vmax.f32 %v1508_v52, 0.0  ;;  %v4609_v16 = vpop.f32.mrb[80].mxu0 }
 0x4aa   :  { %v1523_v9 = vadd.f32 %v4609_v16, %v6101_v5  ;;  %v1646_v51 = vsel %vm1596_vm2, %v1612_v11, %v1513_v24  ;;  %v1517_v13 = vpop.f32.mrb[81].mxu0 }
 0x4ab   :  { %v1645_v39 = vsel %vm1596_vm2, %v1611_v23, %v1508_v52  ;;  %v1518_v17 = vadd.f32 %v6101_v5, %v1517_v13 }
 0x4ac   :  { %4684 = vmatprep.mubr.f32.mxu1 %v1645_v39  ;;  %v1614_v4 = vmax.f32 %v1523_v9, 0.0  ;;  %v6200_v39 = vpop.permute.xlu1 %2802 }
 0x4ad   :  { %4685 = vmatmul.mubr.f32.gmra.mrb[78].mxu1 %v1646_v51  ;;  %v1613_v8 = vmax.f32 %v1518_v17, 0.0  ;;  %v4612_v63 = vpop.f32.mrb[82].mxu0 }
 0x4ae   :  { %v1533_v31 = vadd.f32 %v4612_v63, %v6101_v5  ;;  %v1648_v19 = vsel %vm1596_vm2, %v1614_v4, %v1523_v9  ;;  %v1527_v44 = vpop.f32.mrb[83].mxu0 }
 0x4af   :  { %v1647_v47 = vsel %vm1596_vm2, %v1613_v8, %v1518_v17  ;;  %v1528_v36 = vadd.f32 %v6101_v5, %v1527_v44  ;;  %v6202_v17 = vpop.permute.xlu0 %2798 }
 0x4b0   :  { %4687 = vmatprep.mubr.f32.mxu1 %v1647_v47  ;;  %v1616_v6 = vmax.f32 %v1533_v31, 0.0 }
 0x4b1   :  { %4688 = vmatmul.mubr.f32.gmra.mrb[80].mxu1 %v1648_v19  ;;  %v1615_v15 = vmax.f32 %v1528_v36, 0.0  ;;  %v4615_v2 = vpop.f32.mrb[84].mxu0 }
 0x4b2   :  { %v1543_v37 = vadd.f32 %v4615_v2, %v6101_v5  ;;  %v1650_v62 = vsel %vm1596_vm2, %v1616_v6, %v1533_v31  ;;  %v1537_v26 = vpop.f32.mrb[85].mxu0 }
 0x4b3   :  { %v1649_v56 = vsel %vm1596_vm2, %v1615_v15, %v1528_v36  ;;  %v1538_v59 = vadd.f32 %v6101_v5, %v1537_v26  ;;  %v6206_v4 = vpop.permute.xlu0 %2810 }
 0x4b4   :  { %4690 = vmatprep.mubr.f32.mxu1 %v1649_v56  ;;  %v1618_v58 = vmax.f32 %v1543_v37, 0.0 }
 0x4b5   :  { %4691 = vmatmul.mubr.f32.gmra.mrb[82].mxu1 %v1650_v62  ;;  %v1617_v20 = vmax.f32 %v1538_v59, 0.0  ;;  %v4618_v18 = vpop.f32.mrb[86].mxu0 }
 0x4b6   :  { %v1553_v10 = vadd.f32 %v4618_v18, %v6101_v5  ;;  %v1652_v32 = vsel %vm1596_vm2, %v1618_v58, %v1543_v37  ;;  %v1547_v25 = vpop.f32.mrb[87].mxu0 }
 0x4b7   :  { %v1651_v7 = vsel %vm1596_vm2, %v1617_v20, %v1538_v59  ;;  %v1548_v30 = vadd.f32 %v6101_v5, %v1547_v25  ;;  %v6210_v63 = vpop.permute.xlu0 %2818 }
 0x4b8   :  { %4693 = vmatprep.mubr.f32.mxu1 %v1651_v7  ;;  %v1620_v33 = vmax.f32 %v1553_v10, 0.0 }
 0x4b9   :  { %4694 = vmatmul.mubr.f32.gmra.mrb[84].mxu1 %v1652_v32  ;;  %v1619_v61 = vmax.f32 %v1548_v30, 0.0  ;;  %v4621_v43 = vpop.f32.mrb[88].mxu0 }
 0x4ba   :  { %v1563_v55 = vadd.f32 %v4621_v43, %v6101_v5  ;;  %v1654_v3 = vsel %vm1596_vm2, %v1620_v33, %v1553_v10  ;;  %v1557_v38 = vpop.f32.mrb[89].mxu0 }
 0x4bb   :  { %v1653_v48 = vsel %vm1596_vm2, %v1619_v61, %v1548_v30  ;;  %v1558_v46 = vadd.f32 %v6101_v5, %v1557_v38  ;;  %v6214_v19 = vpop.permute.xlu0 %2826 }
 0x4bc   :  { %4696 = vmatprep.mubr.f32.mxu1 %v1653_v48  ;;  %v1622_v0 = vmax.f32 %v1563_v55, 0.0 }
 0x4bd   :  { %4697 = vmatmul.mubr.f32.gmra.mrb[86].mxu1 %v1654_v3  ;;  %v1621_v22 = vmax.f32 %v1558_v46, 0.0  ;;  %v4624_v54 = vpop.f32.mrb[90].mxu0 }
 0x4be   :  { %v1573_v12 = vadd.f32 %v4624_v54, %v6101_v5  ;;  %v1567_v40 = vpop.f32.mrb[91].mxu0  ;;  %v1656_v49 = vsel %vm1596_vm2, %v1622_v0, %v1563_v55  ;;  %v2229_v0 = vld [vmem:[#allocation4 + $0x388] sm:$0xff] }
 0x4bf   :  { %v1568_v28 = vadd.f32 %v6101_v5, %v1567_v40  ;;  %v1655_v45 = vsel %vm1596_vm2, %v1621_v22, %v1558_v46  ;;  %v6231_v2 = vpop.permute.xlu0 %2834  ;;  %v2228_v46 = vld [vmem:[#allocation4 + $0x380] sm:$0xff] }
 0x4c0   :  { %v1624_v35 = vmax.f32 %v1573_v12, 0.0  ;;  %4699 = vmatprep.mubr.f32.mxu1 %v1655_v45  ;;  %7230 = vst [vmem:[#allocation8_spill] sm:$0xff] %v6231_v2  ;;  %v5095_v54 = vpack.c.bf16 %v2229_v0, %v2228_v46  ;;  %v2237_v46 = vld [vmem:[#allocation4 + $0x3c8] sm:$0xff] }
 0x4c1   :  { %v1623_v50 = vmax.f32 %v1568_v28, 0.0  ;;  %4700 = vmatmul.mubr.f32.gmra.mrb[88].mxu1 %v1656_v49  ;;  %v4627_v21 = vpop.f32.mrb[92].mxu0 }
 0x4c2   :  { %v1583_v53 = vadd.f32 %v4627_v21, %v6101_v5  ;;  %v1577_v41 = vpop.f32.mrb[93].mxu0  ;;  %v1658_v27 = vsel %vm1596_vm2, %v1624_v35, %v1573_v12  ;;  %5096 = vmatprep.subr.bf16.mxu1 %v5095_v54  ;;  %v2230_v21 = vld [vmem:[#allocation4 + $0x390] sm:$0xff] }
 0x4c3   :  { %v1578_v29 = vadd.f32 %v6101_v5, %v1577_v41  ;;  %v1657_v1 = vsel %vm1596_vm2, %v1623_v50, %v1568_v28  ;;  %v6254_v30 = vpop.permute.xlu0 %2842  ;;  %5098 = vmatpush3.bf16.msra.mxu1 %v5095_v54 }
 0x4c4   :  { %v1626_v14 = vmax.f32 %v1583_v53, 0.0  ;;  %4702 = vmatprep.mubr.f32.mxu1 %v1657_v1  ;;  %7232 = vst [vmem:[#allocation9_spill] sm:$0xff] %v6254_v30 }
 0x4c5   :  { %v1625_v24 = vmax.f32 %v1578_v29, 0.0  ;;  %v4630_v42 = vpop.f32.mrb[94].mxu0  ;;  %4703 = vmatmul.mubr.f32.gmra.mrb[90].mxu1 %v1658_v27 }
 0x4c6   :  { %v1593_v60 = vadd.f32 %v4630_v42, %v6101_v5  ;;  %v1587_v57 = vpop.f32.mrb[95].mxu0  ;;  %v1660_v52 = vsel %vm1596_vm2, %v1626_v14, %v1583_v53  ;;  %v2231_v53 = vld [vmem:[#allocation4 + $0x398] sm:$0xff] }
 0x4c7   :  { %v1588_v11 = vadd.f32 %v6101_v5, %v1587_v57  ;;  %v1659_v23 = vsel %vm1596_vm2, %v1625_v24, %v1578_v29  ;;  %v6204_v5 = vpop.permute.xlu1 %2806  ;;  %v6275_v12 = vpop.permute.xlu0 %2850  ;;  %v5099_v27 = vpack.c.bf16 %v2231_v53, %v2230_v21 }
 0x4c8   :  { %v1628_v16 = vmax.f32 %v1593_v60, 0.0  ;;  %4705 = vmatprep.mubr.f32.mxu1 %v1659_v23  ;;  %7234 = vst [vmem:[#allocation13_spill] sm:$0xff] %v6275_v12 }
 0x4c9   :  { %v1627_v9 = vmax.f32 %v1588_v11, 0.0  ;;  %4706 = vmatmul.mubr.f32.gmra.mrb[92].mxu1 %v1660_v52  ;;  %5100 = vmatprep.subr.bf16.mxu1 %v5099_v27  ;;  %v2232_v52 = vld [vmem:[#allocation4 + $0x3a0] sm:$0xff] }
 0x4ca   :  { %v1662_v51 = vsel %vm1596_vm2, %v1628_v16, %v1593_v60  ;;  %5102 = vmatpush3.bf16.msra.mxu1 %v5099_v27  ;;  %v2238_v27 = vld [vmem:[#allocation4 + $0x3d0] sm:$0xff] }
 0x4cb   :  { %v1661_v13 = vsel %vm1596_vm2, %v1627_v9, %v1588_v11  ;;  %v6208_v8 = vpop.permute.xlu1 %2814  ;;  %v6298_v60 = vpop.permute.xlu0 %2858  ;;  %v2233_v11 = vld [vmem:[#allocation4 + $0x3a8] sm:$0xff] }
 0x4cc   :  { %4708 = vmatprep.mubr.f32.mxu1 %v1661_v13  ;;  %7238 = vst [vmem:[#allocation16_spill] sm:$0xff] %v6298_v60  ;;  %v5103_v16 = vpack.c.bf16 %v2233_v11, %v2232_v52 }
 0x4cd   :  { %4709 = vmatmul.mubr.f32.gmra.mrb[94].mxu1 %v1662_v51 }
 0x4ce   :  { %5104 = vmatprep.subr.bf16.mxu1 %v5103_v16 }
 0x4cf   :  { %v6212_v31 = vpop.permute.xlu1 %2822  ;;  %5106 = vmatpush3.bf16.msra.mxu1 %v5103_v16 }
 0x4d3   :  { %v6227_v15 = vpop.permute.xlu1 %2830 }
 0x4d7   :  { %v6248_v10 = vpop.permute.xlu1 %2838 }
 0x4d8   :  { %7231 = vst [vmem:[#allocation11_spill] sm:$0xff] %v6248_v10 }
 0x4db   :  { %v6271_v22 = vpop.permute.xlu1 %2846 }
 0x4dc   :  { %7233 = vst [vmem:[#allocation10_spill] sm:$0xff] %v6271_v22 }
 0x4df   :  { %v6293_v14 = vpop.permute.xlu1 %2854 }
 0x4e0   :  { %7236 = vst [vmem:[#allocation14_spill] sm:$0xff] %v6293_v14 }
 0x564   :  { %v4665_v44 = vpop.f32.mrb[64].mxu1 }
 0x565   :  { %v6222_v47 = vadd.f32 %v4665_v44, %v6219_v34  ;;  %v1754_v36 = vpop.f32.mrb[65].mxu1 }
 0x566   :  { %v6225_v6 = vadd.f32 %v6219_v34, %v1754_v36 }
 0x567   :  { %3503 = vrot.lane.b32.xlu1 %v6222_v47, %s5229_s28  ;;  %v1914_v26 = vmax.f32 %v6222_v47, 0.0 }
 0x568   :  { %v4668_v37 = vpop.f32.mrb[66].mxu1  ;;  %3501 = vrot.lane.b32.xlu0 %v6225_v6, %s5229_s28  ;;  %v1913_v62 = vmax.f32 %v6225_v6, 0.0 }
 0x569   :  { %v6238_v56 = vadd.f32 %v4668_v37, %v6219_v34  ;;  %v1764_v59 = vpop.f32.mrb[67].mxu1  ;;  %v2234_v37 = vld [vmem:[#allocation4 + $0x3b0] sm:$0xff] }
 0x56a   :  { %v6241_v58 = vadd.f32 %v6219_v34, %v1764_v59  ;;  %4743 = vmatprep.mubr.f32.mxu0 %v1913_v62  ;;  %v2235_v62 = vld [vmem:[#allocation4 + $0x3b8] sm:$0xff] }
 0x56b   :  { %3507 = vrot.lane.b32.xlu1 %v6238_v56, %s5229_s28  ;;  %4744 = vmatmul.mubr.f32.vlgmr.msra.gmra.mrb[96].mxu0 %v1914_v26  ;;  %v1916_v7 = vmax.f32 %v6238_v56, 0.0  ;;  %v6315_v26 = vpop.permute.xlu1 %2862 }
 0x56c   :  { %v4671_v20 = vpop.f32.mrb[68].mxu1  ;;  %3505 = vrot.lane.b32.xlu0 %v6241_v58, %s5229_s28  ;;  %v1915_v18 = vmax.f32 %v6241_v58, 0.0  ;;  %7242 = vst [vmem:[#allocation20_spill] sm:$0xff] %v6315_v26 }
 0x56d   :  { %v6251_v32 = vadd.f32 %v4671_v20, %v6219_v34  ;;  %v1774_v25 = vpop.f32.mrb[69].mxu1  ;;  %v5107_v20 = vpack.c.bf16 %v2235_v62, %v2234_v37 }
 0x56e   :  { %v6257_v33 = vadd.f32 %v6219_v34, %v1774_v25  ;;  %4746 = vmatprep.mubr.f32.mxu0 %v1915_v18  ;;  %v6320_v18 = vpop.permute.xlu0 %2866 }
 0x56f   :  { %3511 = vrot.lane.b32.xlu1 %v6251_v32, %s5229_s28  ;;  %4747 = vmatmul.mubr.f32.gmra.mrb[98].mxu0 %v1916_v7  ;;  %v1918_v38 = vmax.f32 %v6251_v32, 0.0  ;;  %7243 = vst [vmem:[#allocation21_spill] sm:$0xff] %v6320_v18 }
 0x570   :  { %v4674_v61 = vpop.f32.mrb[70].mxu1  ;;  %3509 = vrot.lane.b32.xlu0 %v6257_v33, %s5229_s28  ;;  %v1917_v43 = vmax.f32 %v6257_v33, 0.0  ;;  %5108 = vmatprep.subr.bf16.mxu1 %v5107_v20 }
 0x571   :  { %v6265_v55 = vadd.f32 %v4674_v61, %v6219_v34  ;;  %v1784_v3 = vpop.f32.mrb[71].mxu1  ;;  %5110 = vmatpush3.bf16.msra.mxu1 %v5107_v20 }
 0x572   :  { %v6269_v48 = vadd.f32 %v6219_v34, %v1784_v3  ;;  %4749 = vmatprep.mubr.f32.mxu0 %v1917_v43  ;;  %v6342_v53 = vpop.permute.xlu0 %2874 }
 0x573   :  { %3515 = vrot.lane.b32.xlu1 %v6265_v55, %s5229_s28  ;;  %4750 = vmatmul.mubr.f32.gmra.mrb[100].mxu0 %v1918_v38  ;;  %v1920_v35 = vmax.f32 %v6265_v55, 0.0  ;;  %v2236_v38 = vld [vmem:[#allocation4 + $0x3c0] sm:$0xff]  ;;  %7248 = vst [vmem:[#allocation26_spill] sm:$0xff] %v6342_v53 }
 0x574   :  { %v4677_v40 = vpop.f32.mrb[72].mxu1  ;;  %3513 = vrot.lane.b32.xlu0 %v6269_v48, %s5229_s28  ;;  %v1919_v49 = vmax.f32 %v6269_v48, 0.0  ;;  %v5111_v54 = vpack.c.bf16 %v2237_v46, %v2236_v38  ;;  %v2241_v38 = vld [vmem:[#allocation4 + $0x3e8] sm:$0xff] }
 0x575   :  { %v6281_v28 = vadd.f32 %v4677_v40, %v6219_v34  ;;  %v1794_v45 = vpop.f32.mrb[73].mxu1 }
 0x576   :  { %v6285_v50 = vadd.f32 %v6219_v34, %v1794_v45  ;;  %4752 = vmatprep.mubr.f32.mxu0 %v1919_v49  ;;  %v6337_v45 = vpop.permute.xlu1 %2870  ;;  %5112 = vmatprep.subr.bf16.mxu1 %v5111_v54  ;;  %v6364_v37 = vpop.permute.xlu0 %2882 }
 0x577   :  { %7235 = vst [vmem:[#allocation12_spill] sm:$0xff] %v6281_v28  ;;  %4753 = vmatmul.mubr.f32.gmra.mrb[102].mxu0 %v1920_v35  ;;  %3519 = vrot.lane.b32.xlu1 %v6281_v28, %s5229_s28  ;;  %v1922_v41 = vmax.f32 %v6281_v28, 0.0  ;;  %7246 = vst [vmem:[#allocation24_spill] sm:$0xff] %v6337_v45 }
 0x578   :  { %v4680_v29 = vpop.f32.mrb[74].mxu1  ;;  %3517 = vrot.lane.b32.xlu0 %v6285_v50, %s5229_s28  ;;  %v1921_v1 = vmax.f32 %v6285_v50, 0.0  ;;  %5114 = vmatpush3.bf16.msra.mxu1 %v5111_v54  ;;  %7253 = vst [vmem:[#allocation31_spill] sm:$0xff] %v6364_v37 }
 0x579   :  { %v6296_v24 = vadd.f32 %v4680_v29, %v6219_v34  ;;  %v1804_v42 = vpop.f32.mrb[75].mxu1  ;;  %v2239_v29 = vld [vmem:[#allocation4 + $0x3d8] sm:$0xff] }
 0x57a   :  { %4755 = vmatprep.mubr.f32.mxu0 %v1921_v1  ;;  %v6301_v57 = vadd.f32 %v6219_v34, %v1804_v42  ;;  %v5115_v42 = vpack.c.bf16 %v2239_v29, %v2238_v27  ;;  %v6386_v29 = vpop.permute.xlu0 %2890 }
 0x57b   :  { %7237 = vst [vmem:[#allocation15_spill] sm:$0xff] %v6296_v24  ;;  %4756 = vmatmul.mubr.f32.gmra.mrb[104].mxu0 %v1922_v41  ;;  %v1924_v23 = vmax.f32 %v6296_v24, 0.0  ;;  %3523 = vrot.lane.b32.xlu1 %v6296_v24, %s5229_s28  ;;  %7258 = vst [vmem:[#allocation36_spill] sm:$0xff] %v6386_v29 }
 0x57c   :  { %7239 = vst [vmem:[#allocation17_spill] sm:$0xff] %v6301_v57  ;;  %v1923_v9 = vmax.f32 %v6301_v57, 0.0  ;;  %v4683_v51 = vpop.f32.mrb[76].mxu1  ;;  %3521 = vrot.lane.b32.xlu0 %v6301_v57, %s5229_s28  ;;  %5116 = vmatprep.subr.bf16.mxu1 %v5115_v42 }
 0x57d   :  { %v6310_v13 = vadd.f32 %v4683_v51, %v6219_v34  ;;  %v1814_v44 = vpop.f32.mrb[77].mxu1  ;;  %5118 = vmatpush3.bf16.msra.mxu1 %v5115_v42  ;;  %v6359_v51 = vpop.permute.xlu1 %2878 }
 0x57e   :  { %4758 = vmatprep.mubr.f32.mxu0 %v1923_v9  ;;  %v6313_v36 = vadd.f32 %v6219_v34, %v1814_v44  ;;  %7252 = vst [vmem:[#allocation30_spill] sm:$0xff] %v6359_v51 }
 0x57f   :  { %7240 = vst [vmem:[#allocation18_spill] sm:$0xff] %v6310_v13  ;;  %4759 = vmatmul.mubr.f32.gmra.mrb[106].mxu0 %v1924_v23  ;;  %v1926_v59 = vmax.f32 %v6310_v13, 0.0  ;;  %3527 = vrot.lane.b32.xlu1 %v6310_v13, %s5229_s28 }
 0x580   :  { %7241 = vst [vmem:[#allocation19_spill] sm:$0xff] %v6313_v36  ;;  %v1925_v25 = vmax.f32 %v6313_v36, 0.0  ;;  %v4686_v7 = vpop.f32.mrb[78].mxu1  ;;  %3525 = vrot.lane.b32.xlu0 %v6313_v36, %s5229_s28 }
 0x581   :  { %v6326_v61 = vadd.f32 %v4686_v7, %v6219_v34  ;;  %v1824_v43 = vpop.f32.mrb[79].mxu1 }
 0x582   :  { %4761 = vmatprep.mubr.f32.mxu0 %v1925_v25  ;;  %v6329_v3 = vadd.f32 %v6219_v34, %v1824_v43  ;;  %v2240_v43 = vld [vmem:[#allocation4 + $0x3e0] sm:$0xff] }
 0x583   :  { %7244 = vst [vmem:[#allocation22_spill] sm:$0xff] %v6326_v61  ;;  %4762 = vmatmul.mubr.f32.gmra.mrb[108].mxu0 %v1926_v59  ;;  %v1928_v0 = vmax.f32 %v6326_v61, 0.0  ;;  %3531 = vrot.lane.b32.xlu1 %v6326_v61, %s5229_s28 }
 0x584   :  { %7245 = vst [vmem:[#allocation23_spill] sm:$0xff] %v6329_v3  ;;  %v1927_v40 = vmax.f32 %v6329_v3, 0.0  ;;  %v4689_v49 = vpop.f32.mrb[80].mxu1  ;;  %3529 = vrot.lane.b32.xlu0 %v6329_v3, %s5229_s28 }
 0x585   :  { %v6340_v35 = vadd.f32 %v4689_v49, %v6219_v34  ;;  %v1834_v21 = vpop.f32.mrb[81].mxu1  ;;  %v6381_v49 = vpop.permute.xlu1 %2886 }
 0x586   :  { %4764 = vmatprep.mubr.f32.mxu0 %v1927_v40  ;;  %v6345_v41 = vadd.f32 %v6219_v34, %v1834_v21  ;;  %7256 = vst [vmem:[#allocation34_spill] sm:$0xff] %v6381_v49 }
 0x587   :  { %7247 = vst [vmem:[#allocation25_spill] sm:$0xff] %v6340_v35  ;;  %4765 = vmatmul.mubr.f32.gmra.mrb[110].mxu0 %v1928_v0  ;;  %v1930_v1 = vmax.f32 %v6340_v35, 0.0  ;;  %3535 = vrot.lane.b32.xlu1 %v6340_v35, %s5229_s28  ;;  %v5119_v0 = vpack.c.bf16 %v2241_v38, %v2240_v43 }
 0x588   :  { %7249 = vst [vmem:[#allocation27_spill] sm:$0xff] %v6345_v41  ;;  %v1929_v52 = vmax.f32 %v6345_v41, 0.0  ;;  %v4692_v11 = vpop.f32.mrb[82].mxu1  ;;  %3533 = vrot.lane.b32.xlu0 %v6345_v41, %s5229_s28 }
 0x589   :  { %v6354_v23 = vadd.f32 %v4692_v11, %v6219_v34  ;;  %v1844_v16 = vpop.f32.mrb[83].mxu1  ;;  %5120 = vmatprep.subr.bf16.mxu1 %v5119_v0  ;;  %v6403_v43 = vpop.permute.xlu1 %2894 }
 0x58a   :  { %4767 = vmatprep.mubr.f32.mxu0 %v1929_v52  ;;  %v6357_v9 = vadd.f32 %v6219_v34, %v1844_v16  ;;  %5122 = vmatpush3.bf16.msra.mxu1 %v5119_v0  ;;  %7262 = vst [vmem:[#allocation40_spill] sm:$0xff] %v6403_v43  ;;  %v6408_v0 = vpop.permute.xlu0 %2898 }
 0x58b   :  { %7250 = vst [vmem:[#allocation28_spill] sm:$0xff] %v6354_v23  ;;  %4768 = vmatmul.mubr.f32.gmra.mrb[112].mxu0 %v1930_v1  ;;  %v1932_v44 = vmax.f32 %v6354_v23, 0.0  ;;  %3539 = vrot.lane.b32.xlu1 %v6354_v23, %s5229_s28  ;;  %7263 = vst [vmem:[#allocation41_spill] sm:$0xff] %v6408_v0 }
 0x58c   :  { %7251 = vst [vmem:[#allocation29_spill] sm:$0xff] %v6357_v9  ;;  %v1931_v62 = vmax.f32 %v6357_v9, 0.0  ;;  %v4695_v59 = vpop.f32.mrb[84].mxu1  ;;  %3537 = vrot.lane.b32.xlu0 %v6357_v9, %s5229_s28 }
 0x58d   :  { %v6370_v20 = vadd.f32 %v4695_v59, %v6219_v34  ;;  %v1854_v25 = vpop.f32.mrb[85].mxu1  ;;  %v2242_v59 = vld [vmem:[#allocation4 + $0x3f0] sm:$0xff] }
 0x58e   :  { %4770 = vmatprep.mubr.f32.mxu0 %v1931_v62  ;;  %v6373_v7 = vadd.f32 %v6219_v34, %v1854_v25  ;;  %v2243_v25 = vld [vmem:[#allocation4 + $0x3f8] sm:$0xff] }
 0x58f   :  { %7254 = vst [vmem:[#allocation32_spill] sm:$0xff] %v6370_v20  ;;  %4771 = vmatmul.mubr.f32.gmra.mrb[114].mxu0 %v1932_v44  ;;  %v1934_v46 = vmax.f32 %v6370_v20, 0.0  ;;  %3543 = vrot.lane.b32.xlu1 %v6370_v20, %s5229_s28 }
 0x590   :  { %7255 = vst [vmem:[#allocation33_spill] sm:$0xff] %v6373_v7  ;;  %v1933_v54 = vmax.f32 %v6373_v7, 0.0  ;;  %v4698_v40 = vpop.f32.mrb[86].mxu1  ;;  %3541 = vrot.lane.b32.xlu0 %v6373_v7, %s5229_s28 }
 0x591   :  { %v6384_v21 = vadd.f32 %v4698_v40, %v6219_v34  ;;  %v1864_v27 = vpop.f32.mrb[87].mxu1 }
 0x592   :  { %4773 = vmatprep.mubr.f32.mxu0 %v1933_v54  ;;  %v6389_v1 = vadd.f32 %v6219_v34, %v1864_v27 }
 0x593   :  { %7257 = vst [vmem:[#allocation35_spill] sm:$0xff] %v6384_v21  ;;  %4774 = vmatmul.mubr.f32.gmra.mrb[116].mxu0 %v1934_v46  ;;  %v1936_v42 = vmax.f32 %v6384_v21, 0.0  ;;  %3547 = vrot.lane.b32.xlu1 %v6384_v21, %s5229_s28  ;;  %v5123_v46 = vpack.c.bf16 %v2243_v25, %v2242_v59  ;;  %v6425_v25 = vpop.permute.xlu1 %2902 }
 0x594   :  { %7259 = vst [vmem:[#allocation37_spill] sm:$0xff] %v6389_v1  ;;  %v1935_v52 = vmax.f32 %v6389_v1, 0.0  ;;  %v4701_v11 = vpop.f32.mrb[88].mxu1  ;;  %3545 = vrot.lane.b32.xlu0 %v6389_v1, %s5229_s28  ;;  %7266 = vst [vmem:[#allocation44_spill] sm:$0xff] %v6425_v25 }
 0x595   :  { %v6398_v16 = vadd.f32 %v4701_v11, %v6219_v34  ;;  %v1874_v44 = vpop.f32.mrb[89].mxu1  ;;  %5124 = vmatprep.subr.bf16.mxu1 %v5123_v46 }
 0x596   :  { %4776 = vmatprep.mubr.f32.mxu0 %v1935_v52  ;;  %v6401_v62 = vadd.f32 %v6219_v34, %v1874_v44  ;;  %5126 = vmatpush3.bf16.msra.mxu1 %v5123_v46 }
 0x597   :  { %7260 = vst [vmem:[#allocation38_spill] sm:$0xff] %v6398_v16  ;;  %4777 = vmatmul.mubr.f32.gmra.mrb[118].mxu0 %v1936_v42  ;;  %v1938_v38 = vmax.f32 %v6398_v16, 0.0  ;;  %3551 = vrot.lane.b32.xlu1 %v6398_v16, %s5229_s28 }
 0x598   :  { %7261 = vst [vmem:[#allocation39_spill] sm:$0xff] %v6401_v62  ;;  %v4704_v54 = vpop.f32.mrb[90].mxu1  ;;  %v1937_v40 = vmax.f32 %v6401_v62, 0.0  ;;  %3549 = vrot.lane.b32.xlu0 %v6401_v62, %s5229_s28 }
 0x599   :  { %v6414_v27 = vadd.f32 %v4704_v54, %v6219_v34  ;;  %v1884_v52 = vpop.f32.mrb[91].mxu1 }
 0x59a   :  { %v6417_v42 = vadd.f32 %v6219_v34, %v1884_v52  ;;  %4779 = vmatprep.mubr.f32.mxu0 %v1937_v40  ;;  %v6430_v40 = vpop.permute.xlu0 %2906 }
 0x59b   :  { %7264 = vst [vmem:[#allocation42_spill] sm:$0xff] %v6414_v27  ;;  %4780 = vmatmul.mubr.f32.gmra.mrb[120].mxu0 %v1938_v38  ;;  %v1940_v11 = vmax.f32 %v6414_v27, 0.0  ;;  %3555 = vrot.lane.b32.xlu1 %v6414_v27, %s5229_s28  ;;  %7268 = vst [vmem:[#allocation46_spill] sm:$0xff] %v6430_v40 }
 0x59c   :  { %7265 = vst [vmem:[#allocation43_spill] sm:$0xff] %v6417_v42  ;;  %v4707_v44 = vpop.f32.mrb[92].mxu1  ;;  %v1939_v59 = vmax.f32 %v6417_v42, 0.0  ;;  %3553 = vrot.lane.b32.xlu0 %v6417_v42, %s5229_s28 }
 0x59d   :  { %v6428_v54 = vadd.f32 %v4707_v44, %v6219_v34  ;;  %v1894_v52 = vpop.f32.mrb[93].mxu1 }
 0x59e   :  { %v6433_v38 = vadd.f32 %v6219_v34, %v1894_v52  ;;  %4782 = vmatprep.mubr.f32.mxu0 %v1939_v59 }
 0x59f   :  { %7267 = vst [vmem:[#allocation45_spill] sm:$0xff] %v6428_v54  ;;  %4783 = vmatmul.mubr.f32.gmra.mrb[122].mxu0 %v1940_v11  ;;  %v1942_v46 = vmax.f32 %v6428_v54, 0.0  ;;  %3559 = vrot.lane.b32.xlu1 %v6428_v54, %s5229_s28  ;;  %v6447_v11 = vpop.permute.xlu1 %2910  ;;  %v6452_v54 = vpop.permute.xlu0 %2914 }
 0x5a0   :  { %7269 = vst [vmem:[#allocation47_spill] sm:$0xff] %v6433_v38  ;;  %v4710_v27 = vpop.f32.mrb[94].mxu1  ;;  %v1941_v0 = vmax.f32 %v6433_v38, 0.0  ;;  %3557 = vrot.lane.b32.xlu0 %v6433_v38, %s5229_s28  ;;  %7272 = vst [vmem:[#allocation50_spill] sm:$0xff] %v6447_v11 }
 0x5a1   :  { %v6442_v44 = vadd.f32 %v4710_v27, %v6219_v34  ;;  %v1904_v40 = vpop.f32.mrb[95].mxu1  ;;  %7273 = vst [vmem:[#allocation51_spill] sm:$0xff] %v6452_v54 }
 0x5a2   :  { %v6445_v52 = vadd.f32 %v6219_v34, %v1904_v40  ;;  %4785 = vmatprep.mubr.f32.mxu0 %v1941_v0  ;;  %v6460_v34 = vld [vmem:[%s7185_s3 + $0x6] ss:$0 sm:$0xff] }
 0x5a3   :  { %7270 = vst [vmem:[#allocation48_spill] sm:$0xff] %v6442_v44  ;;  %4786 = vmatmul.mubr.f32.gmra.mrb[124].mxu0 %v1942_v46  ;;  %v1944_v59 = vmax.f32 %v6442_v44, 0.0  ;;  %3563 = vrot.lane.b32.xlu1 %v6442_v44, %s5229_s28 }
 0x5a4   :  { %7271 = vst [vmem:[#allocation49_spill] sm:$0xff] %v6445_v52  ;;  %v1943_v38 = vmax.f32 %v6445_v52, 0.0  ;;  %3561 = vrot.lane.b32.xlu0 %v6445_v52, %s5229_s28 }
 0x5a6   :  { %4788 = vmatprep.mubr.f32.mxu0 %v1943_v38 }
 0x5a7   :  { %4789 = vmatmul.mubr.f32.gmra.mrb[126].mxu0 %v1944_v59 }
 0x63e   :  { %v4745_v0 = vpop.f32.mrb[96].mxu0 }
 0x63f   :  { %v2042_v27 = vadd.f32 %v4745_v0, %v6460_v34  ;;  %v2036_v40 = vpop.f32.mrb[97].mxu0 }
 0x640   :  { %v2037_v46 = vadd.f32 %v6460_v34, %v2036_v40 }
 0x641   :  { %v2196_v11 = vmax.f32 %v2042_v27, 0.0 }
 0x642   :  { %v2195_v44 = vmax.f32 %v2037_v46, 0.0  ;;  %v4748_v54 = vpop.f32.mrb[98].mxu0 }
 0x643   :  { %v2052_v16 = vadd.f32 %v4748_v54, %v6460_v34  ;;  %v2046_v25 = vpop.f32.mrb[99].mxu0 }
 0x644   :  { %v2047_v38 = vadd.f32 %v6460_v34, %v2046_v25  ;;  %4823 = vmatprep.mubr.f32.mxu1 %v2195_v44 }
 0x645   :  { %4824 = vmatmul.mubr.f32.vlgmr.msra.gmra.mrb[96].mxu1 %v2196_v11  ;;  %v2198_v42 = vmax.f32 %v2052_v16, 0.0 }
 0x646   :  { %v2197_v59 = vmax.f32 %v2047_v38, 0.0  ;;  %v4751_v52 = vpop.f32.mrb[100].mxu0 }
 0x647   :  { %v2062_v29 = vadd.f32 %v4751_v52, %v6460_v34  ;;  %v2056_v21 = vpop.f32.mrb[101].mxu0 }
 0x648   :  { %v2057_v0 = vadd.f32 %v6460_v34, %v2056_v21  ;;  %4826 = vmatprep.mubr.f32.mxu1 %v2197_v59 }
 0x649   :  { %4827 = vmatmul.mubr.f32.gmra.mrb[98].mxu1 %v2198_v42  ;;  %v2200_v27 = vmax.f32 %v2062_v29, 0.0 }
 0x64a   :  { %v2199_v40 = vmax.f32 %v2057_v0, 0.0  ;;  %v4754_v46 = vpop.f32.mrb[102].mxu0 }
 0x64b   :  { %v2072_v54 = vadd.f32 %v4754_v46, %v6460_v34  ;;  %v2066_v43 = vpop.f32.mrb[103].mxu0 }
 0x64c   :  { %v2067_v25 = vadd.f32 %v6460_v34, %v2066_v43  ;;  %4829 = vmatprep.mubr.f32.mxu1 %v2199_v40 }
 0x64d   :  { %4830 = vmatmul.mubr.f32.gmra.mrb[100].mxu1 %v2200_v27  ;;  %v2202_v16 = vmax.f32 %v2072_v54, 0.0 }
 0x64e   :  { %v2201_v44 = vmax.f32 %v2067_v25, 0.0  ;;  %v4757_v11 = vpop.f32.mrb[104].mxu0 }
 0x64f   :  { %v2082_v52 = vadd.f32 %v4757_v11, %v6460_v34  ;;  %v2076_v38 = vpop.f32.mrb[105].mxu0 }
 0x650   :  { %v2077_v21 = vadd.f32 %v6460_v34, %v2076_v38  ;;  %4832 = vmatprep.mubr.f32.mxu1 %v2201_v44 }
 0x651   :  { %v2204_v42 = vmax.f32 %v2082_v52, 0.0  ;;  %4833 = vmatmul.mubr.f32.gmra.mrb[102].mxu1 %v2202_v16 }
 0x652   :  { %v2203_v59 = vmax.f32 %v2077_v21, 0.0  ;;  %v4760_v29 = vpop.f32.mrb[106].mxu0 }
 0x653   :  { %v2092_v0 = vadd.f32 %v4760_v29, %v6460_v34  ;;  %v2086_v46 = vpop.f32.mrb[107].mxu0 }
 0x654   :  { %4835 = vmatprep.mubr.f32.mxu1 %v2203_v59  ;;  %v2087_v43 = vadd.f32 %v6460_v34, %v2086_v46 }
 0x655   :  { %v2206_v40 = vmax.f32 %v2092_v0, 0.0  ;;  %4836 = vmatmul.mubr.f32.gmra.mrb[104].mxu1 %v2204_v42 }
 0x656   :  { %v2205_v27 = vmax.f32 %v2087_v43, 0.0  ;;  %v4763_v54 = vpop.f32.mrb[108].mxu0 }
 0x657   :  { %v2102_v25 = vadd.f32 %v4763_v54, %v6460_v34  ;;  %v2096_v11 = vpop.f32.mrb[109].mxu0 }
 0x658   :  { %4838 = vmatprep.mubr.f32.mxu1 %v2205_v27  ;;  %v2097_v44 = vadd.f32 %v6460_v34, %v2096_v11 }
 0x659   :  { %4839 = vmatmul.mubr.f32.gmra.mrb[106].mxu1 %v2206_v40  ;;  %v2208_v16 = vmax.f32 %v2102_v25, 0.0 }
 0x65a   :  { %v2207_v52 = vmax.f32 %v2097_v44, 0.0  ;;  %v4766_v38 = vpop.f32.mrb[110].mxu0 }
 0x65b   :  { %v2112_v21 = vadd.f32 %v4766_v38, %v6460_v34  ;;  %v2106_v29 = vpop.f32.mrb[111].mxu0 }
 0x65c   :  { %4841 = vmatprep.mubr.f32.mxu1 %v2207_v52  ;;  %v2107_v59 = vadd.f32 %v6460_v34, %v2106_v29 }
 0x65d   :  { %4842 = vmatmul.mubr.f32.gmra.mrb[108].mxu1 %v2208_v16  ;;  %v2210_v42 = vmax.f32 %v2112_v21, 0.0 }
 0x65e   :  { %v2209_v0 = vmax.f32 %v2107_v59, 0.0  ;;  %v4769_v46 = vpop.f32.mrb[112].mxu0 }
 0x65f   :  { %v2122_v43 = vadd.f32 %v4769_v46, %v6460_v34  ;;  %v2116_v54 = vpop.f32.mrb[113].mxu0 }
 0x660   :  { %4844 = vmatprep.mubr.f32.mxu1 %v2209_v0  ;;  %v2117_v27 = vadd.f32 %v6460_v34, %v2116_v54 }
 0x661   :  { %4845 = vmatmul.mubr.f32.gmra.mrb[110].mxu1 %v2210_v42  ;;  %v2212_v40 = vmax.f32 %v2122_v43, 0.0 }
 0x662   :  { %v2211_v25 = vmax.f32 %v2117_v27, 0.0  ;;  %v4772_v11 = vpop.f32.mrb[114].mxu0 }
 0x663   :  { %v2132_v44 = vadd.f32 %v4772_v11, %v6460_v34  ;;  %v2126_v38 = vpop.f32.mrb[115].mxu0 }
 0x664   :  { %4847 = vmatprep.mubr.f32.mxu1 %v2211_v25  ;;  %v2127_v52 = vadd.f32 %v6460_v34, %v2126_v38 }
 0x665   :  { %4848 = vmatmul.mubr.f32.gmra.mrb[112].mxu1 %v2212_v40  ;;  %v2214_v16 = vmax.f32 %v2132_v44, 0.0 }
 0x666   :  { %v2213_v21 = vmax.f32 %v2127_v52, 0.0  ;;  %v4775_v29 = vpop.f32.mrb[116].mxu0 }
 0x667   :  { %v2142_v59 = vadd.f32 %v4775_v29, %v6460_v34  ;;  %v2136_v46 = vpop.f32.mrb[117].mxu0 }
 0x668   :  { %4850 = vmatprep.mubr.f32.mxu1 %v2213_v21  ;;  %v2137_v0 = vadd.f32 %v6460_v34, %v2136_v46 }
 0x669   :  { %4851 = vmatmul.mubr.f32.gmra.mrb[114].mxu1 %v2214_v16  ;;  %v2216_v42 = vmax.f32 %v2142_v59, 0.0 }
 0x66a   :  { %v2215_v43 = vmax.f32 %v2137_v0, 0.0  ;;  %v4778_v54 = vpop.f32.mrb[118].mxu0 }
 0x66b   :  { %v2152_v27 = vadd.f32 %v4778_v54, %v6460_v34  ;;  %v2146_v11 = vpop.f32.mrb[119].mxu0 }
 0x66c   :  { %4853 = vmatprep.mubr.f32.mxu1 %v2215_v43  ;;  %v2147_v25 = vadd.f32 %v6460_v34, %v2146_v11 }
 0x66d   :  { %4854 = vmatmul.mubr.f32.gmra.mrb[116].mxu1 %v2216_v42  ;;  %v2218_v40 = vmax.f32 %v2152_v27, 0.0 }
 0x66e   :  { %v2217_v44 = vmax.f32 %v2147_v25, 0.0  ;;  %v4781_v38 = vpop.f32.mrb[120].mxu0 }
 0x66f   :  { %v2162_v52 = vadd.f32 %v4781_v38, %v6460_v34  ;;  %v2156_v29 = vpop.f32.mrb[121].mxu0 }
 0x670   :  { %4856 = vmatprep.mubr.f32.mxu1 %v2217_v44  ;;  %v2157_v21 = vadd.f32 %v6460_v34, %v2156_v29 }
 0x671   :  { %4857 = vmatmul.mubr.f32.gmra.mrb[118].mxu1 %v2218_v40  ;;  %v2220_v16 = vmax.f32 %v2162_v52, 0.0 }
 0x672   :  { %v2219_v59 = vmax.f32 %v2157_v21, 0.0  ;;  %v4784_v46 = vpop.f32.mrb[122].mxu0 }
 0x673   :  { %v2172_v0 = vadd.f32 %v4784_v46, %v6460_v34  ;;  %v2166_v54 = vpop.f32.mrb[123].mxu0 }
 0x674   :  { %v2167_v43 = vadd.f32 %v6460_v34, %v2166_v54  ;;  %4859 = vmatprep.mubr.f32.mxu1 %v2219_v59 }
 0x675   :  { %v2222_v42 = vmax.f32 %v2172_v0, 0.0  ;;  %4860 = vmatmul.mubr.f32.gmra.mrb[120].mxu1 %v2220_v16  ;;  %v6494_v0 = vpop.permute.xlu1 %2918 }
 0x676   :  { %v2221_v27 = vmax.f32 %v2167_v43, 0.0  ;;  %v4787_v11 = vpop.f32.mrb[124].mxu0  ;;  %7274 = vst [vmem:[#allocation52_spill] sm:$0xff] %v6494_v0  ;;  %v6496_v43 = vpop.permute.xlu0 %2922 }
 0x677   :  { %v2182_v25 = vadd.f32 %v4787_v11, %v6460_v34  ;;  %v2176_v38 = vpop.f32.mrb[125].mxu0  ;;  %7275 = vst [vmem:[#allocation53_spill] sm:$0xff] %v6496_v43 }
 0x678   :  { %v2177_v44 = vadd.f32 %v6460_v34, %v2176_v38  ;;  %4862 = vmatprep.mubr.f32.mxu1 %v2221_v27 }
 0x679   :  { %v2224_v40 = vmax.f32 %v2182_v25, 0.0  ;;  %4863 = vmatmul.mubr.f32.gmra.mrb[122].mxu1 %v2222_v42  ;;  %v6498_v27 = vpop.permute.xlu1 %3156 }
 0x67a   :  { %v2223_v52 = vmax.f32 %v2177_v44, 0.0  ;;  %v4790_v29 = vpop.f32.mrb[126].mxu0  ;;  %v6500_v42 = vpop.permute.xlu0 %3151 }
 0x67b   :  { %v2192_v21 = vadd.f32 %v4790_v29, %v6460_v34  ;;  %v2186_v46 = vpop.f32.mrb[127].mxu0 }
 0x67c   :  { %v2187_v54 = vadd.f32 %v6460_v34, %v2186_v46  ;;  %4865 = vmatprep.mubr.f32.mxu1 %v2223_v52 }
 0x67d   :  { %v2226_v59 = vmax.f32 %v2192_v21, 0.0  ;;  %4866 = vmatmul.mubr.f32.gmra.mrb[124].mxu1 %v2224_v40  ;;  %v6502_v11 = vpop.permute.xlu1 %3166 }
 0x67e   :  { %v2225_v16 = vmax.f32 %v2187_v54, 0.0  ;;  %v6504_v25 = vpop.permute.xlu0 %3161 }
 0x680   :  { %4868 = vmatprep.mubr.f32.mxu1 %v2225_v16 }
 0x681   :  { %4869 = vmatmul.mubr.f32.gmra.mrb[126].mxu1 %v2226_v59  ;;  %v6506_v38 = vpop.permute.xlu1 %3176 }
 0x682   :  { %v6508_v34 = vpop.permute.xlu0 %3171 }
 0x685   :  { %v6510_v44 = vpop.permute.xlu1 %3186 }
 0x686   :  { %v6512_v40 = vpop.permute.xlu0 %3181 }
 0x689   :  { %v6514_v52 = vpop.permute.xlu1 %3196 }
 0x68a   :  { %7276 = vst [vmem:[#allocation54_spill] sm:$0xff] %v6514_v52  ;;  %v6516_v29 = vpop.permute.xlu0 %3191 }
 0x68d   :  { %v6518_v21 = vpop.permute.xlu1 %3206 }
 0x68e   :  { %7277 = vst [vmem:[#allocation55_spill] sm:$0xff] %v6518_v21  ;;  %v6520_v46 = vpop.permute.xlu0 %3201 }
 0x68f   :  { %7278 = vst [vmem:[#allocation56_spill] sm:$0xff] %v6520_v46 }
 0x691   :  { %v6522_v54 = vpop.permute.xlu1 %3216 }
 0x692   :  { %7279 = vst [vmem:[#allocation57_spill] sm:$0xff] %v6522_v54  ;;  %v6524_v59 = vpop.permute.xlu0 %3211 }
 0x693   :  { %7280 = vst [vmem:[#allocation58_spill] sm:$0xff] %v6524_v59 }
 0x695   :  { %v6526_v16 = vpop.permute.xlu1 %3226 }
 0x696   :  { %7281 = vst [vmem:[#allocation59_spill] sm:$0xff] %v6526_v16  ;;  %v6528_v43 = vpop.permute.xlu0 %3221 }
 0x697   :  { %7282 = vst [vmem:[#allocation60_spill] sm:$0xff] %v6528_v43 }
 0x699   :  { %v6530_v0 = vpop.permute.xlu1 %3236 }
 0x69a   :  { %7283 = vst [vmem:[#allocation61_spill] sm:$0xff] %v6530_v0  ;;  %v6532_v62 = vpop.permute.xlu0 %3231 }
 0x69b   :  { %7284 = vst [vmem:[#allocation62_spill] sm:$0xff] %v6532_v62 }
 0x69d   :  { %v6534_v37 = vpop.permute.xlu1 %3246 }
 0x69e   :  { %7285 = vst [vmem:[#allocation63_spill] sm:$0xff] %v6534_v37  ;;  %v6536_v20 = vpop.permute.xlu0 %3241 }
 0x69f   :  { %7286 = vst [vmem:[#allocation64_spill] sm:$0xff] %v6536_v20 }
 0x6a1   :  { %v6538_v49 = vpop.permute.xlu1 %3256 }
 0x6a2   :  { %7287 = vst [vmem:[#allocation65_spill] sm:$0xff] %v6538_v49  ;;  %v6540_v1 = vpop.permute.xlu0 %3251 }
 0x6a3   :  { %7288 = vst [vmem:[#allocation66_spill] sm:$0xff] %v6540_v1 }
 0x6a5   :  { %v6542_v53 = vpop.permute.xlu1 %3266 }
 0x6a6   :  { %7289 = vst [vmem:[#allocation67_spill] sm:$0xff] %v6542_v53  ;;  %v6544_v23 = vpop.permute.xlu0 %3261 }
 0x6a7   :  { %7290 = vst [vmem:[#allocation68_spill] sm:$0xff] %v6544_v23 }
 0x6a9   :  { %v6546_v51 = vpop.permute.xlu1 %3276 }
 0x6aa   :  { %7291 = vst [vmem:[#allocation69_spill] sm:$0xff] %v6546_v51  ;;  %v6548_v7 = vpop.permute.xlu0 %3271 }
 0x6ab   :  { %7292 = vst [vmem:[#allocation70_spill] sm:$0xff] %v6548_v7 }
 0x6ad   :  { %v6550_v18 = vpop.permute.xlu1 %3286 }
 0x6ae   :  { %7293 = vst [vmem:[#allocation71_spill] sm:$0xff] %v6550_v18  ;;  %v6552_v0 = vpop.permute.xlu0 %3281 }
 0x6af   :  { %7294 = vst [vmem:[#allocation72_spill] sm:$0xff] %v6552_v0 }
 0x6b1   :  { %v6554_v35 = vpop.permute.xlu1 %3296 }
 0x6b2   :  { %7295 = vst [vmem:[#allocation73_spill] sm:$0xff] %v6554_v35  ;;  %v6556_v37 = vpop.permute.xlu0 %3291 }
 0x6b3   :  { %7296 = vst [vmem:[#allocation74_spill] sm:$0xff] %v6556_v37 }
 0x6b5   :  { %v6558_v20 = vpop.permute.xlu1 %3306 }
 0x6b6   :  { %7297 = vst [vmem:[#allocation75_spill] sm:$0xff] %v6558_v20  ;;  %v6560_v49 = vpop.permute.xlu0 %3301  ;;  %v6581_v20 = vld [vmem:[%s7185_s3 + $0x7] ss:$0 sm:$0xff] }
 0x6b7   :  { %7298 = vst [vmem:[#allocation76_spill] sm:$0xff] %v6560_v49 }
 0x6b9   :  { %v6562_v1 = vpop.permute.xlu1 %3375 }
 0x6ba   :  { %v6564_v53 = vpop.permute.xlu0 %3373 }
 0x6bd   :  { %v6566_v23 = vpop.permute.xlu1 %3379 }
 0x6be   :  { %v6568_v51 = vpop.permute.xlu0 %3377 }
 0x6c1   :  { %v6570_v7 = vpop.permute.xlu1 %3383 }
 0x6c2   :  { %v6572_v18 = vpop.permute.xlu0 %3381 }
 0x6c5   :  { %v6574_v0 = vpop.permute.xlu1 %3387 }
 0x6c6   :  { %7299 = vst [vmem:[#allocation77_spill] sm:$0xff] %v6574_v0  ;;  %v6576_v35 = vpop.permute.xlu0 %3385 }
 0x6c9   :  { %v6583_v49 = vpop.permute.xlu1 %3391 }
 0x6ca   :  { %7300 = vst [vmem:[#allocation78_spill] sm:$0xff] %v6583_v49  ;;  %v6585_v37 = vpop.permute.xlu0 %3389 }
 0x6cd   :  { %v6588_v62 = vpop.permute.xlu1 %3395 }
 0x6ce   :  { %7301 = vst [vmem:[#allocation79_spill] sm:$0xff] %v6588_v62  ;;  %v6591_v60 = vpop.permute.xlu0 %3393 }
 0x6cf   :  { %7302 = vst [vmem:[#allocation80_spill] sm:$0xff] %v6591_v60 }
 0x6d1   :  { %v6594_v54 = vpop.permute.xlu1 %3399 }
 0x6d2   :  { %7303 = vst [vmem:[#allocation81_spill] sm:$0xff] %v6594_v54  ;;  %v6597_v43 = vpop.permute.xlu0 %3397 }
 0x6d3   :  { %7304 = vst [vmem:[#allocation82_spill] sm:$0xff] %v6597_v43 }
 0x718   :  { %v4825_v45 = vpop.f32.mrb[96].mxu1 }
 0x719   :  { %v2324_v9 = vadd.f32 %v4825_v45, %v6581_v20  ;;  %v2318_v16 = vpop.f32.mrb[97].mxu1 }
 0x71a   :  { %v2319_v26 = vadd.f32 %v6581_v20, %v2318_v16  ;;  %v6604_v16 = vpop.permute.xlu0 %3401 }
 0x71b   :  { %3599 = vrot.lane.b32.xlu1 %v2324_v9, %s5230_s7  ;;  %2964 = vperm.xlu0 %5139, %v2324_v9   ;;  %v6601_v9 = vpop.permute.xlu1 %3403  ;;  %7306 = vst [vmem:[#allocation84_spill] sm:$0xff] %v6604_v16 }
 0x71c   :  { %v4828_v61 = vpop.f32.mrb[98].mxu1  ;;  %7305 = vst [vmem:[#allocation83_spill] sm:$0xff] %v6601_v9 }
 0x71d   :  { %v2328_v41 = vpop.f32.mrb[99].mxu1  ;;  %v2334_v12 = vadd.f32 %v4828_v61, %v6581_v20 }
 0x71e   :  { %v2329_v13 = vadd.f32 %v6581_v20, %v2328_v41  ;;  %v6610_v61 = vpop.permute.xlu0 %3405 }
 0x71f   :  { %3597 = vrot.lane.b32.xlu0 %v2319_v26, %s5230_s7  ;;  %2959 = vperm.xlu1 %5140, %v2319_v26   ;;  %v6607_v26 = vpop.permute.xlu1 %3407  ;;  %7308 = vst [vmem:[#allocation86_spill] sm:$0xff] %v6610_v61 }
 0x720   :  { %v4831_v45 = vpop.f32.mrb[100].mxu1  ;;  %7307 = vst [vmem:[#allocation85_spill] sm:$0xff] %v6607_v26 }
 0x721   :  { %v2338_v14 = vpop.f32.mrb[101].mxu1 }
 0x722   :  { %v2339_v54 = vadd.f32 %v6581_v20, %v2338_v14  ;;  %v6615_v9 = vpop.permute.xlu0 %3409  ;;  %v2344_v14 = vadd.f32 %v4831_v45, %v6581_v20 }
 0x723   :  { %3601 = vrot.lane.b32.xlu0 %v2329_v13, %s5230_s7  ;;  %2974 = vperm.xlu1 %5140, %v2334_v12   ;;  %v6612_v21 = vpop.permute.xlu1 %3411  ;;  %7310 = vst [vmem:[#allocation88_spill] sm:$0xff] %v6615_v9 }
 0x724   :  { %v4834_v3 = vpop.f32.mrb[102].mxu1  ;;  %7309 = vst [vmem:[#allocation87_spill] sm:$0xff] %v6612_v21 }
 0x725   :  { %v2348_v62 = vpop.f32.mrb[103].mxu1 }
 0x726   :  { %v2349_v59 = vadd.f32 %v6581_v20, %v2348_v62  ;;  %v2354_v62 = vadd.f32 %v4834_v3, %v6581_v20 }
 0x727   :  { %2979 = vperm.xlu0 %5139, %v2339_v54   ;;  %3603 = vrot.lane.b32.xlu1 %v2334_v12, %s5230_s7  ;;  %v6619_v30 = vpop.permute.xlu1 %3415  ;;  %v6621_v12 = vpop.permute.xlu0 %3413 }
 0x728   :  { %v4837_v41 = vpop.f32.mrb[104].mxu1  ;;  %7311 = vst [vmem:[#allocation89_spill] sm:$0xff] %v6619_v30  ;;  %7312 = vst [vmem:[#allocation90_spill] sm:$0xff] %v6621_v12 }
 0x729   :  { %v2358_v43 = vpop.f32.mrb[105].mxu1 }
 0x72a   :  { %v2359_v45 = vadd.f32 %v6581_v20, %v2358_v43  ;;  %v2364_v43 = vadd.f32 %v4837_v41, %v6581_v20 }
 0x72b   :  { %3605 = vrot.lane.b32.xlu0 %v2339_v54, %s5230_s7  ;;  %2969 = vperm.xlu1 %5140, %v2329_v13   ;;  %v6623_v21 = vpop.permute.xlu1 %3419  ;;  %v6627_v13 = vpop.permute.xlu0 %3417 }
 0x72c   :  { %v4840_v16 = vpop.f32.mrb[106].mxu1  ;;  %7313 = vst [vmem:[#allocation91_spill] sm:$0xff] %v6623_v21  ;;  %7314 = vst [vmem:[#allocation92_spill] sm:$0xff] %v6627_v13 }
 0x72d   :  { %v2368_v26 = vpop.f32.mrb[107].mxu1 }
 0x72f   :  { %2989 = vperm.xlu0 %5139, %v2349_v59   ;;  %2984 = vperm.xlu1 %5140, %v2344_v14   ;;  %v6633_v9 = vpop.permute.xlu1 %3423  ;;  %v6635_v12 = vpop.permute.xlu0 %3421 }
 0x730   :  { %v4843_v61 = vpop.f32.mrb[108].mxu1  ;;  %7315 = vst [vmem:[#allocation93_spill] sm:$0xff] %v6633_v9  ;;  %7316 = vst [vmem:[#allocation94_spill] sm:$0xff] %v6635_v12  ;;  %v2369_v9 = vadd.f32 %v6581_v20, %v2368_v26 }
 0x731   :  { %v2378_v24 = vpop.f32.mrb[109].mxu1 }
 0x733   :  { %3609 = vrot.lane.b32.xlu0 %v2349_v59, %s5230_s7  ;;  %3607 = vrot.lane.b32.xlu1 %v2344_v14, %s5230_s7  ;;  %v6642_v3 = vpop.permute.xlu1 %3427  ;;  %v6649_v36 = vpop.permute.xlu0 %3425 }
 0x734   :  { %v6629_v54 = vpop.f32.mrb[110].mxu1  ;;  %7317 = vst [vmem:[#allocation95_spill] sm:$0xff] %v6642_v3  ;;  %7318 = vst [vmem:[#allocation96_spill] sm:$0xff] %v6649_v36  ;;  %v2379_v36 = vadd.f32 %v6581_v20, %v2378_v24 }
 0x735   :  { %v2388_v30 = vpop.f32.mrb[111].mxu1 }
 0x736   :  { %v2389_v46 = vadd.f32 %v6581_v20, %v2388_v30 }
 0x737   :  { %2999 = vperm.xlu0 %5139, %v2359_v45   ;;  %2994 = vperm.xlu1 %5140, %v2354_v62   ;;  %v6656_v41 = vpop.permute.xlu1 %3431  ;;  %v6660_v26 = vpop.permute.xlu0 %3429 }
 0x738   :  { %v4849_v21 = vpop.f32.mrb[112].mxu1  ;;  %7319 = vst [vmem:[#allocation97_spill] sm:$0xff] %v6656_v41  ;;  %7320 = vst [vmem:[#allocation98_spill] sm:$0xff] %v6660_v26 }
 0x739   :  { %v6638_v59 = vadd.f32 %v4849_v21, %v6581_v20  ;;  %v2398_v14 = vpop.f32.mrb[113].mxu1 }
 0x73a   :  { %v2399_v10 = vadd.f32 %v6581_v20, %v2398_v14 }
 0x73b   :  { %3613 = vrot.lane.b32.xlu0 %v2359_v45, %s5230_s7  ;;  %3611 = vrot.lane.b32.xlu1 %v2354_v62, %s5230_s7  ;;  %v6668_v41 = vpop.permute.xlu1 %3435  ;;  %v6673_v26 = vpop.permute.xlu0 %3433 }
 0x73c   :  { %v4852_v13 = vpop.f32.mrb[114].mxu1  ;;  %7321 = vst [vmem:[#allocation99_spill] sm:$0xff] %v6668_v41  ;;  %7322 = vst [vmem:[#allocation100_spill] sm:$0xff] %v6673_v26 }
 0x73d   :  { %v6647_v22 = vadd.f32 %v4852_v13, %v6581_v20  ;;  %v2408_v12 = vpop.f32.mrb[115].mxu1 }
 0x73e   :  { %v2409_v21 = vadd.f32 %v6581_v20, %v2408_v12  ;;  %v2374_v12 = vadd.f32 %v4840_v16, %v6581_v20 }
 0x73f   :  { %3009 = vperm.xlu0 %5139, %v2369_v9   ;;  %3004 = vperm.xlu1 %5140, %v2364_v43   ;;  %v6685_v2 = vpop.permute.xlu0 %3501 }
 0x740   :  { %v4855_v45 = vpop.f32.mrb[116].mxu1 }
 0x741   :  { %v6653_v62 = vadd.f32 %v4855_v45, %v6581_v20  ;;  %v2418_v49 = vpop.f32.mrb[117].mxu1 }
 0x742   :  { %v2419_v3 = vadd.f32 %v6581_v20, %v2418_v49 }
 0x743   :  { %3617 = vrot.lane.b32.xlu0 %v2369_v9, %s5230_s7  ;;  %3615 = vrot.lane.b32.xlu1 %v2364_v43, %s5230_s7  ;;  %v6698_v30 = vpop.permute.xlu0 %3505 }
 0x744   :  { %v4858_v13 = vpop.f32.mrb[118].mxu1 }
 0x745   :  { %v6665_v60 = vadd.f32 %v4858_v13, %v6581_v20  ;;  %v2428_v45 = vpop.f32.mrb[119].mxu1  ;;  %v6678_v13 = vpop.permute.xlu1 %3503 }
 0x746   :  { %v2429_v52 = vadd.f32 %v6581_v20, %v2428_v45  ;;  %v2384_v45 = vadd.f32 %v4843_v61, %v6581_v20 }
 0x747   :  { %3019 = vperm.xlu0 %5139, %v2379_v36   ;;  %3014 = vperm.xlu1 %5140, %v2374_v12  }
 0x748   :  { %v4861_v49 = vpop.f32.mrb[120].mxu1 }
 0x749   :  { %v6671_v9 = vadd.f32 %v4861_v49, %v6581_v20  ;;  %v2438_v43 = vpop.f32.mrb[121].mxu1  ;;  %v6694_v28 = vpop.permute.xlu1 %3507 }
 0x74a   :  { %v2439_v16 = vadd.f32 %v6581_v20, %v2438_v43 }
 0x74b   :  { %3621 = vrot.lane.b32.xlu0 %v2379_v36, %s5230_s7  ;;  %3619 = vrot.lane.b32.xlu1 %v2374_v12, %s5230_s7 }
 0x74c   :  { %v4864_v24 = vpop.f32.mrb[122].mxu1 }
 0x74d   :  { %v6683_v41 = vadd.f32 %v4864_v24, %v6581_v20  ;;  %v2448_v49 = vpop.f32.mrb[123].mxu1  ;;  %v6707_v0 = vpop.permute.xlu1 %3511 }
 0x74e   :  { %v6688_v26 = vadd.f32 %v6581_v20, %v2448_v49  ;;  %v2394_v49 = vadd.f32 %v6629_v54, %v6581_v20 }
 0x74f   :  { %3029 = vperm.xlu0 %5139, %v2389_v46   ;;  %3024 = vperm.xlu1 %5140, %v2384_v45  }
 0x750   :  { %v4867_v36 = vpop.f32.mrb[124].mxu1 }
 0x751   :  { %v6691_v12 = vadd.f32 %v4867_v36, %v6581_v20  ;;  %v2458_v43 = vpop.f32.mrb[125].mxu1  ;;  %v6714_v54 = vpop.permute.xlu1 %3515 }
 0x752   :  { %v2459_v61 = vadd.f32 %v6581_v20, %v2458_v43 }
 0x753   :  { %3625 = vrot.lane.b32.xlu0 %v2389_v46, %s5230_s7  ;;  %3623 = vrot.lane.b32.xlu1 %v2384_v45, %s5230_s7  ;;  %v6709_v46 = vpop.permute.xlu0 %3509 }
 0x754   :  { %v4870_v24 = vpop.f32.mrb[126].mxu1 }
 0x755   :  { %v6704_v36 = vadd.f32 %v4870_v24, %v6581_v20  ;;  %v2468_v57 = vpop.f32.mrb[127].mxu1 }
 0x756   :  { %v2469_v43 = vadd.f32 %v6581_v20, %v2468_v57  ;;  %v6721_v57 = vpop.permute.xlu1 %3519 }
 0x757   :  { %3039 = vperm.xlu0 %5139, %v2399_v10   ;;  %3034 = vperm.xlu1 %5140, %v2394_v49   ;;  %v6716_v14 = vpop.permute.xlu0 %3513 }
 0x75b   :  { %3629 = vrot.lane.b32.xlu0 %v2399_v10, %s5230_s7  ;;  %3627 = vrot.lane.b32.xlu1 %v2394_v49, %s5230_s7  ;;  %v6723_v20 = vpop.permute.xlu0 %3517  ;;  %v6726_v10 = vpop.permute.xlu1 %3523 }
 0x75c   :  { %7323 = vst [vmem:[#allocation101_spill] sm:$0xff] %v6726_v10 }
 0x75f   :  { %3049 = vperm.xlu0 %5139, %v2409_v21   ;;  %3044 = vperm.xlu1 %5140, %v6638_v59   ;;  %v6728_v45 = vpop.permute.xlu0 %3521 }
 0x763   :  { %3633 = vrot.lane.b32.xlu0 %v2409_v21, %s5230_s7  ;;  %3631 = vrot.lane.b32.xlu1 %v6638_v59, %s5230_s7  ;;  %v6733_v21 = vpop.permute.xlu1 %3527  ;;  %v6735_v24 = vpop.permute.xlu0 %3525 }
 0x764   :  { %7324 = vst [vmem:[#allocation102_spill] sm:$0xff] %v6733_v21 }
 0x767   :  { %3059 = vperm.xlu0 %5139, %v2419_v3   ;;  %3054 = vperm.xlu1 %5140, %v6647_v22   ;;  %v6738_v59 = vpop.permute.xlu1 %3531  ;;  %v6740_v49 = vpop.permute.xlu0 %3529 }
 0x768   :  { %7325 = vst [vmem:[#allocation103_spill] sm:$0xff] %v6738_v59 }
 0x76b   :  { %3637 = vrot.lane.b32.xlu0 %v2419_v3, %s5230_s7  ;;  %3635 = vrot.lane.b32.xlu1 %v6647_v22, %s5230_s7  ;;  %v6745_v3 = vpop.permute.xlu1 %3535  ;;  %v6747_v10 = vpop.permute.xlu0 %3533 }
 0x76c   :  { %7326 = vst [vmem:[#allocation104_spill] sm:$0xff] %v6745_v3 }
 0x76f   :  { %3069 = vperm.xlu0 %5139, %v2429_v52   ;;  %3064 = vperm.xlu1 %5140, %v6653_v62   ;;  %v6750_v22 = vpop.permute.xlu1 %3539  ;;  %v6752_v21 = vpop.permute.xlu0 %3537 }
 0x770   :  { %7327 = vst [vmem:[#allocation105_spill] sm:$0xff] %v6750_v22 }
 0x773   :  { %3641 = vrot.lane.b32.xlu0 %v2429_v52, %s5230_s7  ;;  %3639 = vrot.lane.b32.xlu1 %v6653_v62, %s5230_s7  ;;  %v6757_v52 = vpop.permute.xlu1 %3543  ;;  %v6759_v59 = vpop.permute.xlu0 %3541 }
 0x774   :  { %7328 = vst [vmem:[#allocation106_spill] sm:$0xff] %v6757_v52 }
 0x777   :  { %3079 = vperm.xlu0 %5139, %v2439_v16   ;;  %3074 = vperm.xlu1 %5140, %v6665_v60   ;;  %v6763_v62 = vpop.permute.xlu1 %3547  ;;  %v6765_v3 = vpop.permute.xlu0 %3545 }
 0x778   :  { %7329 = vst [vmem:[#allocation107_spill] sm:$0xff] %v6763_v62 }
 0x77b   :  { %3645 = vrot.lane.b32.xlu0 %v2439_v16, %s5230_s7  ;;  %3643 = vrot.lane.b32.xlu1 %v6665_v60, %s5230_s7  ;;  %v6768_v22 = vpop.permute.xlu1 %3551  ;;  %v6770_v16 = vpop.permute.xlu0 %3549 }
 0x77c   :  { %7330 = vst [vmem:[#allocation108_spill] sm:$0xff] %v6768_v22 }
 0x77f   :  { %3089 = vperm.xlu0 %5139, %v6688_v26   ;;  %3084 = vperm.xlu1 %5140, %v6671_v9   ;;  %v6773_v60 = vpop.permute.xlu1 %3555  ;;  %v6775_v52 = vpop.permute.xlu0 %3553 }
 0x780   :  { %7331 = vst [vmem:[#allocation109_spill] sm:$0xff] %v6773_v60  ;;  %7332 = vst [vmem:[#allocation110_spill] sm:$0xff] %v6775_v52 }
 0x783   :  { %3099 = vperm.xlu0 %5139, %v2459_v61   ;;  %3094 = vperm.xlu1 %5140, %v6683_v41   ;;  %v6783_v22 = vpop.permute.xlu1 %3559  ;;  %v6785_v62 = vpop.permute.xlu0 %3557 }
 0x784   :  { %7333 = vst [vmem:[#allocation111_spill] sm:$0xff] %v6783_v22 }
 0x787   :  { %3109 = vperm.xlu0 %5139, %v2469_v43   ;;  %3104 = vperm.xlu1 %5140, %v6691_v12   ;;  %v6790_v60 = vpop.permute.xlu1 %3563  ;;  %v6792_v52 = vpop.permute.xlu0 %3561 }
 0x788   :  { %7334 = vst [vmem:[#allocation112_spill] sm:$0xff] %v6790_v60  ;;  %7335 = vst [vmem:[#allocation113_spill] sm:$0xff] %v6792_v52 }
 0x78b   :  { %3649 = vrot.lane.b32.xlu0 %v6688_v26, %s5230_s7  ;;  %3114 = vperm.xlu1 %5140, %v6704_v36   ;;  %v2926_v26 = vmul.f32 %v6200_v39, %v6222_v47 }
 0x78f   :  { %3653 = vrot.lane.b32.xlu0 %v2459_v61, %s5230_s7  ;;  %3647 = vrot.lane.b32.xlu1 %v6671_v9, %s5230_s7  ;;  %v3600_v9 = vpop.permute.xlu1 %3599 }
 0x793   :  { %3657 = vrot.lane.b32.xlu0 %v2469_v43, %s5230_s7  ;;  %3651 = vrot.lane.b32.xlu1 %v6683_v41, %s5230_s7  ;;  %v2925_v43 = vmul.f32 %v6202_v17, %v6225_v6 }
 0x797   :  { %3655 = vrot.lane.b32.xlu1 %v6691_v12, %s5230_s7 }
 0x79a   :  { %v2965_v61 = vpop.permute.xlu0 %2964 }
 0x79b   :  { %v3118_v22 = vadd.f32 %v2965_v61, %v2926_v26  ;;  %3659 = vrot.lane.b32.xlu1 %v6704_v36, %s5230_s7 }
 0x79d   :  { %v3310_v41 = vadd.f32 %v6498_v27, %v3118_v22  ;;  %v2928_v27 = vmul.f32 %v6206_v4, %v6238_v56  ;;  %v2929_v4 = vmul.f32 %v6208_v8, %v6257_v33  ;;  %v2927_v8 = vmul.f32 %v6204_v5, %v6241_v58 }
 0x79e   :  { %v3598_v60 = vpop.permute.xlu0 %3597  ;;  %v2960_v52 = vpop.permute.xlu1 %2959  ;;  %v2931_v5 = vmul.f32 %v6212_v31, %v6269_v48  ;;  %v2930_v58 = vmul.f32 %v6210_v63, %v6251_v32 }
 0x79f   :  { %v3695_v39 = vsel %vm3693_vm3, %v3310_v41, %v6562_v1  ;;  %v3117_v47 = vadd.f32 %v2960_v52, %v2925_v43 }
 0x7a0   :  { %v3728_v12 = vsel %vm3726_vm4, %v3695_v39, %v6678_v13 }
 0x7a1   :  { %v3761_v36 = vsel %vm3759_vm5, %v3728_v12, %v3600_v9  ;;  %v3309_v26 = vadd.f32 %v6500_v42, %v3117_v47 }
 0x7a2   :  { %3794 = vst.msk [vmem:[%s7186_s4 + $0x8] sm:$0xff] %vm3792_vm6, %v3761_v36  ;;  %v3602_v17 = vpop.permute.xlu0 %3601  ;;  %v2975_v6 = vpop.permute.xlu1 %2974 }
 0x7a3   :  { %v3694_v1 = vsel %vm3693_vm3, %v3309_v26, %v6564_v53  ;;  %v3120_v22 = vadd.f32 %v2975_v6, %v2928_v27  ;;  %v2933_v6 = vmul.f32 %v6227_v15, %v6285_v50 }
 0x7a4   :  { %v3727_v13 = vsel %vm3726_vm4, %v3694_v1, %v6685_v2  ;;  %v2932_v1 = vmul.f32 %v6214_v19, %v6265_v55 }
 0x7a5   :  { %v3760_v52 = vsel %vm3759_vm5, %v3727_v13, %v3598_v60  ;;  %v3312_v42 = vadd.f32 %v6502_v11, %v3120_v22  ;;  %v7336_v13 = vld [vmem:[#allocation77_spill] sm:$0xff] }
 0x7a6   :  { %3793 = vst.msk [vmem:[%s7186_s4] sm:$0xff] %vm3792_vm6, %v3760_v52  ;;  %v2980_v56 = vpop.permute.xlu0 %2979  ;;  %v3604_v9 = vpop.permute.xlu1 %3603 }
 0x7a7   :  { %v3121_v61 = vadd.f32 %v2980_v56, %v2929_v4  ;;  %v3697_v53 = vsel %vm3693_vm3, %v3312_v42, %v6566_v23 }
 0x7a8   :  { %v3730_v2 = vsel %vm3726_vm4, %v3697_v53, %v6694_v28  ;;  %v7339_v53 = vld [vmem:[#allocation12_spill] sm:$0xff] }
 0x7a9   :  { %v3313_v60 = vadd.f32 %v6508_v34, %v3121_v61  ;;  %v3763_v11 = vsel %vm3759_vm5, %v3730_v2, %v3604_v9  ;;  %v7337_v9 = vld [vmem:[#allocation17_spill] sm:$0xff]  ;;  %v7340_v2 = vld [vmem:[#allocation8_spill] sm:$0xff] }
 0x7aa   :  { %3796 = vst.msk [vmem:[%s7186_s4 + $0x18] sm:$0xff] %vm3792_vm6, %v3763_v11  ;;  %v3606_v33 = vpop.permute.xlu0 %3605  ;;  %v2970_v41 = vpop.permute.xlu1 %2969 }
 0x7ab   :  { %v3698_v23 = vsel %vm3693_vm3, %v3313_v60, %v6572_v18  ;;  %v3119_v43 = vadd.f32 %v2970_v41, %v2927_v8  ;;  %v2934_v60 = vmul.f32 %v7340_v2, %v7339_v53  ;;  %v7341_v8 = vld [vmem:[#allocation56_spill] sm:$0xff]  ;;  %v7342_v41 = vld [vmem:[#allocation54_spill] sm:$0xff]  ;;  %v7359_v2 = vld [vmem:[#allocation57_spill] sm:$0xff] }
 0x7ac   :  { %v3731_v28 = vsel %vm3726_vm4, %v3698_v23, %v6709_v46 }
 0x7ad   :  { %v3764_v34 = vsel %vm3759_vm5, %v3731_v28, %v3606_v33  ;;  %v3311_v39 = vadd.f32 %v6504_v25, %v3119_v43 }
 0x7ae   :  { %3797 = vst.msk [vmem:[%s7186_s4 + $0x20] sm:$0xff] %vm3792_vm6, %v3764_v34  ;;  %v2990_v18 = vpop.permute.xlu0 %2989  ;;  %v2985_v47 = vpop.permute.xlu1 %2984  ;;  %v7343_v34 = vld [vmem:[#allocation80_spill] sm:$0xff] }
 0x7af   :  { %v3696_v46 = vsel %vm3693_vm3, %v3311_v39, %v6568_v51  ;;  %v3123_v12 = vadd.f32 %v2990_v18, %v2931_v5  ;;  %v3122_v36 = vadd.f32 %v2985_v47, %v2930_v58  ;;  %v7344_v5 = vld [vmem:[#allocation78_spill] sm:$0xff] }
 0x7b0   :  { %v3729_v25 = vsel %vm3726_vm4, %v3696_v46, %v6698_v30 }
 0x7b1   :  { %v3762_v31 = vsel %vm3759_vm5, %v3729_v25, %v3602_v17  ;;  %v3315_v48 = vadd.f32 %v6512_v40, %v3123_v12  ;;  %v3314_v63 = vadd.f32 %v6506_v38, %v3122_v36  ;;  %v7345_v36 = vld [vmem:[#allocation19_spill] sm:$0xff]  ;;  %v7346_v25 = vld [vmem:[#allocation10_spill] sm:$0xff] }
 0x7b2   :  { %3795 = vst.msk [vmem:[%s7186_s4 + $0x10] sm:$0xff] %vm3792_vm6, %v3762_v31  ;;  %v3610_v32 = vpop.permute.xlu0 %3609  ;;  %v3608_v26 = vpop.permute.xlu1 %3607  ;;  %v2937_v31 = vmul.f32 %v7346_v25, %v7345_v36 }
 0x7b3   :  { %v3700_v51 = vsel %vm3693_vm3, %v3315_v48, %v6576_v35  ;;  %v3699_v27 = vsel %vm3693_vm3, %v3314_v63, %v6570_v7  ;;  %v7347_v48 = vld [vmem:[#allocation15_spill] sm:$0xff]  ;;  %v7348_v63 = vld [vmem:[#allocation9_spill] sm:$0xff] }
 0x7b4   :  { %v3733_v30 = vsel %vm3726_vm4, %v3700_v51, %v6716_v14  ;;  %v3732_v40 = vsel %vm3726_vm4, %v3699_v27, %v6707_v0  ;;  %v7349_v27 = vld [vmem:[#allocation58_spill] sm:$0xff] }
 0x7b5   :  { %v3766_v38 = vsel %vm3759_vm5, %v3733_v30, %v3610_v32  ;;  %v3765_v17 = vsel %vm3759_vm5, %v3732_v40, %v3608_v26  ;;  %v2936_v32 = vmul.f32 %v7348_v63, %v7347_v48  ;;  %v7350_v40 = vld [vmem:[#allocation55_spill] sm:$0xff] }
 0x7b6   :  { %3799 = vst.msk [vmem:[%s7186_s4 + $0x30] sm:$0xff] %vm3792_vm6, %v3766_v38  ;;  %3798 = vst.msk [vmem:[%s7186_s4 + $0x28] sm:$0xff] %vm3792_vm6, %v3765_v17  ;;  %v3000_v35 = vpop.permute.xlu0 %2999  ;;  %v2995_v7 = vpop.permute.xlu1 %2994  ;;  %v7368_v63 = vld [vmem:[#allocation59_spill] sm:$0xff] }
 0x7b7   :  { %v3125_v0 = vadd.f32 %v3000_v35, %v2933_v6  ;;  %v3124_v14 = vadd.f32 %v2995_v7, %v2932_v1  ;;  %v7351_v1 = vld [vmem:[#allocation82_spill] sm:$0xff]  ;;  %v7352_v7 = vld [vmem:[#allocation79_spill] sm:$0xff] }
 0x7b9   :  { %v3317_v22 = vadd.f32 %v6516_v29, %v3125_v0  ;;  %v3316_v15 = vadd.f32 %v6510_v44, %v3124_v14  ;;  %v7338_v44 = vld [vmem:[#allocation11_spill] sm:$0xff] }
 0x7ba   :  { %v3614_v50 = vpop.permute.xlu0 %3613  ;;  %v3612_v19 = vpop.permute.xlu1 %3611  ;;  %v2935_v61 = vmul.f32 %v7338_v44, %v7337_v9 }
 0x7bb   :  { %v3702_v55 = vsel %vm3693_vm3, %v3317_v22, %v6585_v37  ;;  %v3701_v52 = vsel %vm3693_vm3, %v3316_v15, %v7336_v13  ;;  %v7353_v22 = vld [vmem:[#allocation101_spill] sm:$0xff]  ;;  %v7355_v13 = vld [vmem:[#allocation14_spill] sm:$0xff] }
 0x7bc   :  { %v3735_v42 = vsel %vm3726_vm4, %v3702_v55, %v6723_v20  ;;  %v3734_v4 = vsel %vm3726_vm4, %v3701_v52, %v6714_v54  ;;  %v7354_v55 = vld [vmem:[#allocation23_spill] sm:$0xff] }
 0x7bd   :  { %v3768_v56 = vsel %vm3759_vm5, %v3735_v42, %v3614_v50  ;;  %v3767_v29 = vsel %vm3759_vm5, %v3734_v4, %v3612_v19  ;;  %v2939_v52 = vmul.f32 %v7355_v13, %v7354_v55  ;;  %v7356_v42 = vld [vmem:[#allocation18_spill] sm:$0xff]  ;;  %v7357_v4 = vld [vmem:[#allocation13_spill] sm:$0xff]  ;;  %v7376_v13 = vld [vmem:[#allocation64_spill] sm:$0xff] }
 0x7be   :  { %3801 = vst.msk [vmem:[%s7186_s4 + $0x40] sm:$0xff] %vm3792_vm6, %v3768_v56  ;;  %3800 = vst.msk [vmem:[%s7186_s4 + $0x38] sm:$0xff] %vm3792_vm6, %v3767_v29  ;;  %v3010_v37 = vpop.permute.xlu0 %3009  ;;  %v3005_v54 = vpop.permute.xlu1 %3004  ;;  %v2938_v56 = vmul.f32 %v7357_v4, %v7356_v42  ;;  %v7377_v42 = vld [vmem:[#allocation61_spill] sm:$0xff] }
 0x7bf   :  { %v3127_v20 = vadd.f32 %v3010_v37, %v2935_v61  ;;  %v3126_v11 = vadd.f32 %v3005_v54, %v2934_v60  ;;  %v7358_v61 = vld [vmem:[#allocation60_spill] sm:$0xff] }
 0x7c1   :  { %v3319_v33 = vadd.f32 %v7341_v8, %v3127_v20  ;;  %v3318_v23 = vadd.f32 %v7342_v41, %v3126_v11  ;;  %v7360_v20 = vld [vmem:[#allocation84_spill] sm:$0xff]  ;;  %v7361_v8 = vld [vmem:[#allocation81_spill] sm:$0xff] }
 0x7c2   :  { %v3618_v43 = vpop.permute.xlu0 %3617  ;;  %v3616_v28 = vpop.permute.xlu1 %3615 }
 0x7c3   :  { %v3704_v39 = vsel %vm3693_vm3, %v3319_v33, %v7343_v34  ;;  %v3703_v58 = vsel %vm3693_vm3, %v3318_v23, %v7344_v5  ;;  %v7362_v23 = vld [vmem:[#allocation102_spill] sm:$0xff]  ;;  %v7364_v5 = vld [vmem:[#allocation20_spill] sm:$0xff] }
 0x7c4   :  { %v3737_v18 = vsel %vm3726_vm4, %v3704_v39, %v6728_v45  ;;  %v3736_v47 = vsel %vm3726_vm4, %v3703_v58, %v6721_v57  ;;  %v7363_v39 = vld [vmem:[#allocation27_spill] sm:$0xff] }
 0x7c5   :  { %v3770_v46 = vsel %vm3759_vm5, %v3737_v18, %v3618_v43  ;;  %v3769_v12 = vsel %vm3759_vm5, %v3736_v47, %v3616_v28  ;;  %v2941_v58 = vmul.f32 %v7364_v5, %v7363_v39  ;;  %v7365_v18 = vld [vmem:[#allocation22_spill] sm:$0xff]  ;;  %v7366_v47 = vld [vmem:[#allocation16_spill] sm:$0xff] }
 0x7c6   :  { %3803 = vst.msk [vmem:[%s7186_s4 + $0x50] sm:$0xff] %vm3792_vm6, %v3770_v46  ;;  %3802 = vst.msk [vmem:[%s7186_s4 + $0x48] sm:$0xff] %vm3792_vm6, %v3769_v12  ;;  %v3020_v57 = vpop.permute.xlu0 %3019  ;;  %v3015_v45 = vpop.permute.xlu1 %3014  ;;  %v2940_v46 = vmul.f32 %v7366_v47, %v7365_v18  ;;  %v7385_v39 = vld [vmem:[#allocation66_spill] sm:$0xff] }
 0x7c7   :  { %v3129_v26 = vadd.f32 %v3020_v57, %v2937_v31  ;;  %v3128_v51 = vadd.f32 %v3015_v45, %v2936_v32  ;;  %v7367_v31 = vld [vmem:[#allocation62_spill] sm:$0xff] }
 0x7c9   :  { %v3321_v30 = vadd.f32 %v7349_v27, %v3129_v26  ;;  %v3320_v38 = vadd.f32 %v7350_v40, %v3128_v51  ;;  %v7369_v26 = vld [vmem:[#allocation86_spill] sm:$0xff]  ;;  %v7370_v27 = vld [vmem:[#allocation83_spill] sm:$0xff] }
 0x7ca   :  { %v3622_v17 = vpop.permute.xlu0 %3621  ;;  %v3620_v6 = vpop.permute.xlu1 %3619 }
 0x7cb   :  { %v3706_v35 = vsel %vm3693_vm3, %v3321_v30, %v7351_v1  ;;  %v3705_v0 = vsel %vm3693_vm3, %v3320_v38, %v7352_v7  ;;  %v7371_v38 = vld [vmem:[#allocation103_spill] sm:$0xff]  ;;  %v7373_v7 = vld [vmem:[#allocation24_spill] sm:$0xff] }
 0x7cc   :  { %v3739_v14 = vsel %vm3726_vm4, %v3706_v35, %v6735_v24  ;;  %v3738_v15 = vsel %vm3726_vm4, %v3705_v0, %v7353_v22  ;;  %v7372_v35 = vld [vmem:[#allocation29_spill] sm:$0xff] }
 0x7cd   :  { %v3772_v50 = vsel %vm3759_vm5, %v3739_v14, %v3622_v17  ;;  %v3771_v19 = vsel %vm3759_vm5, %v3738_v15, %v3620_v6  ;;  %v2943_v0 = vmul.f32 %v7373_v7, %v7372_v35  ;;  %v7374_v14 = vld [vmem:[#allocation25_spill] sm:$0xff] }
 0x7ce   :  { %3805 = vst.msk [vmem:[%s7186_s4 + $0x60] sm:$0xff] %vm3792_vm6, %v3772_v50  ;;  %3804 = vst.msk [vmem:[%s7186_s4 + $0x58] sm:$0xff] %vm3792_vm6, %v3771_v19  ;;  %v3030_v24 = vpop.permute.xlu0 %3029  ;;  %v3025_v29 = vpop.permute.xlu1 %3024  ;;  %v7375_v22 = vld [vmem:[#allocation21_spill] sm:$0xff] }
 0x7cf   :  { %v3131_v9 = vadd.f32 %v3030_v24, %v2939_v52  ;;  %v3130_v44 = vadd.f32 %v3025_v29, %v2938_v56  ;;  %v2942_v15 = vmul.f32 %v7375_v22, %v7374_v14  ;;  %v7378_v29 = vld [vmem:[#allocation88_spill] sm:$0xff]  ;;  %v7395_v7 = vld [vmem:[#allocation65_spill] sm:$0xff] }
 0x7d1   :  { %v3323_v53 = vadd.f32 %v7358_v61, %v3131_v9  ;;  %v3322_v60 = vadd.f32 %v7359_v2, %v3130_v44  ;;  %v7379_v44 = vld [vmem:[#allocation85_spill] sm:$0xff]  ;;  %v7380_v2 = vld [vmem:[#allocation104_spill] sm:$0xff] }
 0x7d2   :  { %v3626_v37 = vpop.permute.xlu0 %3625  ;;  %v3624_v54 = vpop.permute.xlu1 %3623 }
 0x7d3   :  { %v3708_v11 = vsel %vm3693_vm3, %v3323_v53, %v7360_v20  ;;  %v3707_v33 = vsel %vm3693_vm3, %v3322_v60, %v7361_v8  ;;  %v7381_v20 = vld [vmem:[#allocation33_spill] sm:$0xff] }
 0x7d4   :  { %v3741_v41 = vsel %vm3726_vm4, %v3708_v11, %v6740_v49  ;;  %v3740_v43 = vsel %vm3726_vm4, %v3707_v33, %v7362_v23  ;;  %v7382_v11 = vld [vmem:[#allocation30_spill] sm:$0xff]  ;;  %v7383_v33 = vld [vmem:[#allocation28_spill] sm:$0xff] }
 0x7d5   :  { %v3774_v28 = vsel %vm3759_vm5, %v3741_v41, %v3626_v37  ;;  %v3773_v34 = vsel %vm3759_vm5, %v3740_v43, %v3624_v54  ;;  %v2945_v8 = vmul.f32 %v7382_v11, %v7381_v20  ;;  %v7384_v41 = vld [vmem:[#allocation26_spill] sm:$0xff]  ;;  %v7404_v20 = vld [vmem:[#allocation67_spill] sm:$0xff] }
 0x7d6   :  { %3807 = vst.msk [vmem:[%s7186_s4 + $0x70] sm:$0xff] %vm3792_vm6, %v3774_v28  ;;  %3806 = vst.msk [vmem:[%s7186_s4 + $0x68] sm:$0xff] %vm3792_vm6, %v3773_v34  ;;  %v3040_v49 = vpop.permute.xlu0 %3039  ;;  %v3035_v12 = vpop.permute.xlu1 %3034  ;;  %v2944_v23 = vmul.f32 %v7384_v41, %v7383_v33  ;;  %v7405_v41 = vld [vmem:[#allocation94_spill] sm:$0xff] }
 0x7d7   :  { %v3133_v36 = vadd.f32 %v3040_v49, %v2941_v58  ;;  %v3132_v25 = vadd.f32 %v3035_v12, %v2940_v46  ;;  %v7386_v58 = vld [vmem:[#allocation63_spill] sm:$0xff]  ;;  %v7387_v49 = vld [vmem:[#allocation90_spill] sm:$0xff] }
 0x7d9   :  { %v3325_v48 = vadd.f32 %v7367_v31, %v3133_v36  ;;  %v3324_v32 = vadd.f32 %v7368_v63, %v3132_v25  ;;  %v7388_v36 = vld [vmem:[#allocation87_spill] sm:$0xff] }
 0x7da   :  { %v3630_v57 = vpop.permute.xlu0 %3629  ;;  %v3628_v45 = vpop.permute.xlu1 %3627 }
 0x7db   :  { %v3710_v51 = vsel %vm3693_vm3, %v3325_v48, %v7369_v26  ;;  %v3709_v30 = vsel %vm3693_vm3, %v3324_v32, %v7370_v27  ;;  %v7389_v48 = vld [vmem:[#allocation105_spill] sm:$0xff]  ;;  %v7391_v26 = vld [vmem:[#allocation34_spill] sm:$0xff]  ;;  %v7392_v27 = vld [vmem:[#allocation32_spill] sm:$0xff] }
 0x7dc   :  { %v3743_v40 = vsel %vm3726_vm4, %v3710_v51, %v6747_v10  ;;  %v3742_v17 = vsel %vm3726_vm4, %v3709_v30, %v7371_v38  ;;  %v7393_v30 = vld [vmem:[#allocation31_spill] sm:$0xff] }
 0x7dd   :  { %v3776_v6 = vsel %vm3759_vm5, %v3743_v40, %v3630_v57  ;;  %v3775_v1 = vsel %vm3759_vm5, %v3742_v17, %v3628_v45  ;;  %v7390_v45 = vld [vmem:[#allocation37_spill] sm:$0xff]  ;;  %v2946_v40 = vmul.f32 %v7393_v30, %v7392_v27 }
 0x7de   :  { %3809 = vst.msk [vmem:[%s7186_s4 + $0x80] sm:$0xff] %vm3792_vm6, %v3776_v6  ;;  %3808 = vst.msk [vmem:[%s7186_s4 + $0x78] sm:$0xff] %vm3792_vm6, %v3775_v1  ;;  %v3050_v10 = vpop.permute.xlu0 %3049  ;;  %v3045_v50 = vpop.permute.xlu1 %3044  ;;  %v2947_v51 = vmul.f32 %v7391_v26, %v7390_v45  ;;  %v7394_v1 = vld [vmem:[#allocation68_spill] sm:$0xff] }
 0x7df   :  { %v3135_v19 = vadd.f32 %v3050_v10, %v2943_v0  ;;  %v3134_v55 = vadd.f32 %v3045_v50, %v2942_v15  ;;  %v7396_v15 = vld [vmem:[#allocation92_spill] sm:$0xff]  ;;  %v7397_v50 = vld [vmem:[#allocation89_spill] sm:$0xff] }
 0x7e0   :  { %v7414_v26 = vld [vmem:[#allocation72_spill] sm:$0xff] }
 0x7e1   :  { %v3327_v52 = vadd.f32 %v7376_v13, %v3135_v19  ;;  %v3326_v4 = vadd.f32 %v7377_v42, %v3134_v55  ;;  %v7398_v13 = vld [vmem:[#allocation106_spill] sm:$0xff] }
 0x7e2   :  { %v3634_v56 = vpop.permute.xlu0 %3633  ;;  %v3632_v24 = vpop.permute.xlu1 %3631 }
 0x7e3   :  { %v3712_v9 = vsel %vm3693_vm3, %v3327_v52, %v7378_v29  ;;  %v3711_v61 = vsel %vm3693_vm3, %v3326_v4, %v7379_v44  ;;  %v7402_v44 = vld [vmem:[#allocation36_spill] sm:$0xff] }
 0x7e4   :  { %v3745_v53 = vsel %vm3726_vm4, %v3712_v9, %v6752_v21  ;;  %v3744_v60 = vsel %vm3726_vm4, %v3711_v61, %v7380_v2  ;;  %v7401_v9 = vld [vmem:[#allocation35_spill] sm:$0xff] }
 0x7e5   :  { %v3778_v37 = vsel %vm3759_vm5, %v3745_v53, %v3634_v56  ;;  %v3777_v54 = vsel %vm3759_vm5, %v3744_v60, %v3632_v24  ;;  %v7399_v56 = vld [vmem:[#allocation39_spill] sm:$0xff]  ;;  %v7400_v24 = vld [vmem:[#allocation40_spill] sm:$0xff]  ;;  %v2948_v61 = vmul.f32 %v7402_v44, %v7401_v9 }
 0x7e6   :  { %3811 = vst.msk [vmem:[%s7186_s4 + $0x90] sm:$0xff] %vm3792_vm6, %v3778_v37  ;;  %3810 = vst.msk [vmem:[%s7186_s4 + $0x88] sm:$0xff] %vm3792_vm6, %v3777_v54  ;;  %v3060_v21 = vpop.permute.xlu0 %3059  ;;  %v3055_v43 = vpop.permute.xlu1 %3054  ;;  %v2949_v29 = vmul.f32 %v7400_v24, %v7399_v56  ;;  %v7403_v37 = vld [vmem:[#allocation70_spill] sm:$0xff] }
 0x7e7   :  { %v3137_v28 = vadd.f32 %v3060_v21, %v2945_v8  ;;  %v3136_v34 = vadd.f32 %v3055_v43, %v2944_v23  ;;  %v7406_v21 = vld [vmem:[#allocation91_spill] sm:$0xff] }
 0x7e9   :  { %v3329_v5 = vadd.f32 %v7385_v39, %v3137_v28  ;;  %v3328_v18 = vadd.f32 %v7386_v58, %v3136_v34  ;;  %v7407_v34 = vld [vmem:[#allocation107_spill] sm:$0xff] }
 0x7ea   :  { %v3638_v47 = vpop.permute.xlu0 %3637  ;;  %v3636_v46 = vpop.permute.xlu1 %3635 }
 0x7eb   :  { %v3714_v12 = vsel %vm3693_vm3, %v3329_v5, %v7387_v49  ;;  %v3713_v25 = vsel %vm3693_vm3, %v3328_v18, %v7388_v36  ;;  %v7408_v18 = vld [vmem:[#allocation43_spill] sm:$0xff]  ;;  %v7410_v36 = vld [vmem:[#allocation38_spill] sm:$0xff] }
 0x7ec   :  { %v3747_v31 = vsel %vm3726_vm4, %v3714_v12, %v6759_v59  ;;  %v3746_v63 = vsel %vm3726_vm4, %v3713_v25, %v7389_v48  ;;  %v7411_v25 = vld [vmem:[#allocation41_spill] sm:$0xff]  ;;  %v7412_v48 = vld [vmem:[#allocation47_spill] sm:$0xff] }
 0x7ed   :  { %v3780_v32 = vsel %vm3759_vm5, %v3747_v31, %v3638_v47  ;;  %v3779_v57 = vsel %vm3759_vm5, %v3746_v63, %v3636_v46  ;;  %v7409_v47 = vld [vmem:[#allocation44_spill] sm:$0xff]  ;;  %v2950_v31 = vmul.f32 %v7411_v25, %v7410_v36  ;;  %v7413_v63 = vld [vmem:[#allocation50_spill] sm:$0xff]  ;;  %v7436_v25 = vld [vmem:[#allocation109_spill] sm:$0xff] }
 0x7ee   :  { %3813 = vst.msk [vmem:[%s7186_s4 + $0xa0] sm:$0xff] %vm3792_vm6, %v3780_v32  ;;  %3812 = vst.msk [vmem:[%s7186_s4 + $0x98] sm:$0xff] %vm3792_vm6, %v3779_v57  ;;  %v3070_v59 = vpop.permute.xlu0 %3069  ;;  %v3065_v38 = vpop.permute.xlu1 %3064  ;;  %v2951_v46 = vmul.f32 %v7409_v47, %v7408_v18  ;;  %v2953_v32 = vmul.f32 %v7413_v63, %v7412_v48  ;;  %v7437_v63 = vld [vmem:[#allocation75_spill] sm:$0xff] }
 0x7ef   :  { %v3139_v17 = vadd.f32 %v3070_v59, %v2947_v51  ;;  %v3138_v6 = vadd.f32 %v3065_v38, %v2946_v40  ;;  %v7415_v40 = vld [vmem:[#allocation42_spill] sm:$0xff] }
 0x7f0   :  { %v7416_v59 = vld [vmem:[#allocation46_spill] sm:$0xff] }
 0x7f1   :  { %v3331_v35 = vadd.f32 %v7394_v1, %v3139_v17  ;;  %v3330_v0 = vadd.f32 %v7395_v7, %v3138_v6  ;;  %v2952_v38 = vmul.f32 %v7416_v59, %v7415_v40  ;;  %v7417_v17 = vld [vmem:[#allocation49_spill] sm:$0xff]  ;;  %v7418_v6 = vld [vmem:[#allocation52_spill] sm:$0xff] }
 0x7f2   :  { %v3642_v14 = vpop.permute.xlu0 %3641  ;;  %v3640_v22 = vpop.permute.xlu1 %3639  ;;  %v2955_v1 = vmul.f32 %v7418_v6, %v7417_v17  ;;  %v7441_v6 = vld [vmem:[#allocation112_spill] sm:$0xff] }
 0x7f3   :  { %v3716_v10 = vsel %vm3693_vm3, %v3331_v35, %v7396_v15  ;;  %v3715_v19 = vsel %vm3693_vm3, %v3330_v0, %v7397_v50  ;;  %v7420_v15 = vld [vmem:[#allocation74_spill] sm:$0xff] }
 0x7f4   :  { %v3749_v55 = vsel %vm3726_vm4, %v3716_v10, %v6765_v3  ;;  %v3748_v52 = vsel %vm3726_vm4, %v3715_v19, %v7398_v13  ;;  %v7421_v19 = vld [vmem:[#allocation96_spill] sm:$0xff]  ;;  %v7422_v13 = vld [vmem:[#allocation45_spill] sm:$0xff] }
 0x7f5   :  { %v3782_v42 = vsel %vm3759_vm5, %v3749_v55, %v3642_v14  ;;  %v3781_v4 = vsel %vm3759_vm5, %v3748_v52, %v3640_v22  ;;  %v7419_v14 = vld [vmem:[#allocation69_spill] sm:$0xff]  ;;  %v7423_v52 = vld [vmem:[#allocation51_spill] sm:$0xff] }
 0x7f6   :  { %3815 = vst.msk [vmem:[%s7186_s4 + $0xb0] sm:$0xff] %vm3792_vm6, %v3782_v42  ;;  %3814 = vst.msk [vmem:[%s7186_s4 + $0xa8] sm:$0xff] %vm3792_vm6, %v3781_v4  ;;  %v3080_v3 = vpop.permute.xlu0 %3079  ;;  %v3075_v53 = vpop.permute.xlu1 %3074  ;;  %v2954_v42 = vmul.f32 %v7423_v52, %v7422_v13  ;;  %v7424_v4 = vld [vmem:[#allocation71_spill] sm:$0xff] }
 0x7f7   :  { %v3141_v2 = vadd.f32 %v3080_v3, %v2949_v29  ;;  %v3140_v60 = vadd.f32 %v3075_v53, %v2948_v61  ;;  %v7425_v29 = vld [vmem:[#allocation110_spill] sm:$0xff]  ;;  %v7426_v3 = vld [vmem:[#allocation76_spill] sm:$0xff] }
 0x7f9   :  { %v3333_v54 = vadd.f32 %v7403_v37, %v3141_v2  ;;  %v3332_v11 = vadd.f32 %v7404_v20, %v3140_v60  ;;  %v7427_v60 = vld [vmem:[#allocation98_spill] sm:$0xff] }
 0x7fa   :  { %v3646_v8 = vpop.permute.xlu0 %3645  ;;  %v3644_v33 = vpop.permute.xlu1 %3643 }
 0x7fb   :  { %v3718_v23 = vsel %vm3693_vm3, %v3333_v54, %v7405_v41  ;;  %v3717_v43 = vsel %vm3693_vm3, %v3332_v11, %v7406_v21  ;;  %v7428_v54 = vld [vmem:[#allocation93_spill] sm:$0xff]  ;;  %v7429_v11 = vld [vmem:[#allocation48_spill] sm:$0xff] }
 0x7fc   :  { %v3751_v28 = vsel %vm3726_vm4, %v3718_v23, %v6770_v16  ;;  %v3750_v39 = vsel %vm3726_vm4, %v3717_v43, %v7407_v34  ;;  %v7431_v41 = vld [vmem:[#allocation73_spill] sm:$0xff] }
 0x7fd   :  { %v3784_v5 = vsel %vm3759_vm5, %v3751_v28, %v3646_v8  ;;  %v3783_v58 = vsel %vm3759_vm5, %v3750_v39, %v3644_v33  ;;  %v7430_v8 = vld [vmem:[#allocation53_spill] sm:$0xff]  ;;  %v7432_v28 = vld [vmem:[#allocation108_spill] sm:$0xff] }
 0x7fe   :  { %3817 = vst.msk [vmem:[%s7186_s4 + $0xc0] sm:$0xff] %vm3792_vm6, %v3784_v5  ;;  %3816 = vst.msk [vmem:[%s7186_s4 + $0xb8] sm:$0xff] %vm3792_vm6, %v3783_v58  ;;  %v3090_v16 = vpop.permute.xlu0 %3089  ;;  %v3085_v49 = vpop.permute.xlu1 %3084  ;;  %v2956_v33 = vmul.f32 %v7430_v8, %v7429_v11  ;;  %v7433_v5 = vld [vmem:[#allocation95_spill] sm:$0xff] }
 0x7ff   :  { %v3143_v12 = vadd.f32 %v3090_v16, %v2951_v46  ;;  %v3142_v27 = vadd.f32 %v3085_v49, %v2950_v31  ;;  %v7434_v16 = vld [vmem:[#allocation100_spill] sm:$0xff] }
 0x801   :  { %v3335_v51 = vadd.f32 %v7414_v26, %v3143_v12  ;;  %v3334_v22 = vadd.f32 %v7419_v14, %v3142_v27  ;;  %v7438_v26 = vld [vmem:[#allocation97_spill] sm:$0xff]  ;;  %v7439_v27 = vld [vmem:[#allocation111_spill] sm:$0xff] }
 0x802   :  { %v3100_v57 = vpop.permute.xlu0 %3099  ;;  %v3095_v45 = vpop.permute.xlu1 %3094 }
 0x803   :  { %v3145_v30 = vadd.f32 %v3100_v57, %v2953_v32  ;;  %v3144_v35 = vadd.f32 %v3095_v45, %v2952_v38  ;;  %v3720_v55 = vsel %vm3693_vm3, %v3335_v51, %v7421_v19  ;;  %v3719_v20 = vsel %vm3693_vm3, %v3334_v22, %v7428_v54  ;;  %v7440_v38 = vld [vmem:[#allocation99_spill] sm:$0xff] }
 0x804   :  { %v3753_v9 = vsel %vm3726_vm4, %v3720_v55, %v7425_v29  ;;  %v3752_v34 = vsel %vm3726_vm4, %v3719_v20, %v7432_v28 }
 0x805   :  { %v3337_v10 = vadd.f32 %v7420_v15, %v3145_v30  ;;  %v3336_v56 = vadd.f32 %v7424_v4, %v3144_v35 }
 0x806   :  { %v3110_v7 = vpop.permute.xlu0 %3109  ;;  %v3105_v0 = vpop.permute.xlu1 %3104 }
 0x807   :  { %v3147_v50 = vadd.f32 %v3110_v7, %v2955_v1  ;;  %v3146_v24 = vadd.f32 %v3105_v0, %v2954_v42  ;;  %v3722_v37 = vsel %vm3693_vm3, %v3337_v10, %v7427_v60  ;;  %v3721_v58 = vsel %vm3693_vm3, %v3336_v56, %v7433_v5 }
 0x808   :  { %v3755_v21 = vsel %vm3726_vm4, %v3722_v37, %v6785_v62  ;;  %v7435_v62 = vld [vmem:[#allocation113_spill] sm:$0xff]  ;;  %v3754_v31 = vsel %vm3726_vm4, %v3721_v58, %v7436_v25 }
 0x809   :  { %v3339_v53 = vadd.f32 %v7426_v3, %v3147_v50  ;;  %v3338_v23 = vadd.f32 %v7431_v41, %v3146_v24 }
 0x80a   :  { %v3650_v44 = vpop.permute.xlu0 %3649  ;;  %v3115_v61 = vpop.permute.xlu1 %3114 }
 0x80b   :  { %v3786_v2 = vsel %vm3759_vm5, %v3753_v9, %v3650_v44  ;;  %v3148_v18 = vadd.f32 %v3115_v61, %v2956_v33  ;;  %v3724_v49 = vsel %vm3693_vm3, %v3339_v53, %v7434_v16  ;;  %v3723_v51 = vsel %vm3693_vm3, %v3338_v23, %v7438_v26 }
 0x80c   :  { %3819 = vst.msk [vmem:[%s7186_s4 + $0xd0] sm:$0xff] %vm3792_vm6, %v3786_v2  ;;  %v3757_v12 = vsel %vm3726_vm4, %v3724_v49, %v7435_v62  ;;  %v3756_v30 = vsel %vm3726_vm4, %v3723_v51, %v7439_v27 }
 0x80d   :  { %v3340_v32 = vadd.f32 %v7437_v63, %v3148_v18 }
 0x80e   :  { %v3654_v43 = vpop.permute.xlu0 %3653  ;;  %v3648_v39 = vpop.permute.xlu1 %3647 }
 0x80f   :  { %v3788_v47 = vsel %vm3759_vm5, %v3755_v21, %v3654_v43  ;;  %v3785_v46 = vsel %vm3759_vm5, %v3752_v34, %v3648_v39  ;;  %v3725_v17 = vsel %vm3693_vm3, %v3340_v32, %v7440_v38 }
 0x810   :  { %3821 = vst.msk [vmem:[%s7186_s4 + $0xe0] sm:$0xff] %vm3792_vm6, %v3788_v47  ;;  %3818 = vst.msk [vmem:[%s7186_s4 + $0xc8] sm:$0xff] %vm3792_vm6, %v3785_v46  ;;  %v3758_v1 = vsel %vm3726_vm4, %v3725_v17, %v7441_v6 }
 0x812   :  { %v3658_v36 = vpop.permute.xlu0 %3657  ;;  %v3652_v48 = vpop.permute.xlu1 %3651 }
 0x813   :  { %v3790_v57 = vsel %vm3759_vm5, %v3757_v12, %v3658_v36  ;;  %v3787_v45 = vsel %vm3759_vm5, %v3754_v31, %v3652_v48 }
 0x814   :  { %3823 = vst.msk [vmem:[%s7186_s4 + $0xf0] sm:$0xff] %vm3792_vm6, %v3790_v57  ;;  %3820 = vst.msk [vmem:[%s7186_s4 + $0xd8] sm:$0xff] %vm3792_vm6, %v3787_v45 }
 0x816   :  { %v3656_v40 = vpop.permute.xlu1 %3655 }
 0x817   :  { %v3789_v59 = vsel %vm3759_vm5, %v3756_v30, %v3656_v40 }
 0x818   :  { %3822 = vst.msk [vmem:[%s7186_s4 + $0xe8] sm:$0xff] %vm3792_vm6, %v3789_v59 }
 0x81a   :  { %v3660_v35 = vpop.permute.xlu1 %3659 }
 0x81b   :  { %v3791_v7 = vsel %vm3759_vm5, %v3758_v1, %v3660_v35 }
 0x81c   :  { %3824 = vst.msk [vmem:[%s7186_s4 + $0xf8] sm:$0xff] %vm3792_vm6, %v3791_v7 }
 0x81d   :  { %3829 = vsyncpa [#allocation3], 1 }
 0x81e   :  { %3830 = vsyncpa [#allocation5], 1 }

</bundles_post_ra>
